<compile_context>
chip_gen: v5e
topology: v5e:2x2
jax: 0.10.0
libtpu: 0.0.40
codegen_flags: <defaults>
</compile_context>

<pallas_src>
import math
from functools import lru_cache

import jax
import jax.numpy as jnp
import numpy as np
from jax.experimental import pallas as pl
from jax.experimental.pallas import tpu as pltpu

LN_EPS = 1e-5
BN_EPS = 1e-5
_HIGHEST = jax.lax.Precision.HIGHEST

# Row layout of the packed per-channel parameter table (shared by wrapper & kernel).
_PROWS = (
    "ff1_ln_g", "ff1_ln_b", "ff1_b2",
    "att_ln_g", "att_ln_b", "bq", "bk", "bv", "ub", "vb", "bo",
    "cv_ln_g", "cv_ln_b", "cv_b1a", "cv_b1b", "bn_s", "bn_b", "cv_b2",
    "ff2_ln_g", "ff2_ln_b", "ff2_b2",
    "out_ln_g", "out_ln_b",
)
_PIDX = {n: i for i, n in enumerate(_PROWS)}


# ----------------------------- in-kernel helpers -----------------------------

def _layernorm(x, gamma, beta):
    mu = jnp.mean(x, axis=-1, keepdims=True)
    var = jnp.mean(jnp.square(x - mu), axis=-1, keepdims=True)
    return (x - mu) * jax.lax.rsqrt(var + LN_EPS) * gamma + beta


def _swish(x):
    return x * jax.nn.sigmoid(x)


def _ffn(x, ln_g, ln_b, w1, b1, w2, b2):
    """Conformer feed-forward module on a (T, D) f32 tile; bf16 MXU inputs, f32 acc."""
    h = _layernorm(x, ln_g, ln_b)
    h = jnp.dot(h.astype(w1.dtype), w1, preferred_element_type=jnp.float32) + b1
    h = _swish(h)
    return jnp.dot(h.astype(w2.dtype), w2, preferred_element_type=jnp.float32) + b2


def _roll_last(x, k):
    """Circular roll right by static k along the last (lane) axis.
    (pltpu.roll would use the XLU rotate; slice+concat kept for portable lowering
    in both compiled and interpret paths — identical semantics.)"""
    if k == 0:
        return x
    return jnp.concatenate([x[..., -k:], x[..., :-k]], axis=-1)


def _rel_shift(p):
    """Transformer-XL style relative shift of (H, T, T) positional scores.

    Exact equivalent of the zero-pad-column + reshape(T+1, T) + drop-first-row trick
    used by the PyTorch RelativeMultiHeadAttention, expressed with O(log T) fixed
    lane rolls + small iota masks (broadcast over heads):
        C[h, i, j] = P[h, i, (j - i - 1) mod T]
        R[h, i, j] = C[h, i, j]     for j <= i
                   = 0              for j == i + 1
                   = C[h, i+1, j]   for j >= i + 2
    """
    _, T, _ = p.shape
    # per-row roll amount (i + 1): fixed roll of 1 plus binary decomposition of i,
    # gated by (1, T, 1) row-bit masks (head/lane-broadcast, not (H, T, T) iotas).
    i_col = jax.lax.broadcasted_iota(jnp.int32, (1, T, 1), 1)
    c = _roll_last(p, 1 % T)
    for b in range(max(1, (T - 1).bit_length())):
        amt = (1 << b) % T
        if amt:
            c = jnp.where((i_col & (1 << b)) != 0, _roll_last(c, amt), c)

    i_idx = jax.lax.broadcasted_iota(jnp.int32, (1, T, T), 1)
    j_idx = jax.lax.broadcasted_iota(jnp.int32, (1, T, T), 2)
    c_up = jnp.concatenate([c[:, 1:, :], c[:, :1, :]], axis=1)   # rows shifted up by one
    return jnp.where(j_idx <= i_idx, c,
                     jnp.where(j_idx == i_idx + 1, 0.0, c_up))


# --------------------------------- fused kernel -------------------------------

def conformer_kernel(x_ref, posp_ref, ptab_ref, btab_ref,
                     f1_w1_ref, f1_w2_ref,
                     wq_ref, wk_ref, wv_ref, wo_ref,
                     c_w1a_ref, c_w1b_ref, dw_ref, c_w2_ref,
                     f2_w1_ref, f2_w2_ref,
                     out_ref):
    """One batch element per grid step:
    x += 0.5*FF1(x); x += MHSA_relpos(x); x += ConvModule(x); x += 0.5*FF2(x);
    out = LayerNorm(x)."""
    T, D = x_ref.shape
    H, _, Dh = posp_ref.shape
    K = dw_ref.shape[0]
    pad = (K - 1) // 2
    scale = 1.0 / math.sqrt(D)
    bf16 = jnp.bfloat16

    pt = ptab_ref[...]                                  # (N_rows, D) packed per-channel params
    bt = btab_ref[...]                                  # (2, Dff) FFN hidden biases
    row = lambda name: pt[_PIDX[name]:_PIDX[name] + 1, :]

    x = x_ref[...].astype(jnp.float32)

    # ---- macaron feed-forward #1 (half_step_residual=True) ----
    x = x + 0.5 * _ffn(x, row("ff1_ln_g"), row("ff1_ln_b"),
                       f1_w1_ref[...], bt[0:1, :], f1_w2_ref[...], row("ff1_b2"))

    # ---- multi-headed self-attention with relative positional encoding ----
    h = _layernorm(x, row("att_ln_g"), row("att_ln_b"))
    hb = h.astype(bf16)
    q = jnp.dot(hb, wq_ref[...], preferred_element_type=jnp.float32) + row("bq")
    k = jnp.dot(hb, wk_ref[...], preferred_element_type=jnp.float32) + row("bk")
    v = jnp.dot(hb, wv_ref[...], preferred_element_type=jnp.float32) + row("bv")

    # u/v biases added in flat (T, D) layout (== per-head broadcast), then bf16 for the MXU
    qu = (q + row("ub")).astype(bf16)
    qv = (q + row("vb")).astype(bf16)
    kb = k.astype(bf16)
    vb = v.astype(bf16)

    def split_heads(m):                                 # (T, H*Dh) -> (H, T, Dh)
        # TODO(synk): a single relayout (reshape + XLU transpose) would avoid the
        # per-head lane-slice copies; kept as slices for portable lowering.
        return jnp.concatenate(
            [m[:, hh * Dh:(hh + 1) * Dh][None] for hh in range(H)], axis=0)

    quh, qvh, kh, vh = split_heads(qu), split_heads(qv), split_heads(kb), split_heads(vb)
    ph = posp_ref[...]                                  # (H, T, Dh) bf16, pre-projected + pre-split

    bd = (((2,), (2,)), ((0,), (0,)))                   # contract Dh, batch over heads
    content = jax.lax.dot_general(quh, kh, bd, preferred_element_type=jnp.float32)
    pscore = jax.lax.dot_general(qvh, ph, bd, preferred_element_type=jnp.float32)
    s = (content + _rel_shift(pscore)) * scale          # (H, T, T)

    # TODO(synk): for long sequences replace this materialized (H, T, T) softmax with a
    # flash-style kv-tile loop (online softmax); fine within the VMEM budget at small T.
    s = s - jnp.max(s, axis=-1, keepdims=True)
    e = jnp.exp(s)
    attn = e * pl.reciprocal(jnp.sum(e, axis=-1, keepdims=True), approx=True)
    ctx_h = jax.lax.dot_general(attn.astype(bf16), vh, (((2,), (1,)), ((0,), (0,))),
                                preferred_element_type=jnp.float32)     # (H, T, Dh)
    ctx = jnp.concatenate([ctx_h[hh] for hh in range(H)], axis=-1)      # (T, D)
    o = jnp.dot(ctx.astype(bf16), wo_ref[...],
                preferred_element_type=jnp.float32) + row("bo")
    x = x + o

    # ---- conformer convolution module (channels-last) ----
    h = _layernorm(x, row("cv_ln_g"), row("cv_ln_b"))
    hb = h.astype(bf16)
    val = jnp.dot(hb, c_w1a_ref[...], preferred_element_type=jnp.float32) + row("cv_b1a")
    gat = jnp.dot(hb, c_w1b_ref[...], preferred_element_type=jnp.float32) + row("cv_b1b")
    g = val * jax.nn.sigmoid(gat)                       # GLU via two D->D GEMMs (no lane split)

    # depthwise conv along time: value-level zero-padded gate + K static-offset taps
    zpad = jnp.zeros((pad, D), jnp.float32)
    gp = jnp.concatenate([zpad, g, zpad], axis=0)       # (T + K - 1, D)
    dw = dw_ref[...]                                    # (K, D) taps
    acc = gp[0:T, :] * dw[0:1, :]
    for kk in range(1, K):
        acc = acc + gp[kk:kk + T, :] * dw[kk:kk + 1, :]

    y = acc * row("bn_s") + row("bn_b")                 # BatchNorm1d (eval, pre-folded)
    y = _swish(y)
    o = jnp.dot(y.astype(bf16), c_w2_ref[...],
                preferred_element_type=jnp.float32) + row("cv_b2")
    x = x + o                                           # conv residual

    # ---- macaron feed-forward #2 (half-step) + final LayerNorm (fused) ----
    x = x + 0.5 * _ffn(x, row("ff2_ln_g"), row("ff2_ln_b"),
                       f2_w1_ref[...], bt[1:2, :], f2_w2_ref[...], row("ff2_b2"))
    out_ref[...] = _layernorm(x, row("out_ln_g"), row("out_ln_b")).astype(out_ref.dtype)


# ------------------------------ pallas wrapper --------------------------------

@lru_cache(maxsize=None)
def sinusoidal_pe(T, D):
    """Cached sinusoidal positional-encoding table as a NumPy array.
    Returns NumPy (not jnp) so the lru_cache can never capture/leak a JAX tracer."""
    pos = np.arange(T, dtype=np.float32)[:, None]
    div = np.exp(np.arange(0, D, 2, dtype=np.float32) * (-math.log(10000.0) / D))
    pe = np.zeros((T, D), np.float32)
    pe[:, 0::2] = np.sin(pos * div)
    pe[:, 1::2] = np.cos(pos * div)
    return pe


def prepare_conformer_params(params, T):
    """One-time preprocessing (call OUTSIDE jit): bf16 weight casts, packed per-channel
    tables, folded BatchNorm, GLU weight split, transposed depthwise taps, and the
    pre-projected + head-split positional encodings."""
    pa, pc, pf1, pf2 = params["mhsa"], params["conv"], params["ff1"], params["ff2"]
    D = pa["wq"].shape[0]
    H, Dh = pa["ub"].shape
    K = pc["dw"].shape[1]
    assert K % 2 == 1, "depthwise kernel size must be odd for symmetric 'same' padding"
    assert D % H == 0
    bf16 = jnp.bfloat16

    bn_scale = pc["bn_w"] * jax.lax.rsqrt(pc["bn_var"] + BN_EPS)
    bn_shift = pc["bn_b"] - pc["bn_mean"] * bn_scale

    # positional projection pe @ wpos, head-split to (H, T, Dh), bf16 for the MXU
    pe = jnp.asarray(sinusoidal_pe(T, D))
    posp = jnp.dot(pe, pa["wpos"]).reshape(T, H, Dh).transpose(1, 0, 2).astype(bf16)

    ptab = jnp.stack([
        pf1["ln_g"], pf1["ln_b"], pf1["b2"],
        pa["ln_g"], pa["ln_b"], pa["bq"], pa["bk"], pa["bv"],
        pa["ub"].reshape(-1), pa["vb"].reshape(-1), pa["bo"],
        pc["ln_g"], pc["ln_b"], pc["bpw1"][:D], pc["bpw1"][D:],
        bn_scale, bn_shift, pc["bpw2"],
        pf2["ln_g"], pf2["ln_b"], pf2["b2"],
        params["ln_g"], params["ln_b"],
    ]).astype(jnp.float32)
    assert ptab.shape[0] == len(_PROWS)
    btab = jnp.stack([pf1["b1"], pf2["b1"]]).astype(jnp.float32)

    return dict(
        posp=posp, ptab=ptab, btab=btab,
        f1_w1=pf1["w1"].astype(bf16), f1_w2=pf1["w2"].astype(bf16),
        wq=pa["wq"].astype(bf16), wk=pa["wk"].astype(bf16),
        wv=pa["wv"].astype(bf16), wo=pa["wo"].astype(bf16),
        c_w1a=pc["wpw1"][:, :D].astype(bf16), c_w1b=pc["wpw1"][:, D:].astype(bf16),
        dw=jnp.transpose(pc["dw"]).astype(jnp.float32),       # (K, D) taps
        c_w2=pc["wpw2"].astype(bf16),
        f2_w1=pf2["w1"].astype(bf16), f2_w2=pf2["w2"].astype(bf16),
    )


def _vmem_limit_bytes():
    """Generation-aware VMEM budget: physical capacity minus ~16 MiB headroom
    (v5e/v6e 128 MiB -> 112 MiB, v7x 64 MiB -> 48 MiB)."""
    cap = 64 * 1024 * 1024
    try:
        cap = int(pltpu.get_tpu_info().vmem_capacity_bytes)
    except Exception:
        pass
    return max(cap - 16 * 1024 * 1024, 32 * 1024 * 1024)


def _const_spec(a):
    """Grid-invariant operand (weights/tables): full block, single-buffered."""
    nd = a.ndim
    idx = lambda b: (0,) * nd
    try:
        return pl.BlockSpec(a.shape, idx, pipeline_mode=pl.Buffered(1))
    except Exception:  # older jax without pipeline_mode / Buffered
        return pl.BlockSpec(a.shape, idx)


def conformer_block_pallas(x, w):
    """x: (B, T, D) f32; w: output of prepare_conformer_params()."""
    B, T, D = x.shape

    args = (x, w["posp"], w["ptab"], w["btab"],
            w["f1_w1"], w["f1_w2"],
            w["wq"], w["wk"], w["wv"], w["wo"],
            w["c_w1a"], w["c_w1b"], w["dw"], w["c_w2"],
            w["f2_w1"], w["f2_w2"])

    act_spec = pl.BlockSpec((None, T, D), lambda b: (b, 0, 0))   # one batch element / step
    cparams = pltpu.CompilerParams(
        dimension_semantics=("parallel",),        # megacore split over batch on v7x
        vmem_limit_bytes=_vmem_limit_bytes(),
    )
    # TODO(synk): for long T, add a time-tile grid axis + flash-style kv loop (with a
    # (K-1)-row conv halo) instead of whole-sequence blocks.
    return pl.pallas_call(
        conformer_kernel,
        grid=(B,),
        in_specs=[act_spec] + [_const_spec(a) for a in args[1:]],
        out_specs=act_spec,
        out_shape=jax.ShapeDtypeStruct((B, T, D), jnp.float32),
        compiler_params=cparams,
    )(*args)


# ---------------------------- pure-JAX reference ------------------------------

def _mm(a, b):
    return jnp.dot(a, b, precision=_HIGHEST)


def _layernorm_ref(x, g, b):
    mu = jnp.mean(x, -1, keepdims=True)
    var = jnp.mean(jnp.square(x - mu), -1, keepdims=True)
    return (x - mu) / jnp.sqrt(var + LN_EPS) * g + b


def _ff_ref(x, p):
    h = _layernorm_ref(x, p["ln_g"], p["ln_b"])
    h = _mm(h, p["w1"]) + p["b1"]
    h = h * jax.nn.sigmoid(h)
    return _mm(h, p["w2"]) + p["b2"]


def _rel_shift_ref(s):
    B, H, T1, T2 = s.shape
    z = jnp.zeros((B, H, T1, 1), s.dtype)
    padded = jnp.concatenate([z, s], axis=-1).reshape(B, H, T2 + 1, T1)
    return padded[:, :, 1:, :].reshape(B, H, T1, T2)


def _mhsa_ref(x, pe, p):
    B, T, D = x.shape
    H, Dh = p["ub"].shape
    h = _layernorm_ref(x, p["ln_g"], p["ln_b"])
    q = (_mm(h, p["wq"]) + p["bq"]).reshape(B, T, H, Dh)
    k = (_mm(h, p["wk"]) + p["bk"]).reshape(B, T, H, Dh).transpose(0, 2, 1, 3)
    v = (_mm(h, p["wv"]) + p["bv"]).reshape(B, T, H, Dh).transpose(0, 2, 1, 3)
    pos = _mm(pe, p["wpos"]).reshape(T, H, Dh)
    content = jnp.einsum("bihd,bhjd->bhij", q + p["ub"], k, precision=_HIGHEST)
    pscore = _rel_shift_ref(
        jnp.einsum("bihd,jhd->bhij", q + p["vb"], pos, precision=_HIGHEST))
    attn = jax.nn.softmax((content + pscore) / math.sqrt(D), axis=-1)
    ctx = jnp.einsum("bhij,bhjd->bihd", attn, v, precision=_HIGHEST).reshape(B, T, D)
    return _mm(ctx, p["wo"]) + p["bo"]


def _conv_ref(x, p):
    B, T, D = x.shape
    K = p["dw"].shape[1]
    pad = (K - 1) // 2
    h = _layernorm_ref(x, p["ln_g"], p["ln_b"])
    z = _mm(h, p["wpw1"]) + p["bpw1"]
    g = z[..., :D] * jax.nn.sigmoid(z[..., D:])
    y = jax.lax.conv_general_dilated(
        g.transpose(0, 2, 1), p["dw"][:, None, :], (1,), [(pad, pad)],
        dimension_numbers=("NCH", "OIH", "NCH"), feature_group_count=D,
        precision=_HIGHEST,
    ).transpose(0, 2, 1)
    y = (y - p["bn_mean"]) / jnp.sqrt(p["bn_var"] + BN_EPS) * p["bn_w"] + p["bn_b"]
    y = y * jax.nn.sigmoid(y)
    return _mm(y, p["wpw2"]) + p["bpw2"]


def conformer_block_ref(x, params):
    T, D = x.shape[1], x.shape[2]
    pe = jnp.asarray(sinusoidal_pe(T, D))
    x = x + 0.5 * _ff_ref(x, params["ff1"])
    x = x + _mhsa_ref(x, pe, params["mhsa"])
    x = x + _conv_ref(x, params["conv"])
    x = x + 0.5 * _ff_ref(x, params["ff2"])
    return _layernorm_ref(x, params["ln_g"], params["ln_b"])


# ------------------------------ params / main ---------------------------------

def init_params(key, D, H, ff_e, conv_e, K):
    Dh, Dff, Dc = D // H, D * ff_e, D * conv_e
    keys = iter(jax.random.split(key, 48))

    def nrm(shape, scale):
        return jax.random.normal(next(keys), shape, jnp.float32) * scale

    def ln_p():
        return {"ln_g": 1.0 + 0.1 * nrm((D,), 1.0), "ln_b": 0.1 * nrm((D,), 1.0)}

    def ff_p():
        return {**ln_p(),
                "w1": nrm((D, Dff), D ** -0.5), "b1": nrm((Dff,), 0.02),
                "w2": nrm((Dff, D), Dff ** -0.5), "b2": nrm((D,), 0.02)}

    mhsa = {**ln_p(),
            "wq": nrm((D, D), D ** -0.5), "bq": nrm((D,), 0.02),
            "wk": nrm((D, D), D ** -0.5), "bk": nrm((D,), 0.02),
            "wv": nrm((D, D), D ** -0.5), "bv": nrm((D,), 0.02),
            "wpos": nrm((D, D), D ** -0.5),
            "ub": nrm((H, Dh), Dh ** -0.5), "vb": nrm((H, Dh), Dh ** -0.5),
            "wo": nrm((D, D), D ** -0.5), "bo": nrm((D,), 0.02)}

    conv = {**ln_p(),
            "wpw1": nrm((D, Dc), D ** -0.5), "bpw1": nrm((Dc,), 0.02),
            "dw": nrm((D, K), K ** -0.5),
            "bn_w": 1.0 + 0.1 * nrm((D,), 1.0), "bn_b": 0.1 * nrm((D,), 1.0),
            "bn_mean": jnp.zeros((D,), jnp.float32),
            "bn_var": jnp.ones((D,), jnp.float32),
            "wpw2": nrm((D, D), D ** -0.5), "bpw2": nrm((D,), 0.02)}

    return {"ff1": ff_p(), "mhsa": mhsa, "conv": conv, "ff2": ff_p(), **ln_p()}


if __name__ == "__main__":
    B, T, D = 2, 16, 32          # (batch, time, encoder_dim)
    H, FF_E, CONV_E, K = 4, 4, 2, 7

    key = jax.random.PRNGKey(0)
    k_params, k_x = jax.random.split(key)
    params = init_params(k_params, D, H, FF_E, CONV_E, K)
    x = jax.random.normal(k_x, (B, T, D), jnp.float32)

    prep = prepare_conformer_params(params, T)        # one-time, outside jit
    out = jax.jit(conformer_block_pallas)(x, prep)
    out = jax.block_until_ready(out)

    ref = conformer_block_ref(x, params)
    err = float(jnp.max(jnp.abs(out - ref)))
    assert out.shape == (B, T, D)
    # bf16 MXU inputs everywhere (projections, FFNs AND attention score / attn@V GEMMs)
    # with f32 accumulation, vs. a full-f32 HIGHEST-precision reference -> 5e-2 tolerance.
    assert err < 5e-2, f"max abs error vs reference: {err}"
    print("KERNEL_OK")
</pallas_src>

<mosaic_0001>
module attributes {stable_mosaic.version = 11 : i64} {
  func.func @conformer_kernel(%arg0: i32, %arg1: memref<1x16x32xf32, #tpu.memory_space<vmem>>, %arg2: memref<4x16x8xbf16, #tpu.memory_space<vmem>>, %arg3: memref<23x32xf32, #tpu.memory_space<vmem>>, %arg4: memref<2x128xf32, #tpu.memory_space<vmem>>, %arg5: memref<32x128xbf16, #tpu.memory_space<vmem>>, %arg6: memref<128x32xbf16, #tpu.memory_space<vmem>>, %arg7: memref<32x32xbf16, #tpu.memory_space<vmem>>, %arg8: memref<32x32xbf16, #tpu.memory_space<vmem>>, %arg9: memref<32x32xbf16, #tpu.memory_space<vmem>>, %arg10: memref<32x32xbf16, #tpu.memory_space<vmem>>, %arg11: memref<32x32xbf16, #tpu.memory_space<vmem>>, %arg12: memref<32x32xbf16, #tpu.memory_space<vmem>>, %arg13: memref<7x32xf32, #tpu.memory_space<vmem>>, %arg14: memref<32x32xbf16, #tpu.memory_space<vmem>>, %arg15: memref<32x128xbf16, #tpu.memory_space<vmem>>, %arg16: memref<128x32xbf16, #tpu.memory_space<vmem>>, %arg17: memref<1x16x32xf32, #tpu.memory_space<vmem>>) attributes {dimension_semantics = [#tpu.dimension_semantics<parallel>], iteration_bounds = array<i64: 2>, scalar_prefetch = 0 : i64, scratch_operands = 0 : i64, tpu.core_type = #tpu.core_type<tc>, window_params = [{transform_indices = @transform_0, window_bounds = array<i64: 1, 16, 32>}, {pipeline_mode = #tpu.pipeline_mode<synchronous>, transform_indices = @transform_1, window_bounds = array<i64: 4, 16, 8>}, {pipeline_mode = #tpu.pipeline_mode<synchronous>, transform_indices = @transform_2, window_bounds = array<i64: 23, 32>}, {pipeline_mode = #tpu.pipeline_mode<synchronous>, transform_indices = @transform_3, window_bounds = array<i64: 2, 128>}, {pipeline_mode = #tpu.pipeline_mode<synchronous>, transform_indices = @transform_4, window_bounds = array<i64: 32, 128>}, {pipeline_mode = #tpu.pipeline_mode<synchronous>, transform_indices = @transform_5, window_bounds = array<i64: 128, 32>}, {pipeline_mode = #tpu.pipeline_mode<synchronous>, transform_indices = @transform_6, window_bounds = array<i64: 32, 32>}, {pipeline_mode = #tpu.pipeline_mode<synchronous>, transform_indices = @transform_7, window_bounds = array<i64: 32, 32>}, {pipeline_mode = #tpu.pipeline_mode<synchronous>, transform_indices = @transform_8, window_bounds = array<i64: 32, 32>}, {pipeline_mode = #tpu.pipeline_mode<synchronous>, transform_indices = @transform_9, window_bounds = array<i64: 32, 32>}, {pipeline_mode = #tpu.pipeline_mode<synchronous>, transform_indices = @transform_10, window_bounds = array<i64: 32, 32>}, {pipeline_mode = #tpu.pipeline_mode<synchronous>, transform_indices = @transform_11, window_bounds = array<i64: 32, 32>}, {pipeline_mode = #tpu.pipeline_mode<synchronous>, transform_indices = @transform_12, window_bounds = array<i64: 7, 32>}, {pipeline_mode = #tpu.pipeline_mode<synchronous>, transform_indices = @transform_13, window_bounds = array<i64: 32, 32>}, {pipeline_mode = #tpu.pipeline_mode<synchronous>, transform_indices = @transform_14, window_bounds = array<i64: 32, 128>}, {pipeline_mode = #tpu.pipeline_mode<synchronous>, transform_indices = @transform_15, window_bounds = array<i64: 128, 32>}, {transform_indices = @transform_16, window_bounds = array<i64: 1, 16, 32>}]} {
    %c0 = arith.constant 0 : index
    %c0_0 = arith.constant 0 : index
    %0 = vector.load %arg3[%c0, %c0_0] : memref<23x32xf32, #tpu.memory_space<vmem>>, vector<23x32xf32>
    %c0_1 = arith.constant 0 : index
    %c0_2 = arith.constant 0 : index
    %1 = vector.load %arg4[%c0_1, %c0_2] : memref<2x128xf32, #tpu.memory_space<vmem>>, vector<2x128xf32>
    %c0_3 = arith.constant 0 : index
    %c0_4 = arith.constant 0 : index
    %c0_5 = arith.constant 0 : index
    %2 = vector.load %arg1[%c0_3, %c0_4, %c0_5] : memref<1x16x32xf32, #tpu.memory_space<vmem>>, vector<1x16x32xf32>
    %3 = vector.shape_cast %2 : vector<1x16x32xf32> to vector<16x32xf32>
    %4 = vector.extract_strided_slice %0 {offsets = [0, 0], sizes = [1, 32], strides = [1, 1]} : vector<23x32xf32> to vector<1x32xf32>
    %5 = vector.extract_strided_slice %0 {offsets = [1, 0], sizes = [1, 32], strides = [1, 1]} : vector<23x32xf32> to vector<1x32xf32>
    %c0_6 = arith.constant 0 : index
    %c0_7 = arith.constant 0 : index
    %6 = vector.load %arg5[%c0_6, %c0_7] : memref<32x128xbf16, #tpu.memory_space<vmem>>, vector<32x128xbf16>
    %7 = vector.extract_strided_slice %1 {offsets = [0, 0], sizes = [1, 128], strides = [1, 1]} : vector<2x128xf32> to vector<1x128xf32>
    %c0_8 = arith.constant 0 : index
    %c0_9 = arith.constant 0 : index
    %8 = vector.load %arg6[%c0_8, %c0_9] : memref<128x32xbf16, #tpu.memory_space<vmem>>, vector<128x32xbf16>
    %9 = vector.extract_strided_slice %0 {offsets = [2, 0], sizes = [1, 32], strides = [1, 1]} : vector<23x32xf32> to vector<1x32xf32>
    %cst = arith.constant dense<0.000000e+00> : vector<16xf32>
    %10 = vector.multi_reduction <add>, %3, %cst [1] : vector<16x32xf32> to vector<16xf32>
    %11 = vector.shape_cast %10 : vector<16xf32> to vector<16x1xf32>
    %cst_10 = arith.constant 3.200000e+01 : f32
    %12 = vector.broadcast %cst_10 : f32 to vector<16x1xf32>
    %13 = arith.divf %11, %12 : vector<16x1xf32>
    %14 = vector.broadcast %13 : vector<16x1xf32> to vector<16x32xf32>
    %15 = arith.subf %3, %14 : vector<16x32xf32>
    %16 = arith.mulf %15, %15 : vector<16x32xf32>
    %cst_11 = arith.constant dense<0.000000e+00> : vector<16xf32>
    %17 = vector.multi_reduction <add>, %16, %cst_11 [1] : vector<16x32xf32> to vector<16xf32>
    %18 = vector.shape_cast %17 : vector<16xf32> to vector<16x1xf32>
    %cst_12 = arith.constant 3.200000e+01 : f32
    %19 = vector.broadcast %cst_12 : f32 to vector<16x1xf32>
    %20 = arith.divf %18, %19 : vector<16x1xf32>
    %21 = vector.broadcast %13 : vector<16x1xf32> to vector<16x32xf32>
    %22 = arith.subf %3, %21 : vector<16x32xf32>
    %cst_13 = arith.constant 9.99999974E-6 : f32
    %23 = vector.broadcast %cst_13 : f32 to vector<16x1xf32>
    %24 = arith.addf %20, %23 : vector<16x1xf32>
    %25 = math.rsqrt %24 : vector<16x1xf32>
    %26 = vector.broadcast %25 : vector<16x1xf32> to vector<16x32xf32>
    %27 = arith.mulf %22, %26 : vector<16x32xf32>
    %28 = vector.broadcast %4 : vector<1x32xf32> to vector<16x32xf32>
    %29 = arith.mulf %27, %28 : vector<16x32xf32>
    %30 = vector.broadcast %5 : vector<1x32xf32> to vector<16x32xf32>
    %31 = arith.addf %29, %30 : vector<16x32xf32>
    %32 = arith.truncf %31 : vector<16x32xf32> to vector<16x32xbf16>
    %cst_14 = arith.constant dense<0.000000e+00> : vector<16x128xf32>
    %33 = tpu.matmul %32, %6, %cst_14 {dimension_numbers = #tpu.dot_dimension_numbers<[1], [0], [0], [1], [0, 0, 1, 1], [], []>} : vector<16x32xbf16>, vector<32x128xbf16>, vector<16x128xf32> -> vector<16x128xf32>
    %34 = vector.broadcast %7 : vector<1x128xf32> to vector<16x128xf32>
    %35 = arith.addf %33, %34 : vector<16x128xf32>
    %36 = arith.negf %35 : vector<16x128xf32>
    %37 = math.exp %36 : vector<16x128xf32>
    %cst_15 = arith.constant 1.000000e+00 : f32
    %38 = vector.broadcast %cst_15 : f32 to vector<16x128xf32>
    %39 = arith.addf %38, %37 : vector<16x128xf32>
    %40 = arith.divf %38, %39 : vector<16x128xf32>
    %41 = arith.mulf %35, %40 : vector<16x128xf32>
    %42 = arith.truncf %41 : vector<16x128xf32> to vector<16x128xbf16>
    %cst_16 = arith.constant dense<0.000000e+00> : vector<16x32xf32>
    %43 = tpu.matmul %42, %8, %cst_16 {dimension_numbers = #tpu.dot_dimension_numbers<[1], [0], [0], [1], [0, 0, 1, 1], [], []>} : vector<16x128xbf16>, vector<128x32xbf16>, vector<16x32xf32> -> vector<16x32xf32>
    %44 = vector.broadcast %9 : vector<1x32xf32> to vector<16x32xf32>
    %45 = arith.addf %43, %44 : vector<16x32xf32>
    %cst_17 = arith.constant 5.000000e-01 : f32
    %46 = vector.broadcast %cst_17 : f32 to vector<16x32xf32>
    %47 = arith.mulf %46, %45 : vector<16x32xf32>
    %48 = arith.addf %3, %47 : vector<16x32xf32>
    %49 = vector.extract_strided_slice %0 {offsets = [3, 0], sizes = [1, 32], strides = [1, 1]} : vector<23x32xf32> to vector<1x32xf32>
    %50 = vector.extract_strided_slice %0 {offsets = [4, 0], sizes = [1, 32], strides = [1, 1]} : vector<23x32xf32> to vector<1x32xf32>
    %cst_18 = arith.constant dense<0.000000e+00> : vector<16xf32>
    %51 = vector.multi_reduction <add>, %48, %cst_18 [1] : vector<16x32xf32> to vector<16xf32>
    %52 = vector.shape_cast %51 : vector<16xf32> to vector<16x1xf32>
    %cst_19 = arith.constant 3.200000e+01 : f32
    %53 = vector.broadcast %cst_19 : f32 to vector<16x1xf32>
    %54 = arith.divf %52, %53 : vector<16x1xf32>
    %55 = vector.broadcast %54 : vector<16x1xf32> to vector<16x32xf32>
    %56 = arith.subf %48, %55 : vector<16x32xf32>
    %57 = arith.mulf %56, %56 : vector<16x32xf32>
    %cst_20 = arith.constant dense<0.000000e+00> : vector<16xf32>
    %58 = vector.multi_reduction <add>, %57, %cst_20 [1] : vector<16x32xf32> to vector<16xf32>
    %59 = vector.shape_cast %58 : vector<16xf32> to vector<16x1xf32>
    %cst_21 = arith.constant 3.200000e+01 : f32
    %60 = vector.broadcast %cst_21 : f32 to vector<16x1xf32>
    %61 = arith.divf %59, %60 : vector<16x1xf32>
    %62 = vector.broadcast %54 : vector<16x1xf32> to vector<16x32xf32>
    %63 = arith.subf %48, %62 : vector<16x32xf32>
    %cst_22 = arith.constant 9.99999974E-6 : f32
    %64 = vector.broadcast %cst_22 : f32 to vector<16x1xf32>
    %65 = arith.addf %61, %64 : vector<16x1xf32>
    %66 = math.rsqrt %65 : vector<16x1xf32>
    %67 = vector.broadcast %66 : vector<16x1xf32> to vector<16x32xf32>
    %68 = arith.mulf %63, %67 : vector<16x32xf32>
    %69 = vector.broadcast %49 : vector<1x32xf32> to vector<16x32xf32>
    %70 = arith.mulf %68, %69 : vector<16x32xf32>
    %71 = vector.broadcast %50 : vector<1x32xf32> to vector<16x32xf32>
    %72 = arith.addf %70, %71 : vector<16x32xf32>
    %73 = arith.truncf %72 : vector<16x32xf32> to vector<16x32xbf16>
    %c0_23 = arith.constant 0 : index
    %c0_24 = arith.constant 0 : index
    %74 = vector.load %arg7[%c0_23, %c0_24] : memref<32x32xbf16, #tpu.memory_space<vmem>>, vector<32x32xbf16>
    %cst_25 = arith.constant dense<0.000000e+00> : vector<16x32xf32>
    %75 = tpu.matmul %73, %74, %cst_25 {dimension_numbers = #tpu.dot_dimension_numbers<[1], [0], [0], [1], [0, 0, 1, 1], [], []>} : vector<16x32xbf16>, vector<32x32xbf16>, vector<16x32xf32> -> vector<16x32xf32>
    %76 = vector.extract_strided_slice %0 {offsets = [5, 0], sizes = [1, 32], strides = [1, 1]} : vector<23x32xf32> to vector<1x32xf32>
    %77 = vector.broadcast %76 : vector<1x32xf32> to vector<16x32xf32>
    %78 = arith.addf %75, %77 : vector<16x32xf32>
    %c0_26 = arith.constant 0 : index
    %c0_27 = arith.constant 0 : index
    %79 = vector.load %arg8[%c0_26, %c0_27] : memref<32x32xbf16, #tpu.memory_space<vmem>>, vector<32x32xbf16>
    %cst_28 = arith.constant dense<0.000000e+00> : vector<16x32xf32>
    %80 = tpu.matmul %73, %79, %cst_28 {dimension_numbers = #tpu.dot_dimension_numbers<[1], [0], [0], [1], [0, 0, 1, 1], [], []>} : vector<16x32xbf16>, vector<32x32xbf16>, vector<16x32xf32> -> vector<16x32xf32>
    %81 = vector.extract_strided_slice %0 {offsets = [6, 0], sizes = [1, 32], strides = [1, 1]} : vector<23x32xf32> to vector<1x32xf32>
    %82 = vector.broadcast %81 : vector<1x32xf32> to vector<16x32xf32>
    %83 = arith.addf %80, %82 : vector<16x32xf32>
    %c0_29 = arith.constant 0 : index
    %c0_30 = arith.constant 0 : index
    %84 = vector.load %arg9[%c0_29, %c0_30] : memref<32x32xbf16, #tpu.memory_space<vmem>>, vector<32x32xbf16>
    %cst_31 = arith.constant dense<0.000000e+00> : vector<16x32xf32>
    %85 = tpu.matmul %73, %84, %cst_31 {dimension_numbers = #tpu.dot_dimension_numbers<[1], [0], [0], [1], [0, 0, 1, 1], [], []>} : vector<16x32xbf16>, vector<32x32xbf16>, vector<16x32xf32> -> vector<16x32xf32>
    %86 = vector.extract_strided_slice %0 {offsets = [7, 0], sizes = [1, 32], strides = [1, 1]} : vector<23x32xf32> to vector<1x32xf32>
    %87 = vector.broadcast %86 : vector<1x32xf32> to vector<16x32xf32>
    %88 = arith.addf %85, %87 : vector<16x32xf32>
    %89 = vector.extract_strided_slice %0 {offsets = [8, 0], sizes = [1, 32], strides = [1, 1]} : vector<23x32xf32> to vector<1x32xf32>
    %90 = vector.broadcast %89 : vector<1x32xf32> to vector<16x32xf32>
    %91 = arith.addf %78, %90 : vector<16x32xf32>
    %92 = arith.truncf %91 : vector<16x32xf32> to vector<16x32xbf16>
    %93 = vector.extract_strided_slice %0 {offsets = [9, 0], sizes = [1, 32], strides = [1, 1]} : vector<23x32xf32> to vector<1x32xf32>
    %94 = vector.broadcast %93 : vector<1x32xf32> to vector<16x32xf32>
    %95 = arith.addf %78, %94 : vector<16x32xf32>
    %96 = arith.truncf %95 : vector<16x32xf32> to vector<16x32xbf16>
    %97 = arith.truncf %83 : vector<16x32xf32> to vector<16x32xbf16>
    %98 = arith.truncf %88 : vector<16x32xf32> to vector<16x32xbf16>
    %99 = vector.extract_strided_slice %92 {offsets = [0, 0], sizes = [16, 8], strides = [1, 1]} : vector<16x32xbf16> to vector<16x8xbf16>
    %100 = vector.shape_cast %99 : vector<16x8xbf16> to vector<1x16x8xbf16>
    %101 = vector.extract_strided_slice %92 {offsets = [0, 8], sizes = [16, 8], strides = [1, 1]} : vector<16x32xbf16> to vector<16x8xbf16>
    %102 = vector.shape_cast %101 : vector<16x8xbf16> to vector<1x16x8xbf16>
    %103 = vector.extract_strided_slice %92 {offsets = [0, 16], sizes = [16, 8], strides = [1, 1]} : vector<16x32xbf16> to vector<16x8xbf16>
    %104 = vector.shape_cast %103 : vector<16x8xbf16> to vector<1x16x8xbf16>
    %105 = vector.extract_strided_slice %92 {offsets = [0, 24], sizes = [16, 8], strides = [1, 1]} : vector<16x32xbf16> to vector<16x8xbf16>
    %106 = vector.shape_cast %105 : vector<16x8xbf16> to vector<1x16x8xbf16>
    %107 = tpu.concatenate %100, %102, %104, %106 in 0 : vector<1x16x8xbf16>, vector<1x16x8xbf16>, vector<1x16x8xbf16>, vector<1x16x8xbf16> -> vector<4x16x8xbf16>
    %108 = vector.extract_strided_slice %96 {offsets = [0, 0], sizes = [16, 8], strides = [1, 1]} : vector<16x32xbf16> to vector<16x8xbf16>
    %109 = vector.shape_cast %108 : vector<16x8xbf16> to vector<1x16x8xbf16>
    %110 = vector.extract_strided_slice %96 {offsets = [0, 8], sizes = [16, 8], strides = [1, 1]} : vector<16x32xbf16> to vector<16x8xbf16>
    %111 = vector.shape_cast %110 : vector<16x8xbf16> to vector<1x16x8xbf16>
    %112 = vector.extract_strided_slice %96 {offsets = [0, 16], sizes = [16, 8], strides = [1, 1]} : vector<16x32xbf16> to vector<16x8xbf16>
    %113 = vector.shape_cast %112 : vector<16x8xbf16> to vector<1x16x8xbf16>
    %114 = vector.extract_strided_slice %96 {offsets = [0, 24], sizes = [16, 8], strides = [1, 1]} : vector<16x32xbf16> to vector<16x8xbf16>
    %115 = vector.shape_cast %114 : vector<16x8xbf16> to vector<1x16x8xbf16>
    %116 = tpu.concatenate %109, %111, %113, %115 in 0 : vector<1x16x8xbf16>, vector<1x16x8xbf16>, vector<1x16x8xbf16>, vector<1x16x8xbf16> -> vector<4x16x8xbf16>
    %117 = vector.extract_strided_slice %97 {offsets = [0, 0], sizes = [16, 8], strides = [1, 1]} : vector<16x32xbf16> to vector<16x8xbf16>
    %118 = vector.shape_cast %117 : vector<16x8xbf16> to vector<1x16x8xbf16>
    %119 = vector.extract_strided_slice %97 {offsets = [0, 8], sizes = [16, 8], strides = [1, 1]} : vector<16x32xbf16> to vector<16x8xbf16>
    %120 = vector.shape_cast %119 : vector<16x8xbf16> to vector<1x16x8xbf16>
    %121 = vector.extract_strided_slice %97 {offsets = [0, 16], sizes = [16, 8], strides = [1, 1]} : vector<16x32xbf16> to vector<16x8xbf16>
    %122 = vector.shape_cast %121 : vector<16x8xbf16> to vector<1x16x8xbf16>
    %123 = vector.extract_strided_slice %97 {offsets = [0, 24], sizes = [16, 8], strides = [1, 1]} : vector<16x32xbf16> to vector<16x8xbf16>
    %124 = vector.shape_cast %123 : vector<16x8xbf16> to vector<1x16x8xbf16>
    %125 = tpu.concatenate %118, %120, %122, %124 in 0 : vector<1x16x8xbf16>, vector<1x16x8xbf16>, vector<1x16x8xbf16>, vector<1x16x8xbf16> -> vector<4x16x8xbf16>
    %126 = vector.extract_strided_slice %98 {offsets = [0, 0], sizes = [16, 8], strides = [1, 1]} : vector<16x32xbf16> to vector<16x8xbf16>
    %127 = vector.shape_cast %126 : vector<16x8xbf16> to vector<1x16x8xbf16>
    %128 = vector.extract_strided_slice %98 {offsets = [0, 8], sizes = [16, 8], strides = [1, 1]} : vector<16x32xbf16> to vector<16x8xbf16>
    %129 = vector.shape_cast %128 : vector<16x8xbf16> to vector<1x16x8xbf16>
    %130 = vector.extract_strided_slice %98 {offsets = [0, 16], sizes = [16, 8], strides = [1, 1]} : vector<16x32xbf16> to vector<16x8xbf16>
    %131 = vector.shape_cast %130 : vector<16x8xbf16> to vector<1x16x8xbf16>
    %132 = vector.extract_strided_slice %98 {offsets = [0, 24], sizes = [16, 8], strides = [1, 1]} : vector<16x32xbf16> to vector<16x8xbf16>
    %133 = vector.shape_cast %132 : vector<16x8xbf16> to vector<1x16x8xbf16>
    %134 = tpu.concatenate %127, %129, %131, %133 in 0 : vector<1x16x8xbf16>, vector<1x16x8xbf16>, vector<1x16x8xbf16>, vector<1x16x8xbf16> -> vector<4x16x8xbf16>
    %c0_32 = arith.constant 0 : index
    %c0_33 = arith.constant 0 : index
    %c0_34 = arith.constant 0 : index
    %135 = vector.load %arg2[%c0_32, %c0_33, %c0_34] : memref<4x16x8xbf16, #tpu.memory_space<vmem>>, vector<4x16x8xbf16>
    %cst_35 = arith.constant dense<0.000000e+00> : vector<4x16x16xf32>
    %136 = tpu.matmul %107, %125, %cst_35 {dimension_numbers = #tpu.dot_dimension_numbers<[2], [2], [1], [1], [0, 0, 0, 1, 1, 1], [0], [0]>} : vector<4x16x8xbf16>, vector<4x16x8xbf16>, vector<4x16x16xf32> -> vector<4x16x16xf32>
    %cst_36 = arith.constant dense<0.000000e+00> : vector<4x16x16xf32>
    %137 = tpu.matmul %116, %135, %cst_36 {dimension_numbers = #tpu.dot_dimension_numbers<[2], [2], [1], [1], [0, 0, 0, 1, 1, 1], [0], [0]>} : vector<4x16x8xbf16>, vector<4x16x8xbf16>, vector<4x16x16xf32> -> vector<4x16x16xf32>
    %138 = tpu.iota {dimensions = array<i32: 1>} : vector<1x16x1xi32>
    %139 = vector.extract_strided_slice %137 {offsets = [0, 0, 15], sizes = [4, 16, 1], strides = [1, 1, 1]} : vector<4x16x16xf32> to vector<4x16x1xf32>
    %140 = vector.extract_strided_slice %137 {offsets = [0, 0, 0], sizes = [4, 16, 15], strides = [1, 1, 1]} : vector<4x16x16xf32> to vector<4x16x15xf32>
    %141 = tpu.concatenate %139, %140 in 2 : vector<4x16x1xf32>, vector<4x16x15xf32> -> vector<4x16x16xf32>
    %c1_i32 = arith.constant 1 : i32
    %142 = vector.broadcast %c1_i32 : i32 to vector<1x16x1xi32>
    %143 = arith.andi %138, %142 : vector<1x16x1xi32>
    %c0_i32 = arith.constant 0 : i32
    %144 = vector.broadcast %c0_i32 : i32 to vector<1x16x1xi32>
    %145 = arith.cmpi ne, %143, %144 : vector<1x16x1xi32>
    %146 = vector.extract_strided_slice %141 {offsets = [0, 0, 15], sizes = [4, 16, 1], strides = [1, 1, 1]} : vector<4x16x16xf32> to vector<4x16x1xf32>
    %147 = vector.extract_strided_slice %141 {offsets = [0, 0, 0], sizes = [4, 16, 15], strides = [1, 1, 1]} : vector<4x16x16xf32> to vector<4x16x15xf32>
    %148 = tpu.concatenate %146, %147 in 2 : vector<4x16x1xf32>, vector<4x16x15xf32> -> vector<4x16x16xf32>
    %149 = vector.shape_cast %145 : vector<1x16x1xi1> to vector<1x16x1xi1>
    %150 = vector.broadcast %149 : vector<1x16x1xi1> to vector<4x16x16xi1>
    %151 = arith.select %150, %148, %141 : vector<4x16x16xi1>, vector<4x16x16xf32>
    %c2_i32 = arith.constant 2 : i32
    %152 = vector.broadcast %c2_i32 : i32 to vector<1x16x1xi32>
    %153 = arith.andi %138, %152 : vector<1x16x1xi32>
    %c0_i32_37 = arith.constant 0 : i32
    %154 = vector.broadcast %c0_i32_37 : i32 to vector<1x16x1xi32>
    %155 = arith.cmpi ne, %153, %154 : vector<1x16x1xi32>
    %156 = vector.extract_strided_slice %151 {offsets = [0, 0, 14], sizes = [4, 16, 2], strides = [1, 1, 1]} : vector<4x16x16xf32> to vector<4x16x2xf32>
    %157 = vector.extract_strided_slice %151 {offsets = [0, 0, 0], sizes = [4, 16, 14], strides = [1, 1, 1]} : vector<4x16x16xf32> to vector<4x16x14xf32>
    %158 = tpu.concatenate %156, %157 in 2 : vector<4x16x2xf32>, vector<4x16x14xf32> -> vector<4x16x16xf32>
    %159 = vector.shape_cast %155 : vector<1x16x1xi1> to vector<1x16x1xi1>
    %160 = vector.broadcast %159 : vector<1x16x1xi1> to vector<4x16x16xi1>
    %161 = arith.select %160, %158, %151 : vector<4x16x16xi1>, vector<4x16x16xf32>
    %c4_i32 = arith.constant 4 : i32
    %162 = vector.broadcast %c4_i32 : i32 to vector<1x16x1xi32>
    %163 = arith.andi %138, %162 : vector<1x16x1xi32>
    %c0_i32_38 = arith.constant 0 : i32
    %164 = vector.broadcast %c0_i32_38 : i32 to vector<1x16x1xi32>
    %165 = arith.cmpi ne, %163, %164 : vector<1x16x1xi32>
    %166 = vector.extract_strided_slice %161 {offsets = [0, 0, 12], sizes = [4, 16, 4], strides = [1, 1, 1]} : vector<4x16x16xf32> to vector<4x16x4xf32>
    %167 = vector.extract_strided_slice %161 {offsets = [0, 0, 0], sizes = [4, 16, 12], strides = [1, 1, 1]} : vector<4x16x16xf32> to vector<4x16x12xf32>
    %168 = tpu.concatenate %166, %167 in 2 : vector<4x16x4xf32>, vector<4x16x12xf32> -> vector<4x16x16xf32>
    %169 = vector.shape_cast %165 : vector<1x16x1xi1> to vector<1x16x1xi1>
    %170 = vector.broadcast %169 : vector<1x16x1xi1> to vector<4x16x16xi1>
    %171 = arith.select %170, %168, %161 : vector<4x16x16xi1>, vector<4x16x16xf32>
    %c8_i32 = arith.constant 8 : i32
    %172 = vector.broadcast %c8_i32 : i32 to vector<1x16x1xi32>
    %173 = arith.andi %138, %172 : vector<1x16x1xi32>
    %c0_i32_39 = arith.constant 0 : i32
    %174 = vector.broadcast %c0_i32_39 : i32 to vector<1x16x1xi32>
    %175 = arith.cmpi ne, %173, %174 : vector<1x16x1xi32>
    %176 = vector.extract_strided_slice %171 {offsets = [0, 0, 8], sizes = [4, 16, 8], strides = [1, 1, 1]} : vector<4x16x16xf32> to vector<4x16x8xf32>
    %177 = vector.extract_strided_slice %171 {offsets = [0, 0, 0], sizes = [4, 16, 8], strides = [1, 1, 1]} : vector<4x16x16xf32> to vector<4x16x8xf32>
    %178 = tpu.concatenate %176, %177 in 2 : vector<4x16x8xf32>, vector<4x16x8xf32> -> vector<4x16x16xf32>
    %179 = vector.shape_cast %175 : vector<1x16x1xi1> to vector<1x16x1xi1>
    %180 = vector.broadcast %179 : vector<1x16x1xi1> to vector<4x16x16xi1>
    %181 = arith.select %180, %178, %171 : vector<4x16x16xi1>, vector<4x16x16xf32>
    %182 = tpu.iota {dimensions = array<i32: 1>} : vector<1x16x16xi32>
    %183 = tpu.iota {dimensions = array<i32: 2>} : vector<1x16x16xi32>
    %184 = vector.extract_strided_slice %181 {offsets = [0, 1, 0], sizes = [4, 15, 16], strides = [1, 1, 1]} : vector<4x16x16xf32> to vector<4x15x16xf32>
    %185 = vector.extract_strided_slice %181 {offsets = [0, 0, 0], sizes = [4, 1, 16], strides = [1, 1, 1]} : vector<4x16x16xf32> to vector<4x1x16xf32>
    %186 = tpu.concatenate %184, %185 in 1 : vector<4x15x16xf32>, vector<4x1x16xf32> -> vector<4x16x16xf32>
    %187 = arith.cmpi sle, %183, %182 : vector<1x16x16xi32>
    %c1_i32_40 = arith.constant 1 : i32
    %188 = vector.broadcast %c1_i32_40 : i32 to vector<1x16x16xi32>
    %189 = arith.addi %182, %188 : vector<1x16x16xi32>
    %190 = arith.cmpi eq, %183, %189 : vector<1x16x16xi32>
    %cst_41 = arith.constant 0.000000e+00 : f32
    %191 = vector.shape_cast %190 : vector<1x16x16xi1> to vector<1x16x16xi1>
    %192 = vector.broadcast %191 : vector<1x16x16xi1> to vector<4x16x16xi1>
    %193 = vector.broadcast %cst_41 : f32 to vector<4x16x16xf32>
    %194 = arith.select %192, %193, %186 : vector<4x16x16xi1>, vector<4x16x16xf32>
    %195 = vector.shape_cast %187 : vector<1x16x16xi1> to vector<1x16x16xi1>
    %196 = vector.broadcast %195 : vector<1x16x16xi1> to vector<4x16x16xi1>
    %197 = arith.select %196, %181, %194 : vector<4x16x16xi1>, vector<4x16x16xf32>
    %198 = arith.addf %136, %197 : vector<4x16x16xf32>
    %cst_42 = arith.constant 0.176776692 : f32
    %199 = vector.broadcast %cst_42 : f32 to vector<4x16x16xf32>
    %200 = arith.mulf %198, %199 : vector<4x16x16xf32>
    %cst_43 = arith.constant dense<0xFF800000> : vector<4x16xf32>
    %201 = vector.multi_reduction <maximumf>, %200, %cst_43 [2] : vector<4x16x16xf32> to vector<4x16xf32>
    %202 = vector.shape_cast %201 : vector<4x16xf32> to vector<4x16x1xf32>
    %203 = vector.broadcast %202 : vector<4x16x1xf32> to vector<4x16x16xf32>
    %204 = arith.subf %200, %203 : vector<4x16x16xf32>
    %205 = math.exp %204 : vector<4x16x16xf32>
    %cst_44 = arith.constant dense<0.000000e+00> : vector<4x16xf32>
    %206 = vector.multi_reduction <add>, %205, %cst_44 [2] : vector<4x16x16xf32> to vector<4x16xf32>
    %207 = vector.shape_cast %206 : vector<4x16xf32> to vector<4x16x1xf32>
    %208 = tpu.reciprocal %207 {approx = true} : vector<4x16x1xf32> -> vector<4x16x1xf32>
    %209 = vector.broadcast %208 : vector<4x16x1xf32> to vector<4x16x16xf32>
    %210 = arith.mulf %205, %209 : vector<4x16x16xf32>
    %211 = arith.truncf %210 : vector<4x16x16xf32> to vector<4x16x16xbf16>
    %cst_45 = arith.constant dense<0.000000e+00> : vector<4x16x8xf32>
    %212 = tpu.matmul %211, %134, %cst_45 {dimension_numbers = #tpu.dot_dimension_numbers<[2], [1], [1], [2], [0, 0, 0, 1, 1, 2], [0], [0]>} : vector<4x16x16xbf16>, vector<4x16x8xbf16>, vector<4x16x8xf32> -> vector<4x16x8xf32>
    %213 = vector.extract_strided_slice %212 {offsets = [0, 0, 0], sizes = [1, 16, 8], strides = [1, 1, 1]} : vector<4x16x8xf32> to vector<1x16x8xf32>
    %214 = vector.shape_cast %213 : vector<1x16x8xf32> to vector<16x8xf32>
    %215 = vector.extract_strided_slice %212 {offsets = [1, 0, 0], sizes = [1, 16, 8], strides = [1, 1, 1]} : vector<4x16x8xf32> to vector<1x16x8xf32>
    %216 = vector.shape_cast %215 : vector<1x16x8xf32> to vector<16x8xf32>
    %217 = vector.extract_strided_slice %212 {offsets = [2, 0, 0], sizes = [1, 16, 8], strides = [1, 1, 1]} : vector<4x16x8xf32> to vector<1x16x8xf32>
    %218 = vector.shape_cast %217 : vector<1x16x8xf32> to vector<16x8xf32>
    %219 = vector.extract_strided_slice %212 {offsets = [3, 0, 0], sizes = [1, 16, 8], strides = [1, 1, 1]} : vector<4x16x8xf32> to vector<1x16x8xf32>
    %220 = vector.shape_cast %219 : vector<1x16x8xf32> to vector<16x8xf32>
    %221 = tpu.concatenate %214, %216, %218, %220 in 1 : vector<16x8xf32>, vector<16x8xf32>, vector<16x8xf32>, vector<16x8xf32> -> vector<16x32xf32>
    %222 = arith.truncf %221 : vector<16x32xf32> to vector<16x32xbf16>
    %c0_46 = arith.constant 0 : index
    %c0_47 = arith.constant 0 : index
    %223 = vector.load %arg10[%c0_46, %c0_47] : memref<32x32xbf16, #tpu.memory_space<vmem>>, vector<32x32xbf16>
    %cst_48 = arith.constant dense<0.000000e+00> : vector<16x32xf32>
    %224 = tpu.matmul %222, %223, %cst_48 {dimension_numbers = #tpu.dot_dimension_numbers<[1], [0], [0], [1], [0, 0, 1, 1], [], []>} : vector<16x32xbf16>, vector<32x32xbf16>, vector<16x32xf32> -> vector<16x32xf32>
    %225 = vector.extract_strided_slice %0 {offsets = [10, 0], sizes = [1, 32], strides = [1, 1]} : vector<23x32xf32> to vector<1x32xf32>
    %226 = vector.broadcast %225 : vector<1x32xf32> to vector<16x32xf32>
    %227 = arith.addf %224, %226 : vector<16x32xf32>
    %228 = arith.addf %48, %227 : vector<16x32xf32>
    %229 = vector.extract_strided_slice %0 {offsets = [11, 0], sizes = [1, 32], strides = [1, 1]} : vector<23x32xf32> to vector<1x32xf32>
    %230 = vector.extract_strided_slice %0 {offsets = [12, 0], sizes = [1, 32], strides = [1, 1]} : vector<23x32xf32> to vector<1x32xf32>
    %cst_49 = arith.constant dense<0.000000e+00> : vector<16xf32>
    %231 = vector.multi_reduction <add>, %228, %cst_49 [1] : vector<16x32xf32> to vector<16xf32>
    %232 = vector.shape_cast %231 : vector<16xf32> to vector<16x1xf32>
    %cst_50 = arith.constant 3.200000e+01 : f32
    %233 = vector.broadcast %cst_50 : f32 to vector<16x1xf32>
    %234 = arith.divf %232, %233 : vector<16x1xf32>
    %235 = vector.broadcast %234 : vector<16x1xf32> to vector<16x32xf32>
    %236 = arith.subf %228, %235 : vector<16x32xf32>
    %237 = arith.mulf %236, %236 : vector<16x32xf32>
    %cst_51 = arith.constant dense<0.000000e+00> : vector<16xf32>
    %238 = vector.multi_reduction <add>, %237, %cst_51 [1] : vector<16x32xf32> to vector<16xf32>
    %239 = vector.shape_cast %238 : vector<16xf32> to vector<16x1xf32>
    %cst_52 = arith.constant 3.200000e+01 : f32
    %240 = vector.broadcast %cst_52 : f32 to vector<16x1xf32>
    %241 = arith.divf %239, %240 : vector<16x1xf32>
    %242 = vector.broadcast %234 : vector<16x1xf32> to vector<16x32xf32>
    %243 = arith.subf %228, %242 : vector<16x32xf32>
    %cst_53 = arith.constant 9.99999974E-6 : f32
    %244 = vector.broadcast %cst_53 : f32 to vector<16x1xf32>
    %245 = arith.addf %241, %244 : vector<16x1xf32>
    %246 = math.rsqrt %245 : vector<16x1xf32>
    %247 = vector.broadcast %246 : vector<16x1xf32> to vector<16x32xf32>
    %248 = arith.mulf %243, %247 : vector<16x32xf32>
    %249 = vector.broadcast %229 : vector<1x32xf32> to vector<16x32xf32>
    %250 = arith.mulf %248, %249 : vector<16x32xf32>
    %251 = vector.broadcast %230 : vector<1x32xf32> to vector<16x32xf32>
    %252 = arith.addf %250, %251 : vector<16x32xf32>
    %253 = arith.truncf %252 : vector<16x32xf32> to vector<16x32xbf16>
    %c0_54 = arith.constant 0 : index
    %c0_55 = arith.constant 0 : index
    %254 = vector.load %arg11[%c0_54, %c0_55] : memref<32x32xbf16, #tpu.memory_space<vmem>>, vector<32x32xbf16>
    %cst_56 = arith.constant dense<0.000000e+00> : vector<16x32xf32>
    %255 = tpu.matmul %253, %254, %cst_56 {dimension_numbers = #tpu.dot_dimension_numbers<[1], [0], [0], [1], [0, 0, 1, 1], [], []>} : vector<16x32xbf16>, vector<32x32xbf16>, vector<16x32xf32> -> vector<16x32xf32>
    %256 = vector.extract_strided_slice %0 {offsets = [13, 0], sizes = [1, 32], strides = [1, 1]} : vector<23x32xf32> to vector<1x32xf32>
    %257 = vector.broadcast %256 : vector<1x32xf32> to vector<16x32xf32>
    %258 = arith.addf %255, %257 : vector<16x32xf32>
    %c0_57 = arith.constant 0 : index
    %c0_58 = arith.constant 0 : index
    %259 = vector.load %arg12[%c0_57, %c0_58] : memref<32x32xbf16, #tpu.memory_space<vmem>>, vector<32x32xbf16>
    %cst_59 = arith.constant dense<0.000000e+00> : vector<16x32xf32>
    %260 = tpu.matmul %253, %259, %cst_59 {dimension_numbers = #tpu.dot_dimension_numbers<[1], [0], [0], [1], [0, 0, 1, 1], [], []>} : vector<16x32xbf16>, vector<32x32xbf16>, vector<16x32xf32> -> vector<16x32xf32>
    %261 = vector.extract_strided_slice %0 {offsets = [14, 0], sizes = [1, 32], strides = [1, 1]} : vector<23x32xf32> to vector<1x32xf32>
    %262 = vector.broadcast %261 : vector<1x32xf32> to vector<16x32xf32>
    %263 = arith.addf %260, %262 : vector<16x32xf32>
    %264 = arith.negf %263 : vector<16x32xf32>
    %265 = math.exp %264 : vector<16x32xf32>
    %cst_60 = arith.constant 1.000000e+00 : f32
    %266 = vector.broadcast %cst_60 : f32 to vector<16x32xf32>
    %267 = arith.addf %266, %265 : vector<16x32xf32>
    %268 = arith.divf %266, %267 : vector<16x32xf32>
    %269 = arith.mulf %258, %268 : vector<16x32xf32>
    %cst_61 = arith.constant 0.000000e+00 : f32
    %270 = vector.broadcast %cst_61 : f32 to vector<3x32xf32>
    %271 = tpu.concatenate %270, %269, %270 in 0 : vector<3x32xf32>, vector<16x32xf32>, vector<3x32xf32> -> vector<22x32xf32>
    %c0_62 = arith.constant 0 : index
    %c0_63 = arith.constant 0 : index
    %272 = vector.load %arg13[%c0_62, %c0_63] : memref<7x32xf32, #tpu.memory_space<vmem>>, vector<7x32xf32>
    %273 = vector.extract_strided_slice %271 {offsets = [0, 0], sizes = [16, 32], strides = [1, 1]} : vector<22x32xf32> to vector<16x32xf32>
    %274 = vector.extract_strided_slice %272 {offsets = [0, 0], sizes = [1, 32], strides = [1, 1]} : vector<7x32xf32> to vector<1x32xf32>
    %275 = vector.broadcast %274 : vector<1x32xf32> to vector<16x32xf32>
    %276 = arith.mulf %273, %275 : vector<16x32xf32>
    %277 = vector.extract_strided_slice %271 {offsets = [1, 0], sizes = [16, 32], strides = [1, 1]} : vector<22x32xf32> to vector<16x32xf32>
    %278 = vector.extract_strided_slice %272 {offsets = [1, 0], sizes = [1, 32], strides = [1, 1]} : vector<7x32xf32> to vector<1x32xf32>
    %279 = vector.broadcast %278 : vector<1x32xf32> to vector<16x32xf32>
    %280 = arith.mulf %277, %279 : vector<16x32xf32>
    %281 = arith.addf %276, %280 : vector<16x32xf32>
    %282 = vector.extract_strided_slice %271 {offsets = [2, 0], sizes = [16, 32], strides = [1, 1]} : vector<22x32xf32> to vector<16x32xf32>
    %283 = vector.extract_strided_slice %272 {offsets = [2, 0], sizes = [1, 32], strides = [1, 1]} : vector<7x32xf32> to vector<1x32xf32>
    %284 = vector.broadcast %283 : vector<1x32xf32> to vector<16x32xf32>
    %285 = arith.mulf %282, %284 : vector<16x32xf32>
    %286 = arith.addf %281, %285 : vector<16x32xf32>
    %287 = vector.extract_strided_slice %271 {offsets = [3, 0], sizes = [16, 32], strides = [1, 1]} : vector<22x32xf32> to vector<16x32xf32>
    %288 = vector.extract_strided_slice %272 {offsets = [3, 0], sizes = [1, 32], strides = [1, 1]} : vector<7x32xf32> to vector<1x32xf32>
    %289 = vector.broadcast %288 : vector<1x32xf32> to vector<16x32xf32>
    %290 = arith.mulf %287, %289 : vector<16x32xf32>
    %291 = arith.addf %286, %290 : vector<16x32xf32>
    %292 = vector.extract_strided_slice %271 {offsets = [4, 0], sizes = [16, 32], strides = [1, 1]} : vector<22x32xf32> to vector<16x32xf32>
    %293 = vector.extract_strided_slice %272 {offsets = [4, 0], sizes = [1, 32], strides = [1, 1]} : vector<7x32xf32> to vector<1x32xf32>
    %294 = vector.broadcast %293 : vector<1x32xf32> to vector<16x32xf32>
    %295 = arith.mulf %292, %294 : vector<16x32xf32>
    %296 = arith.addf %291, %295 : vector<16x32xf32>
    %297 = vector.extract_strided_slice %271 {offsets = [5, 0], sizes = [16, 32], strides = [1, 1]} : vector<22x32xf32> to vector<16x32xf32>
    %298 = vector.extract_strided_slice %272 {offsets = [5, 0], sizes = [1, 32], strides = [1, 1]} : vector<7x32xf32> to vector<1x32xf32>
    %299 = vector.broadcast %298 : vector<1x32xf32> to vector<16x32xf32>
    %300 = arith.mulf %297, %299 : vector<16x32xf32>
    %301 = arith.addf %296, %300 : vector<16x32xf32>
    %302 = vector.extract_strided_slice %271 {offsets = [6, 0], sizes = [16, 32], strides = [1, 1]} : vector<22x32xf32> to vector<16x32xf32>
    %303 = vector.extract_strided_slice %272 {offsets = [6, 0], sizes = [1, 32], strides = [1, 1]} : vector<7x32xf32> to vector<1x32xf32>
    %304 = vector.broadcast %303 : vector<1x32xf32> to vector<16x32xf32>
    %305 = arith.mulf %302, %304 : vector<16x32xf32>
    %306 = arith.addf %301, %305 : vector<16x32xf32>
    %307 = vector.extract_strided_slice %0 {offsets = [15, 0], sizes = [1, 32], strides = [1, 1]} : vector<23x32xf32> to vector<1x32xf32>
    %308 = vector.broadcast %307 : vector<1x32xf32> to vector<16x32xf32>
    %309 = arith.mulf %306, %308 : vector<16x32xf32>
    %310 = vector.extract_strided_slice %0 {offsets = [16, 0], sizes = [1, 32], strides = [1, 1]} : vector<23x32xf32> to vector<1x32xf32>
    %311 = vector.broadcast %310 : vector<1x32xf32> to vector<16x32xf32>
    %312 = arith.addf %309, %311 : vector<16x32xf32>
    %313 = arith.negf %312 : vector<16x32xf32>
    %314 = math.exp %313 : vector<16x32xf32>
    %cst_64 = arith.constant 1.000000e+00 : f32
    %315 = vector.broadcast %cst_64 : f32 to vector<16x32xf32>
    %316 = arith.addf %315, %314 : vector<16x32xf32>
    %317 = arith.divf %315, %316 : vector<16x32xf32>
    %318 = arith.mulf %312, %317 : vector<16x32xf32>
    %319 = arith.truncf %318 : vector<16x32xf32> to vector<16x32xbf16>
    %c0_65 = arith.constant 0 : index
    %c0_66 = arith.constant 0 : index
    %320 = vector.load %arg14[%c0_65, %c0_66] : memref<32x32xbf16, #tpu.memory_space<vmem>>, vector<32x32xbf16>
    %cst_67 = arith.constant dense<0.000000e+00> : vector<16x32xf32>
    %321 = tpu.matmul %319, %320, %cst_67 {dimension_numbers = #tpu.dot_dimension_numbers<[1], [0], [0], [1], [0, 0, 1, 1], [], []>} : vector<16x32xbf16>, vector<32x32xbf16>, vector<16x32xf32> -> vector<16x32xf32>
    %322 = vector.extract_strided_slice %0 {offsets = [17, 0], sizes = [1, 32], strides = [1, 1]} : vector<23x32xf32> to vector<1x32xf32>
    %323 = vector.broadcast %322 : vector<1x32xf32> to vector<16x32xf32>
    %324 = arith.addf %321, %323 : vector<16x32xf32>
    %325 = arith.addf %228, %324 : vector<16x32xf32>
    %326 = vector.extract_strided_slice %0 {offsets = [18, 0], sizes = [1, 32], strides = [1, 1]} : vector<23x32xf32> to vector<1x32xf32>
    %327 = vector.extract_strided_slice %0 {offsets = [19, 0], sizes = [1, 32], strides = [1, 1]} : vector<23x32xf32> to vector<1x32xf32>
    %c0_68 = arith.constant 0 : index
    %c0_69 = arith.constant 0 : index
    %328 = vector.load %arg15[%c0_68, %c0_69] : memref<32x128xbf16, #tpu.memory_space<vmem>>, vector<32x128xbf16>
    %329 = vector.extract_strided_slice %1 {offsets = [1, 0], sizes = [1, 128], strides = [1, 1]} : vector<2x128xf32> to vector<1x128xf32>
    %c0_70 = arith.constant 0 : index
    %c0_71 = arith.constant 0 : index
    %330 = vector.load %arg16[%c0_70, %c0_71] : memref<128x32xbf16, #tpu.memory_space<vmem>>, vector<128x32xbf16>
    %331 = vector.extract_strided_slice %0 {offsets = [20, 0], sizes = [1, 32], strides = [1, 1]} : vector<23x32xf32> to vector<1x32xf32>
    %cst_72 = arith.constant dense<0.000000e+00> : vector<16xf32>
    %332 = vector.multi_reduction <add>, %325, %cst_72 [1] : vector<16x32xf32> to vector<16xf32>
    %333 = vector.shape_cast %332 : vector<16xf32> to vector<16x1xf32>
    %cst_73 = arith.constant 3.200000e+01 : f32
    %334 = vector.broadcast %cst_73 : f32 to vector<16x1xf32>
    %335 = arith.divf %333, %334 : vector<16x1xf32>
    %336 = vector.broadcast %335 : vector<16x1xf32> to vector<16x32xf32>
    %337 = arith.subf %325, %336 : vector<16x32xf32>
    %338 = arith.mulf %337, %337 : vector<16x32xf32>
    %cst_74 = arith.constant dense<0.000000e+00> : vector<16xf32>
    %339 = vector.multi_reduction <add>, %338, %cst_74 [1] : vector<16x32xf32> to vector<16xf32>
    %340 = vector.shape_cast %339 : vector<16xf32> to vector<16x1xf32>
    %cst_75 = arith.constant 3.200000e+01 : f32
    %341 = vector.broadcast %cst_75 : f32 to vector<16x1xf32>
    %342 = arith.divf %340, %341 : vector<16x1xf32>
    %343 = vector.broadcast %335 : vector<16x1xf32> to vector<16x32xf32>
    %344 = arith.subf %325, %343 : vector<16x32xf32>
    %cst_76 = arith.constant 9.99999974E-6 : f32
    %345 = vector.broadcast %cst_76 : f32 to vector<16x1xf32>
    %346 = arith.addf %342, %345 : vector<16x1xf32>
    %347 = math.rsqrt %346 : vector<16x1xf32>
    %348 = vector.broadcast %347 : vector<16x1xf32> to vector<16x32xf32>
    %349 = arith.mulf %344, %348 : vector<16x32xf32>
    %350 = vector.broadcast %326 : vector<1x32xf32> to vector<16x32xf32>
    %351 = arith.mulf %349, %350 : vector<16x32xf32>
    %352 = vector.broadcast %327 : vector<1x32xf32> to vector<16x32xf32>
    %353 = arith.addf %351, %352 : vector<16x32xf32>
    %354 = arith.truncf %353 : vector<16x32xf32> to vector<16x32xbf16>
    %cst_77 = arith.constant dense<0.000000e+00> : vector<16x128xf32>
    %355 = tpu.matmul %354, %328, %cst_77 {dimension_numbers = #tpu.dot_dimension_numbers<[1], [0], [0], [1], [0, 0, 1, 1], [], []>} : vector<16x32xbf16>, vector<32x128xbf16>, vector<16x128xf32> -> vector<16x128xf32>
    %356 = vector.broadcast %329 : vector<1x128xf32> to vector<16x128xf32>
    %357 = arith.addf %355, %356 : vector<16x128xf32>
    %358 = arith.negf %357 : vector<16x128xf32>
    %359 = math.exp %358 : vector<16x128xf32>
    %cst_78 = arith.constant 1.000000e+00 : f32
    %360 = vector.broadcast %cst_78 : f32 to vector<16x128xf32>
    %361 = arith.addf %360, %359 : vector<16x128xf32>
    %362 = arith.divf %360, %361 : vector<16x128xf32>
    %363 = arith.mulf %357, %362 : vector<16x128xf32>
    %364 = arith.truncf %363 : vector<16x128xf32> to vector<16x128xbf16>
    %cst_79 = arith.constant dense<0.000000e+00> : vector<16x32xf32>
    %365 = tpu.matmul %364, %330, %cst_79 {dimension_numbers = #tpu.dot_dimension_numbers<[1], [0], [0], [1], [0, 0, 1, 1], [], []>} : vector<16x128xbf16>, vector<128x32xbf16>, vector<16x32xf32> -> vector<16x32xf32>
    %366 = vector.broadcast %331 : vector<1x32xf32> to vector<16x32xf32>
    %367 = arith.addf %365, %366 : vector<16x32xf32>
    %cst_80 = arith.constant 5.000000e-01 : f32
    %368 = vector.broadcast %cst_80 : f32 to vector<16x32xf32>
    %369 = arith.mulf %368, %367 : vector<16x32xf32>
    %370 = arith.addf %325, %369 : vector<16x32xf32>
    %371 = vector.extract_strided_slice %0 {offsets = [21, 0], sizes = [1, 32], strides = [1, 1]} : vector<23x32xf32> to vector<1x32xf32>
    %372 = vector.extract_strided_slice %0 {offsets = [22, 0], sizes = [1, 32], strides = [1, 1]} : vector<23x32xf32> to vector<1x32xf32>
    %cst_81 = arith.constant dense<0.000000e+00> : vector<16xf32>
    %373 = vector.multi_reduction <add>, %370, %cst_81 [1] : vector<16x32xf32> to vector<16xf32>
    %374 = vector.shape_cast %373 : vector<16xf32> to vector<16x1xf32>
    %cst_82 = arith.constant 3.200000e+01 : f32
    %375 = vector.broadcast %cst_82 : f32 to vector<16x1xf32>
    %376 = arith.divf %374, %375 : vector<16x1xf32>
    %377 = vector.broadcast %376 : vector<16x1xf32> to vector<16x32xf32>
    %378 = arith.subf %370, %377 : vector<16x32xf32>
    %379 = arith.mulf %378, %378 : vector<16x32xf32>
    %cst_83 = arith.constant dense<0.000000e+00> : vector<16xf32>
    %380 = vector.multi_reduction <add>, %379, %cst_83 [1] : vector<16x32xf32> to vector<16xf32>
    %381 = vector.shape_cast %380 : vector<16xf32> to vector<16x1xf32>
    %cst_84 = arith.constant 3.200000e+01 : f32
    %382 = vector.broadcast %cst_84 : f32 to vector<16x1xf32>
    %383 = arith.divf %381, %382 : vector<16x1xf32>
    %384 = vector.broadcast %376 : vector<16x1xf32> to vector<16x32xf32>
    %385 = arith.subf %370, %384 : vector<16x32xf32>
    %cst_85 = arith.constant 9.99999974E-6 : f32
    %386 = vector.broadcast %cst_85 : f32 to vector<16x1xf32>
    %387 = arith.addf %383, %386 : vector<16x1xf32>
    %388 = math.rsqrt %387 : vector<16x1xf32>
    %389 = vector.broadcast %388 : vector<16x1xf32> to vector<16x32xf32>
    %390 = arith.mulf %385, %389 : vector<16x32xf32>
    %391 = vector.broadcast %371 : vector<1x32xf32> to vector<16x32xf32>
    %392 = arith.mulf %390, %391 : vector<16x32xf32>
    %393 = vector.broadcast %372 : vector<1x32xf32> to vector<16x32xf32>
    %394 = arith.addf %392, %393 : vector<16x32xf32>
    %c0_86 = arith.constant 0 : index
    %c0_87 = arith.constant 0 : index
    %c0_88 = arith.constant 0 : index
    %395 = vector.load %arg17[%c0_86, %c0_87, %c0_88] : memref<1x16x32xf32, #tpu.memory_space<vmem>>, vector<1x16x32xf32>
    %396 = vector.shape_cast %395 : vector<1x16x32xf32> to vector<16x32xf32>
    %397 = vector.shape_cast %394 : vector<16x32xf32> to vector<1x16x32xf32>
    tpu.vector_store %arg17[%c0_86, %c0_87, %c0_88], %397 {strides = array<i32>} : memref<1x16x32xf32, #tpu.memory_space<vmem>>, vector<1x16x32xf32>,
    return
  }
  func.func @transform_0(%arg0: i32) -> (i32, i32, i32) {
    %c0_i32 = arith.constant 0 : i32
    %c0_i32_0 = arith.constant 0 : i32
    %c0_i32_1 = arith.constant 0 : i32
    return %arg0, %c0_i32, %c0_i32_0 : i32, i32, i32
  }
  func.func @transform_1(%arg0: i32) -> (i32, i32, i32) {
    %c0_i32 = arith.constant 0 : i32
    %c0_i32_0 = arith.constant 0 : i32
    %c0_i32_1 = arith.constant 0 : i32
    %c0_i32_2 = arith.constant 0 : i32
    return %c0_i32, %c0_i32_0, %c0_i32_1 : i32, i32, i32
  }
  func.func @transform_2(%arg0: i32) -> (i32, i32) {
    %c0_i32 = arith.constant 0 : i32
    %c0_i32_0 = arith.constant 0 : i32
    %c0_i32_1 = arith.constant 0 : i32
    return %c0_i32, %c0_i32_0 : i32, i32
  }
  func.func @transform_3(%arg0: i32) -> (i32, i32) {
    %c0_i32 = arith.constant 0 : i32
    %c0_i32_0 = arith.constant 0 : i32
    %c0_i32_1 = arith.constant 0 : i32
    return %c0_i32, %c0_i32_0 : i32, i32
  }
  func.func @transform_4(%arg0: i32) -> (i32, i32) {
    %c0_i32 = arith.constant 0 : i32
    %c0_i32_0 = arith.constant 0 : i32
    %c0_i32_1 = arith.constant 0 : i32
    return %c0_i32, %c0_i32_0 : i32, i32
  }
  func.func @transform_5(%arg0: i32) -> (i32, i32) {
    %c0_i32 = arith.constant 0 : i32
    %c0_i32_0 = arith.constant 0 : i32
    %c0_i32_1 = arith.constant 0 : i32
    return %c0_i32, %c0_i32_0 : i32, i32
  }
  func.func @transform_6(%arg0: i32) -> (i32, i32) {
    %c0_i32 = arith.constant 0 : i32
    %c0_i32_0 = arith.constant 0 : i32
    %c0_i32_1 = arith.constant 0 : i32
    return %c0_i32, %c0_i32_0 : i32, i32
  }
  func.func @transform_7(%arg0: i32) -> (i32, i32) {
    %c0_i32 = arith.constant 0 : i32
    %c0_i32_0 = arith.constant 0 : i32
    %c0_i32_1 = arith.constant 0 : i32
    return %c0_i32, %c0_i32_0 : i32, i32
  }
  func.func @transform_8(%arg0: i32) -> (i32, i32) {
    %c0_i32 = arith.constant 0 : i32
    %c0_i32_0 = arith.constant 0 : i32
    %c0_i32_1 = arith.constant 0 : i32
    return %c0_i32, %c0_i32_0 : i32, i32
  }
  func.func @transform_9(%arg0: i32) -> (i32, i32) {
    %c0_i32 = arith.constant 0 : i32
    %c0_i32_0 = arith.constant 0 : i32
    %c0_i32_1 = arith.constant 0 : i32
    return %c0_i32, %c0_i32_0 : i32, i32
  }
  func.func @transform_10(%arg0: i32) -> (i32, i32) {
    %c0_i32 = arith.constant 0 : i32
    %c0_i32_0 = arith.constant 0 : i32
    %c0_i32_1 = arith.constant 0 : i32
    return %c0_i32, %c0_i32_0 : i32, i32
  }
  func.func @transform_11(%arg0: i32) -> (i32, i32) {
    %c0_i32 = arith.constant 0 : i32
    %c0_i32_0 = arith.constant 0 : i32
    %c0_i32_1 = arith.constant 0 : i32
    return %c0_i32, %c0_i32_0 : i32, i32
  }
  func.func @transform_12(%arg0: i32) -> (i32, i32) {
    %c0_i32 = arith.constant 0 : i32
    %c0_i32_0 = arith.constant 0 : i32
    %c0_i32_1 = arith.constant 0 : i32
    return %c0_i32, %c0_i32_0 : i32, i32
  }
  func.func @transform_13(%arg0: i32) -> (i32, i32) {
    %c0_i32 = arith.constant 0 : i32
    %c0_i32_0 = arith.constant 0 : i32
    %c0_i32_1 = arith.constant 0 : i32
    return %c0_i32, %c0_i32_0 : i32, i32
  }
  func.func @transform_14(%arg0: i32) -> (i32, i32) {
    %c0_i32 = arith.constant 0 : i32
    %c0_i32_0 = arith.constant 0 : i32
    %c0_i32_1 = arith.constant 0 : i32
    return %c0_i32, %c0_i32_0 : i32, i32
  }
  func.func @transform_15(%arg0: i32) -> (i32, i32) {
    %c0_i32 = arith.constant 0 : i32
    %c0_i32_0 = arith.constant 0 : i32
    %c0_i32_1 = arith.constant 0 : i32
    return %c0_i32, %c0_i32_0 : i32, i32
  }
  func.func @transform_16(%arg0: i32) -> (i32, i32, i32) {
    %c0_i32 = arith.constant 0 : i32
    %c0_i32_0 = arith.constant 0 : i32
    %c0_i32_1 = arith.constant 0 : i32
    return %arg0, %c0_i32, %c0_i32_0 : i32, i32, i32
  }
}

</mosaic_0001>

<bundles_post_ra>
// kernel: conformer_block_pallas.1
= control target key start
LH: loop header
LB: loop body
LE: loop exit
PB: predicated region body
PF: predicated region fallthrough
CT: control target
= control target key end

     0   :  { %s4169_s0 = inlined_call_operand.vmem [shape: f32[2,16,32], index: 0, kind: input, shape index: {}]   ;;  %s4170_s1 = inlined_call_operand.vmem [shape: bf16[4,16,8], index: 1, kind: input, shape index: {}]   ;;  %s4171_s2 = inlined_call_operand.vmem [shape: f32[23,32], index: 2, kind: input, shape index: {}]   ;;  %s4172_s3 = inlined_call_operand.hbm [shape: f32[2,128], index: 3, kind: input, shape index: {}]   ;;  %s4173_s4 = inlined_call_operand.vmem [shape: bf16[32,128], index: 4, kind: input, shape index: {}]   ;;  %s4174_s5 = inlined_call_operand.vmem [shape: bf16[128,32], index: 5, kind: input, shape index: {}]   ;;  %s4175_s6 = inlined_call_operand.vmem [shape: bf16[32,32], index: 6, kind: input, shape index: {}]   ;;  %s4176_s7 = inlined_call_operand.vmem [shape: bf16[32,32], index: 7, kind: input, shape index: {}]   ;;  %s4177_s8 = inlined_call_operand.vmem [shape: bf16[32,32], index: 8, kind: input, shape index: {}]   ;;  %s4178_s9 = inlined_call_operand.vmem [shape: bf16[32,32], index: 9, kind: input, shape index: {}]   ;;  %s4179_s10 = inlined_call_operand.vmem [shape: bf16[32,32], index: 10, kind: input, shape index: {}]   ;;  %s4180_s11 = inlined_call_operand.vmem [shape: bf16[32,32], index: 11, kind: input, shape index: {}]   ;;  %s4181_s12 = inlined_call_operand.vmem [shape: f32[7,32], index: 12, kind: input, shape index: {}]   ;;  %s4182_s13 = inlined_call_operand.hbm [shape: bf16[32,32], index: 13, kind: input, shape index: {}]   ;;  %s4183_s14 = inlined_call_operand.hbm [shape: bf16[32,128], index: 14, kind: input, shape index: {}]   ;;  %s4184_s15 = inlined_call_operand.vmem [shape: bf16[128,32], index: 15, kind: input, shape index: {}]   ;;  %s4185_s16 = inlined_call_operand.hbm [shape: f32[2,16,32], index: 16, kind: output, shape index: {}]  }
   0x1   :  { %4194 = sst [smem:[#allocation19_spill]] %s4169_s0 }
   0x2   :  { %4195 = sst [smem:[#allocation20_spill]] %s4170_s1 }
   0x3   :  { %4196 = sst [smem:[#allocation21_spill]] %s4182_s13 }
   0x4   :  { %21 = vsyncpa [#allocation3], 0 }
   0x5   :  { %22 = vsyncpa [#allocation6], 0 }
   0x6   :  { %23 = vsyncpa [#allocation4], 0 }
   0x7   :  { %25 = vsyncpa [#allocation4 + $0x1], 0  ;;  %s3388_s21 = smov 0   ;;  %s3390_s22 = smov 0  }
   0x8   :  { %s3392_s23 = smov 0   ;;  %s3394_s24 = smov 0  }
   0x9 LB: > { %4197 = sst [smem:[#allocation12_spill]] %s3270_s21  ;;  %s3409_s25 = sadd.s32 4294967295, %s3282_s24   ;;  %s3282_s24 = sphi %s3394_s24, %s4227_s24   ;;  %s3278_s23 = sphi %s3392_s23, %s4229_s23   ;;  %s3274_s22 = sphi %s3390_s22, %s4231_s22   ;;  %s3270_s21 = sphi %s3388_s21, %s4230_s21  }
   0xa   : > { %4198 = sst [smem:[#allocation13_spill]] %s3278_s23  ;;  %s2694_s26 = sadd.s32 4294967294, %s3282_s24  }
   0xb   : > { %4199 = sst [smem:[#allocation14_spill]] %s3282_s24  ;;  %s3413_s27 = sadd.s32 1, %s3282_s24  }
   0xc   : > { %4200 = sst [smem:[#allocation15_spill]] %s3413_s27  ;;  %s379_s28 = sadd.s32 1, %s3278_s23 }
   0xd   : > { %s376_s29 = ssub.s32 %s3282_s24, %s3413_s27  ;;  %p389_p0 = scmp.ne.s32.totalorder %s3278_s23, %s3274_s22 }
   0xe   : > { %p377_p1 = scmp.eq.s32.totalorder %s376_s29, 0  ;;  %p390_p2 = scmp.eq.s32.totalorder %s3409_s25, 1 }
   0xf   : > { %p395_p3 = scmp.ne.s32.totalorder %s3274_s22, %s3270_s21  ;;  %p396_p4 = scmp.eq.s32.totalorder %s2694_s26, 1 }
  0x10   : > { %s3424_s30 = scalar_select %p377_p1, %s3278_s23, %s379_s28  }
  0x11   : > { %p3426_p5 = por %p390_p2, %p389_p0  ;;  %p3430_p6 = por %p396_p4, %p395_p3 }
  0x12   : > { %4201 = sst [smem:[#allocation16_spill]] %s3424_s30  ;;  %p2695_p7 = scmp.ge.s32.totalorder %s3282_s24, 1 }
  0x13   : > { %s4202_s0 = scalar_select %p3426_p5, 1, 0 }
  0x14   : > { %s4204_s17 = scalar_select %p3430_p6, 1, 0 }
  0x15   : > { %4203 = sst [smem:[#allocation17_spill]] %s4202_s0  ;;  %p403_p8 = scmp.lt.s32.totalorder %s3282_s24, 3 }
  0x16   : > { %4205 = sst [smem:[#allocation18_spill]] %s4204_s17  ;;  %p2961_p9 = scmp.eq.s32.totalorder %s3409_s25, 0 }
  0x17   : > { %p3437_p10 = pnand %p2695_p7, %p403_p8  ;;  %s4207_s13 = sld [smem:[#allocation21_spill]] }
  0x18   : > { %s3284_s28 = smov [#allocation5]   ;;  %s421_s19 = sshll.u32 %s4172_s3, 4  ;;  %s422_s19 = int_to_ptr.hbm [resolvable:$true] %s421_s19 }
  0x19   : > { %p2947_p11 = pneg %p3437_p10  ;;  %s461_s29 = sshll.u32 %s3284_s28, 4  ;;  %s462_s29 = int_to_ptr.vmem [resolvable:$true] %s461_s29 }
  0x1a   : > { %s3285_s20 = smov 64   ;;  %s3287_s17 = smov [#allocation2]  }
  0x1b   : > { %p3448_p12 = pnand %p2961_p9, %p2947_p11  ;;  %s423_s28 = sshll.u32 %s3287_s17, 4  ;;  %s424_s28 = int_to_ptr.vmem [resolvable:$true] %s423_s28 }
  0x1c   : > { %s473_s0 = sshll.u32 %s4183_s14, 4  ;;  %s3288_s23 = smov [#allocation7]   ;;  %s474_s0 = int_to_ptr.hbm [resolvable:$true] %s473_s0 }
  0x1d   : > { %s459_s26 = sshll.u32 %s4207_s13, 4  ;;  %s3286_s13 = smov 4   ;;  %s460_s26 = int_to_ptr.hbm [resolvable:$true] %s459_s26 }
  0x1e   : > { %2953 = dma.hbm_to_vmem [thread:$0]  (!%p3448_p12), %s460_s26, 256, %s462_s29, [#allocation6], %s3285_s20, %s3285_s20, %s3286_s13  }
  0x1f   : > { %2950 = dma.hbm_to_vmem [thread:$0]  (!%p3448_p12), %s422_s19, 32, %s424_s28, [#allocation3]  }
  0x20   : > { %s475_s27 = sshll.u32 %s3288_s23, 4  ;;  %502 = sbr.rel (%p3437_p10) target bundleno = 4132 (0x1024), region = 84  ;;  %s476_s27 = int_to_ptr.vmem [resolvable:$true] %s475_s27 }
  0x21   : > { %2956 = dma.hbm_to_vmem [thread:$0]  (!%p3448_p12), %s474_s0, 256, %s476_s27, [#allocation6], %s3285_s20, %s3285_s20, %s3286_s13  }
  0x25   : > { %3257 = dma.done.wait (%p2961_p9), [#allocation3], 32  }
  0x26   : > { %3259 = vsyncadd (%p2961_p9), [#allocation3], 4294967264 }
  0x27   : > { %3261 = dma.done.wait (%p2961_p9), [#allocation6], 512  }
  0x28   : > { %3263 = vsyncadd (%p2961_p9), [#allocation6], 4294966784  ;;  %p563_p13 = scmp.lt.s32.totalorder %s3409_s25, 1  ;;  %s4209_s0 = sld [smem:[#allocation19_spill]]  ;;  %vm595_vm0 = vcmask 261120   ;;  %v3289_v4 = vmov 32.0  }
  0x29   : > { %3034 = vrcp.f32 %v3289_v4  ;;  %v2895_v21 = vld [vmem:[%s4173_s4 + $0x8] sm:$0xff]  ;;  %v2894_v23 = vld [vmem:[%s4173_s4] sm:$0xff]  ;;  %v2903_v53 = vld [vmem:[%s4174_s5 + $0x38] sm:$0xff]  ;;  %s4210_s1 = sld [smem:[#allocation20_spill]]  ;;  %s3292_s18 = smov 112  }
  0x2a   : > { %s564_s21 = scalar_select %p563_p13, %s3409_s25, 1  ;;  %676 = vmatpush.bf16.msra.mxu0 %v2895_v21  ;;  %v3506_v40 = vld [vmem:[%s4171_s2] sm:$0xff]  ;;  %774 = vmatpush.bf16.msra.mxu1 %v2903_v53  ;;  %v2902_v54 = vld [vmem:[%s4174_s5 + $0x30] sm:$0xff]  ;;  %v2901_v55 = vld [vmem:[%s4174_s5 + $0x28] sm:$0xff] }
  0x2b   : > { %v647_v43 = vperm.slane %v3506_v40, 0  ;;  %v650_v48 = vperm.slane %v3506_v40, 1  ;;  %v2900_v56 = vld [vmem:[%s4174_s5 + $0x20] sm:$0xff]  ;;  %v2899_v58 = vld [vmem:[%s4174_s5 + $0x18] sm:$0xff]  ;;  %v2898_v60 = vld [vmem:[%s4174_s5 + $0x10] sm:$0xff]  ;;  %s3293_s28 = smov 113  }
  0x2c   : > { %s2893_s13 = sshll.u32 %s564_s21, 4  ;;  %v572_v57 = vld [vmem:[#allocation2] sm:$0x3]  ;;  %v2897_v63 = vld [vmem:[%s4174_s5 + $0x8] sm:$0xff]  ;;  %s3294_s23 = smov 1  }
  0x2d   : > { %v654_v59 = vperm.slane %v572_v57, 0  ;;  %v2909_v57 = vld [vmem:[%s4177_s8 + $0x8] sm:$0xff]  ;;  %s3295_s27 = smov 2   ;;  %s3296_s21 = smov 114  }
  0x2e   : > { %s567_s17 = scalar_lea.vmem %s4209_s0, %s2893_s13  ;;  %677 = vmatpush.bf16.msra.mxu0 %v2894_v23  ;;  %775 = vmatpush.bf16.msra.mxu1 %v2902_v54  ;;  %s3290_s0 = smov 120  }
  0x2f   : > { %v3479_v0 = vld [vmem:[%s567_s17] sm:$0xff]  ;;  %v3483_v2 = vld [vmem:[%s567_s17 + $0x8] sm:$0xff]  ;;  %v3035_v5 = vpop.eup %3034  ;;  %s3291_s17 = smov 104   ;;  %s3297_s13 = smov 4  }
  0x30   : > { %v596_v1 = vsel %vm595_vm0, %v3479_v0, 0.0  ;;  %v599_v3 = vsel %vm595_vm0, %v3483_v2, 0.0  ;;  %v603_v6 = vmul.f32 32.0, %v3035_v5  ;;  %vm607_vm1 = vweird.f32 %v3035_v5  ;;  %s3298_s24 = smov 116   ;;  %s3299_s30 = smov 8  }
  0x31   : > { %597 = vadd.xlane.f32.xlu0 %v596_v1 }
  0x32   : > { %v604_v7 = vsub.f32 1.0, %v603_v6  ;;  %776 = vmatpush.bf16.msra.mxu1 %v2901_v55  ;;  %v2905_v55 = vld [vmem:[%s4175_s6 + $0x8] sm:$0xff]  ;;  %931 = vmatpush.bf16.msrb.mxu0 %v2909_v57 }
  0x33   : > { %869 = vmatpush.bf16.msra.mxu2 %v2905_v55 }
  0x34   : > { %v605_v8 = vmul.f32 %v3035_v5, %v604_v7 }
  0x36   : > { %v606_v9 = vadd.f32 %v3035_v5, %v605_v8  ;;  %777 = vmatpush.bf16.msra.mxu1 %v2900_v56  ;;  %v2907_v56 = vld [vmem:[%s4176_s7 + $0x8] sm:$0xff] }
  0x37   : > { %900 = vmatpush.bf16.msra.mxu3 %v2907_v56 }
  0x38   : > { %v3487_v10 = vsel %vm607_vm1, %v3035_v5, %v606_v9 }
  0x39   : > { %600 = vadd.xlane.f32.xlu0 %v599_v3  ;;  %v2896_v3 = vld [vmem:[%s4174_s5] sm:$0xff] }
  0x3a   : > { %778 = vmatpush.bf16.msra.mxu1 %v2899_v58 }
  0x3e   : > { %779 = vmatpush.bf16.msra.mxu1 %v2898_v60  ;;  %v2906_v60 = vld [vmem:[%s4176_s7] sm:$0xff] }
  0x3f   : > { %901 = vmatpush.bf16.msra.mxu3 %v2906_v60 }
  0x42   : > { %780 = vmatpush.bf16.msra.mxu1 %v2897_v63 }
  0x46   : > { %781 = vmatpush.bf16.msra.mxu1 %v2896_v3 }
  0xa4   : > { %v598_v11 = vpop.xlane.xlu0 %597 }
  0xa5   : > { %v609_v12 = vmul.f32 %v3487_v10, %v598_v11 }
  0xa7   : > { %v611_v13 = vsub.f32 %v3479_v0, %v609_v12 }
  0xa9   : > { %v613_v14 = vmul.f32 %v611_v13, %v611_v13 }
  0xab   : > { %v615_v15 = vsel %vm595_vm0, %v613_v14, 0.0 }
  0xac   : > { %616 = vadd.xlane.f32.xlu1 %v615_v15  ;;  %v601_v16 = vpop.xlane.xlu0 %600 }
  0xad   : > { %v610_v17 = vmul.f32 %v3487_v10, %v601_v16 }
  0xaf   : > { %v612_v18 = vsub.f32 %v3483_v2, %v610_v17 }
  0xb1   : > { %v614_v19 = vmul.f32 %v612_v18, %v612_v18 }
  0xb3   : > { %v618_v20 = vsel %vm595_vm0, %v614_v19, 0.0 }
  0xb4   : > { %619 = vadd.xlane.f32.xlu1 %v618_v20 }
 0x11f   : > { %v617_v22 = vpop.xlane.xlu1 %616 }
 0x120   : > { %v621_v24 = vmul.f32 %v617_v22, %v3487_v10 }
 0x122   : > { %v623_v25 = vadd.f32 1e-05, %v621_v24 }
 0x124   : > { %3036 = vrsqrt.f32 %v623_v25  ;;  %vm631_vm3 = vweird.f32 %v623_v25 }
 0x127   : > { %v620_v26 = vpop.xlane.xlu1 %619 }
 0x128   : > { %v622_v27 = vmul.f32 %v620_v26, %v3487_v10 }
 0x12a   : > { %v3037_v28 = vpop.eup %3036  ;;  %v624_v29 = vadd.f32 1e-05, %v622_v27 }
 0x12b   : > { %v626_v30 = vmul.f32 %v3037_v28, %v623_v25  ;;  %vm632_vm2 = vweird.f32 %v3037_v28 }
 0x12c   : > { %3038 = vrsqrt.f32 %v624_v29  ;;  %vm633_vm4 = vmor %vm631_vm3, %vm632_vm2  ;;  %vm641_vm6 = vweird.f32 %v624_v29 }
 0x12d   : > { %v627_v31 = vmul.f32 %v3037_v28, %v626_v30 }
 0x12f   : > { %v628_v32 = vmul.f32 0.5, %v627_v31 }
 0x131   : > { %v629_v33 = vsub.f32 1.5, %v628_v32 }
 0x132   : > { %v3039_v34 = vpop.eup %3038 }
 0x133   : > { %v630_v35 = vmul.f32 %v3037_v28, %v629_v33  ;;  %v636_v36 = vmul.f32 %v3039_v34, %v624_v29  ;;  %vm642_vm5 = vweird.f32 %v3039_v34 }
 0x134   : > { %vm643_vm7 = vmor %vm641_vm6, %vm642_vm5 }
 0x135   : > { %v637_v37 = vmul.f32 %v3039_v34, %v636_v36  ;;  %v634_v38 = vsel %vm633_vm4, %v3037_v28, %v630_v35  ;;  %v725_v35 = vperm.slane %v3506_v40, 2 }
 0x136   : > { %v645_v42 = vmul.f32 %v634_v38, %v611_v13 }
 0x137   : > { %v638_v39 = vmul.f32 0.5, %v637_v37 }
 0x138   : > { %v648_v47 = vmul.f32 %v647_v43, %v645_v42 }
 0x139   : > { %v639_v41 = vsub.f32 1.5, %v638_v39 }
 0x13a   : > { %v651_v50 = vadd.f32 %v650_v48, %v648_v47 }
 0x13b   : > { %v640_v44 = vmul.f32 %v3039_v34, %v639_v41 }
 0x13d   : > { %v644_v45 = vsel %vm643_vm7, %v3039_v34, %v640_v44  ;;  %vm1025_vm7 = vcmask 64512  }
 0x13e   : > { %v646_v46 = vmul.f32 %v644_v45, %v612_v18 }
 0x140   : > { %v649_v49 = vmul.f32 %v647_v43, %v646_v46 }
 0x142   : > { %v652_v51 = vadd.f32 %v650_v48, %v649_v49 }
 0x144   : > { %v653_v52 = vpack.c.bf16 %v652_v51, %v651_v50 }
 0x146   : > { %2715 = vmatmul.msk.bf16.vlgmr.msra.gmra.mxu0 %vm595_vm0, %v653_v52 }
 0x1c3   : > { %v679_v61 = vpop.f32.mrf.mxu0 }
 0x1c4   : > { %v680_v62 = vadd.f32 %v679_v61, %v654_v59 }
 0x1c6   : > { %v2716_v1 = vmul.f32 -1.442695, %v680_v62 }
 0x1c8   : > { %3040 = vpow2.f32 %v2716_v1 }
 0x1cb   : > { %v681_v4 = vpop.f32.mrf.mxu0 }
 0x1cc   : > { %v682_v5 = vadd.f32 %v681_v4, %v654_v59  ;;  %v2904_v59 = vld [vmem:[%s4175_s6] sm:$0xff] }
 0x1cd   : > { %870 = vmatpush.bf16.msra.mxu2 %v2904_v59 }
 0x1ce   : > { %v3041_v6 = vpop.eup %3040  ;;  %v2717_v7 = vmul.f32 -1.442695, %v682_v5 }
 0x1cf   : > { %v690_v8 = vadd.f32 1.0, %v3041_v6 }
 0x1d0   : > { %3042 = vpow2.f32 %v2717_v7 }
 0x1d1   : > { %3044 = vrcp.f32 %v690_v8  ;;  %v703_v19 = vand.u32 2147483648, %v690_v8  ;;  %vm697_vm9 = vweird.f32 %v690_v8  ;;  %v701_v20 = vand.u32 2147483647, %v690_v8 }
 0x1d3   : > { %v704_v26 = vor.u32 1.1754944e-38, %v703_v19  ;;  %vm702_vm12 = vcmp.eq.f32.partialorder %v701_v20, 8.507059e+37  ;;  %v836_v19 = vperm.slane %v3506_v40, 3 }
 0x1d6   : > { %v3043_v9 = vpop.eup %3042 }
 0x1d7   : > { %v3045_v11 = vpop.eup %3044  ;;  %v691_v12 = vadd.f32 1.0, %v3043_v9 }
 0x1d8   : > { %v693_v13 = vmul.f32 %v3045_v11, %v690_v8  ;;  %vm698_vm8 = vweird.f32 %v3045_v11 }
 0x1d9   : > { %3046 = vrcp.f32 %v691_v12  ;;  %vm699_vm10 = vmor %vm697_vm9, %vm698_vm8  ;;  %v718_v22 = vand.u32 2147483648, %v691_v12  ;;  %v716_v25 = vand.u32 2147483647, %v691_v12  ;;  %vm712_vm13 = vweird.f32 %v691_v12 }
 0x1da   : > { %v694_v14 = vsub.f32 1.0, %v693_v13  ;;  %vm1189_vm8 = vcmask 7168  }
 0x1db   : > { %v719_v29 = vor.u32 1.1754944e-38, %v718_v22  ;;  %vm717_vm15 = vcmp.eq.f32.partialorder %v716_v25, 8.507059e+37 }
 0x1dc   : > { %v695_v15 = vmul.f32 %v3045_v11, %v694_v14 }
 0x1de   : > { %v696_v17 = vadd.f32 %v3045_v11, %v695_v15 }
 0x1df   : > { %v3047_v16 = vpop.eup %3046 }
 0x1e0   : > { %v708_v18 = vmul.f32 %v3047_v16, %v691_v12  ;;  %v700_v23 = vsel %vm699_vm10, %v3045_v11, %v696_v17  ;;  %vm713_vm11 = vweird.f32 %v3047_v16 }
 0x1e1   : > { %v705_v28 = vsel %vm702_vm12, %v704_v26, %v700_v23  ;;  %vm714_vm14 = vmor %vm712_vm13, %vm713_vm11  ;;  %vm1338_vm11 = vcmask 15360  }
 0x1e2   : > { %v709_v21 = vsub.f32 1.0, %v708_v18  ;;  %v722_v32 = vmul.f32 %v705_v28, %v680_v62  ;;  %v2908_v62 = vld [vmem:[%s4177_s8] sm:$0xff] }
 0x1e3   : > { %932 = vmatpush.bf16.msrb.mxu0 %v2908_v62 }
 0x1e4   : > { %v710_v24 = vmul.f32 %v3047_v16, %v709_v21 }
 0x1e6   : > { %v711_v27 = vadd.f32 %v3047_v16, %v710_v24  ;;  %v839_v24 = vperm.slane %v3506_v40, 4 }
 0x1e8   : > { %v715_v30 = vsel %vm714_vm14, %v3047_v16, %v711_v27  ;;  %vm1419_vm14 = vcmask 31744  }
 0x1e9   : > { %v720_v31 = vsel %vm717_vm15, %v719_v29, %v715_v30  ;;  %v2910_v29 = vld [vmem:[%s4210_s1] sm:$0xff] }
 0x1ea   : > { %v723_v33 = vmul.f32 %v720_v31, %v682_v5  ;;  %v1030_v30 = vsel %vm1025_vm7, %v2910_v29, 0  ;;  %v2911_v31 = vld [vmem:[%s4210_s1 + $0x8] sm:$0xff] }
 0x1eb   : > { %1039 = vmatpush.bf16.xpose.msrb.mxu2 %v1030_v30 }
 0x1ec   : > { %v724_v34 = vpack.c.bf16 %v723_v33, %v722_v32  ;;  %v1058_v32 = vsel %vm1025_vm7, %v2911_v31, 0  ;;  %v570_v33 = vld [vmem:[%s4171_s2 + $0x8] sm:$0xff] }
 0x1ed   : > { %1067 = vmatpush.bf16.xpose.msrb.mxu3 %v1058_v32 }
 0x1ee   : > { %782 = vmatmul.bf16.vlgmr.msra.gmra.mxu1 %v724_v34  ;;  %v847_v34 = vperm.slane %v3506_v40, 5 }
 0x26b   : > { %v783_v36 = vpop.f32.mrf.mxu1 }
 0x26c   : > { %v784_v37 = vadd.f32 %v783_v36, %v725_v35 }
 0x26e   : > { %v788_v38 = vmul.f32 0.5, %v784_v37 }
 0x270   : > { %v3537_v39 = vadd.f32 %v788_v38, %v3479_v0 }
 0x272   : > { %v792_v41 = vsel %vm595_vm0, %v3537_v39, 0.0 }
 0x273   : > { %v785_v42 = vpop.f32.mrf.mxu1  ;;  %793 = vadd.xlane.f32.xlu2 %v792_v41  ;;  %v881_v41 = vperm.slane %v3506_v40, 6 }
 0x274   : > { %v786_v43 = vadd.f32 %v785_v42, %v725_v35  ;;  %v944_v35 = vperm.slane %v570_v33, 1  ;;  %v939_v42 = vperm.slane %v570_v33, 0 }
 0x276   : > { %v789_v44 = vmul.f32 0.5, %v786_v43 }
 0x278   : > { %v3542_v45 = vadd.f32 %v789_v44, %v3483_v2 }
 0x27a   : > { %v795_v46 = vsel %vm595_vm0, %v3542_v45, 0.0 }
 0x27b   : > { %796 = vadd.xlane.f32.xlu2 %v795_v46 }
 0x2e6   : > { %v794_v47 = vpop.xlane.xlu2 %793 }
 0x2e7   : > { %v798_v48 = vmul.f32 %v794_v47, %v3487_v10 }
 0x2e9   : > { %v800_v0 = vsub.f32 %v3537_v39, %v798_v48 }
 0x2eb   : > { %v802_v49 = vmul.f32 %v800_v0, %v800_v0 }
 0x2ed   : > { %v804_v50 = vsel %vm595_vm0, %v802_v49, 0.0 }
 0x2ee   : > { %805 = vadd.xlane.f32.xlu0 %v804_v50  ;;  %v797_v51 = vpop.xlane.xlu2 %796 }
 0x2ef   : > { %v799_v52 = vmul.f32 %v797_v51, %v3487_v10 }
 0x2f1   : > { %v801_v53 = vsub.f32 %v3542_v45, %v799_v52 }
 0x2f3   : > { %v803_v2 = vmul.f32 %v801_v53, %v801_v53 }
 0x2f5   : > { %v807_v54 = vsel %vm595_vm0, %v803_v2, 0.0 }
 0x2f6   : > { %808 = vadd.xlane.f32.xlu1 %v807_v54 }
 0x361   : > { %v806_v58 = vpop.xlane.xlu0 %805 }
 0x362   : > { %v810_v61 = vmul.f32 %v806_v58, %v3487_v10 }
 0x364   : > { %v812_v63 = vadd.f32 1e-05, %v810_v61 }
 0x366   : > { %3048 = vrsqrt.f32 %v812_v63  ;;  %vm820_vm2 = vweird.f32 %v812_v63 }
 0x369   : > { %v809_v1 = vpop.xlane.xlu1 %808 }
 0x36a   : > { %v811_v3 = vmul.f32 %v809_v1, %v3487_v10 }
 0x36c   : > { %v3049_v4 = vpop.eup %3048  ;;  %v813_v5 = vadd.f32 1e-05, %v811_v3 }
 0x36d   : > { %v815_v6 = vmul.f32 %v3049_v4, %v812_v63  ;;  %vm821_vm1 = vweird.f32 %v3049_v4 }
 0x36e   : > { %3050 = vrsqrt.f32 %v813_v5  ;;  %vm822_vm3 = vmor %vm820_vm2, %vm821_vm1  ;;  %vm830_vm5 = vweird.f32 %v813_v5  ;;  %vm1530_vm2 = vcmask 1046528  }
 0x36f   : > { %v816_v7 = vmul.f32 %v3049_v4, %v815_v6 }
 0x371   : > { %v817_v8 = vmul.f32 0.5, %v816_v7 }
 0x373   : > { %v818_v9 = vsub.f32 1.5, %v817_v8 }
 0x374   : > { %v3051_v11 = vpop.eup %3050 }
 0x375   : > { %v819_v12 = vmul.f32 %v3049_v4, %v818_v9  ;;  %v825_v13 = vmul.f32 %v3051_v11, %v813_v5  ;;  %vm831_vm4 = vweird.f32 %v3051_v11  ;;  %v2913_v5 = vld [vmem:[%s4210_s1 + $0x18] sm:$0xff]  ;;  %v2912_v9 = vld [vmem:[%s4210_s1 + $0x10] sm:$0xff] }
 0x376   : > { %vm832_vm6 = vmor %vm830_vm5, %vm831_vm4  ;;  %v1114_v6 = vsel %vm1025_vm7, %v2913_v5, 0  ;;  %vm1701_vm5 = vcmask 130048  }
 0x377   : > { %v826_v14 = vmul.f32 %v3051_v11, %v825_v13  ;;  %v823_v15 = vsel %vm822_vm3, %v3049_v4, %v819_v12  ;;  %v912_v13 = vperm.slane %v3506_v40, 7 }
 0x378   : > { %v834_v18 = vmul.f32 %v823_v15, %v800_v0 }
 0x379   : > { %v827_v16 = vmul.f32 0.5, %v826_v14 }
 0x37a   : > { %v837_v23 = vmul.f32 %v836_v19, %v834_v18 }
 0x37b   : > { %v828_v17 = vsub.f32 1.5, %v827_v16 }
 0x37c   : > { %v840_v26 = vadd.f32 %v839_v24, %v837_v23 }
 0x37d   : > { %v829_v20 = vmul.f32 %v3051_v11, %v828_v17 }
 0x37f   : > { %v833_v21 = vsel %vm832_vm6, %v3051_v11, %v829_v20  ;;  %v1086_v11 = vsel %vm1025_vm7, %v2912_v9, 0 }
 0x380   : > { %v835_v22 = vmul.f32 %v833_v21, %v801_v53  ;;  %1095 = vmatpush.bf16.xpose.msra.mxu0 %v1086_v11 }
 0x382   : > { %v838_v25 = vmul.f32 %v836_v19, %v835_v22 }
 0x384   : > { %v841_v27 = vadd.f32 %v839_v24, %v838_v25 }
 0x386   : > { %v842_v28 = vpack.c.bf16 %v841_v27, %v840_v26 }
 0x388   : > { %2758 = vmatmul.msk.bf16.vlgmr.msra.gmra.mxu2 %vm595_vm0, %v842_v28  ;;  %2767 = vmatmul.msk.bf16.vlgmr.msra.gmra.mxu3 %vm595_vm0, %v842_v28 }
 0x389   : > { %2776 = vmatmul.msk.bf16.vlgmr.msrb.gmra.mxu0 %vm595_vm0, %v842_v28  ;;  %1123 = vmatpush.bf16.xpose.msra.mxu2 %v1114_v6 }
 0x406   : > { %v934_v7 = vpop.f32.mrf.mxu0 }
 0x407   : > { %v935_v16 = vadd.f32 %v934_v7, %v912_v13 }
 0x409   : > { %v3621_v18 = vpack.c.bf16 %v935_v16, %v935_v16 }
 0x40b   : > { %v872_v36 = vpop.f32.mrf.mxu2  ;;  %v903_v37 = vpop.f32.mrf.mxu3  ;;  %v1803_v24 = vunpack.c.l.b16 %v3621_v18 }
 0x40c   : > { %v873_v38 = vadd.f32 %v872_v36, %v847_v34  ;;  %v904_v46 = vadd.f32 %v903_v37, %v881_v41 }
 0x40e   : > { %v945_v43 = vadd.f32 %v944_v35, %v873_v38  ;;  %v940_v47 = vadd.f32 %v939_v42, %v873_v38  ;;  %v949_v49 = vpack.c.bf16 %v904_v46, %v904_v46  ;;  %v936_v12 = vpop.f32.mrf.mxu0 }
 0x40f   : > { %v937_v15 = vadd.f32 %v936_v12, %v912_v13 }
 0x410   : > { %v947_v44 = vpack.c.bf16 %v945_v43, %v945_v43  ;;  %v942_v52 = vpack.c.bf16 %v940_v47, %v940_v47  ;;  %v1592_v57 = vunpack.c.l.b16 %v949_v49 }
 0x411   : > { %v3619_v17 = vpack.c.bf16 %v937_v15, %v937_v15 }
 0x412   : > { %969 = vrot.lane.b32.xlu1 %v947_v44, %s3290_s0  ;;  %977 = vrot.lane.b32.xlu2 %v947_v44, %s3291_s17  ;;  %v1589_v59 = vunpack.c.l.b16 %v942_v52  ;;  %v1017_v62 = vunpack.c.l.b16 %v947_v44 }
 0x413   : > { %v874_v48 = vpop.f32.mrf.mxu2  ;;  %v905_v0 = vpop.f32.mrf.mxu3  ;;  %v1804_v19 = vunpack.c.l.b16 %v3619_v17 }
 0x414   : > { %v875_v50 = vadd.f32 %v874_v48, %v847_v34  ;;  %v906_v51 = vadd.f32 %v905_v0, %v881_v41 }
 0x415   : > { %v1805_v26 = vpack.c.b16 %v1804_v19, %v1803_v24 }
 0x416   : > { %v941_v53 = vadd.f32 %v939_v42, %v875_v50  ;;  %v946_v2 = vadd.f32 %v944_v35, %v875_v50  ;;  %v950_v54 = vpack.c.bf16 %v906_v51, %v906_v51 }
 0x418   : > { %v943_v55 = vpack.c.bf16 %v941_v53, %v941_v53  ;;  %v948_v56 = vpack.c.bf16 %v946_v2, %v946_v2  ;;  %v1593_v58 = vunpack.c.l.b16 %v950_v54 }
 0x41a   : > { %v1590_v60 = vunpack.c.l.b16 %v943_v55  ;;  %979 = vrot.lane.b32.xlu0 %v948_v56, %s3291_s17  ;;  %983 = vrot.lane.b32.xlu1 %v949_v49, %s3290_s0  ;;  %v1594_v61 = vpack.c.b16 %v1593_v58, %v1592_v57  ;;  %v1018_v63 = vunpack.c.l.b16 %v948_v56 }
 0x41b   : > { %971 = vrot.lane.b32.xlu2 %v948_v56, %s3290_s0 }
 0x41c   : > { %v1599_v1 = vsel %vm1025_vm7, %v1594_v61, 0  ;;  %v1019_v3 = vpack.c.b16 %v1018_v63, %v1017_v62  ;;  %v1591_v4 = vpack.c.b16 %v1590_v60, %v1589_v59 }
 0x41d   : > { %1608 = vmatpush.bf16.xpose.msra.mxu3 %v1599_v1 }
 0x41e   : > { %2781 = vmatmul.msk.bf16.vlgmr.msrb.gmra.mxu2 %vm1025_vm7, %v1019_v3 }
 0x422   : > { %973 = vrot.lane.b32.xlu0 %v947_v44, %s3292_s18  ;;  %993 = vrot.lane.b32.xlu1 %v950_v54, %s3291_s17 }
 0x423   : > { %975 = vrot.lane.b32.xlu2 %v948_v56, %s3292_s18 }
 0x42a   : > { %985 = vrot.lane.b32.xlu0 %v950_v54, %s3290_s0  ;;  %963 = vrot.lane.b32.xlu1 %v942_v52, %s3291_s17 }
 0x42b   : > { %991 = vrot.lane.b32.xlu2 %v949_v49, %s3291_s17 }
 0x432   : > { %989 = vrot.lane.b32.xlu1 %v950_v54, %s3292_s18  ;;  %955 = vrot.lane.b32.xlu0 %v942_v52, %s3290_s0 }
 0x433   : > { %987 = vrot.lane.b32.xlu2 %v949_v49, %s3292_s18 }
 0x43a   : > { %959 = vrot.lane.b32.xlu0 %v942_v52, %s3292_s18 }
 0x43b   : > { %957 = vrot.lane.b32.xlu2 %v943_v55, %s3290_s0 }
 0x442   : > { %965 = vrot.lane.b32.xlu0 %v943_v55, %s3291_s17 }
 0x443   : > { %961 = vrot.lane.b32.xlu2 %v943_v55, %s3292_s18 }
 0x46c   : > { %v978_v8 = vpop.permute.xlu2 %977 }
 0x46d   : > { %v1102_v28 = vunpack.c.l.b16 %v978_v8 }
 0x475   : > { %v972_v14 = vpop.permute.xlu2 %971 }
 0x476   : > { %v1047_v22 = vunpack.c.l.b16 %v972_v14 }
 0x47d   : > { %v976_v20 = vpop.permute.xlu2 %975 }
 0x47e   : > { %v1075_v34 = vunpack.c.l.b16 %v976_v20 }
 0x484   : > { %v970_v21 = vpop.permute.xlu1 %969 }
 0x485   : > { %v1046_v23 = vunpack.c.l.b16 %v970_v21  ;;  %v992_v30 = vpop.permute.xlu2 %991 }
 0x486   : > { %v1670_v35 = vunpack.c.l.b16 %v992_v30 }
 0x487   : > { %v1048_v25 = vpack.c.b16 %v1047_v22, %v1046_v23 }
 0x489   : > { %2786 = vmatmul.msk.bf16.vlgmr.msrb.gmra.mxu3 %vm1025_vm7, %v1048_v25 }
 0x48a   : > { %1817 = vmatpush.bf16.msrb.mxu3 %v1805_v26 }
 0x48c   : > { %v980_v40 = vpop.permute.xlu0 %979  ;;  %v984_v27 = vpop.permute.xlu1 %983 }
 0x48d   : > { %v1103_v29 = vunpack.c.l.b16 %v980_v40  ;;  %v988_v42 = vpop.permute.xlu2 %987  ;;  %v1618_v47 = vunpack.c.l.b16 %v984_v27  ;;  %v1130_v40 = vlaneseq }
 0x48e   : > { %v1644_v2 = vunpack.c.l.b16 %v988_v42 }
 0x48f   : > { %v1104_v31 = vpack.c.b16 %v1103_v29, %v1102_v28  ;;  %v3661_v28 = vshrl.u32 %v1130_v40, 7 }
 0x491   : > { %2796 = vmatmul.msk.bf16.vlgmr.msra.gmra.mxu2 %vm1025_vm7, %v1104_v31 }
 0x494   : > { %v974_v32 = vpop.permute.xlu0 %973  ;;  %v994_v33 = vpop.permute.xlu1 %993 }
 0x495   : > { %v1074_v36 = vunpack.c.l.b16 %v974_v32  ;;  %v1671_v37 = vunpack.c.l.b16 %v994_v33  ;;  %v958_v51 = vpop.permute.xlu2 %957  ;;  %v1198_v33 = vand.u32 1, %v3661_v28 }
 0x496   : > { %v1616_v54 = vunpack.c.l.b16 %v958_v51 }
 0x497   : > { %v1076_v38 = vpack.c.b16 %v1075_v34, %v1074_v36  ;;  %v1672_v41 = vpack.c.b16 %v1671_v37, %v1670_v35  ;;  %vm3669_vm9 = vcmp.ne.s32.totalorder %v1198_v33, 0 }
 0x499   : > { %2791 = vmatmul.msk.bf16.vlgmr.msra.gmra.mxu0 %vm1025_vm7, %v1076_v38  ;;  %2797 = vmatmul.msk.bf16.vlgmr.msra.gmra.mxu3 %vm1025_vm7, %v1591_v4  ;;  %v1677_v43 = vsel %vm1025_vm7, %v1672_v41, 0 }
 0x49a   : > { %1686 = vmatpush.bf16.xpose.msrb.mxu2 %v1677_v43 }
 0x49c   : > { %v986_v44 = vpop.permute.xlu0 %985  ;;  %v964_v46 = vpop.permute.xlu1 %963 }
 0x49d   : > { %v1619_v48 = vunpack.c.l.b16 %v986_v44  ;;  %v962_v62 = vpop.permute.xlu2 %961  ;;  %v1667_v4 = vunpack.c.l.b16 %v964_v46 }
 0x49e   : > { %v1642_v3 = vunpack.c.l.b16 %v962_v62 }
 0x49f   : > { %v1620_v0 = vpack.c.b16 %v1619_v48, %v1618_v47  ;;  %v3685_v48 = vadd.s32 8, %v3661_v28 }
 0x4a1   : > { %v1041_v49 = vpop.f32.mrf.mxu2  ;;  %v1625_v50 = vsel %vm1025_vm7, %v1620_v0, 0  ;;  %v1199_v51 = vand.u32 1, %v3685_v48 }
 0x4a2   : > { %1634 = vmatpush.bf16.xpose.msrb.mxu0 %v1625_v50  ;;  %1141 = vrot.lane.b32.xlu2 %v1041_v49, %s3293_s28 }
 0x4a3   : > { %1165 = vrot.lane.b32.xlu1 %v1041_v49, %s3294_s23  ;;  %vm3700_vm10 = vcmp.ne.s32.totalorder %v1199_v51, 0 }
 0x4a4   : > { %v990_v52 = vpop.permute.xlu1 %989  ;;  %v956_v53 = vpop.permute.xlu0 %955 }
 0x4a5   : > { %v1645_v55 = vunpack.c.l.b16 %v990_v52  ;;  %v1615_v56 = vunpack.c.l.b16 %v956_v53 }
 0x4a7   : > { %v1646_v57 = vpack.c.b16 %v1645_v55, %v1644_v2  ;;  %v1617_v58 = vpack.c.b16 %v1616_v54, %v1615_v56 }
 0x4a9   : > { %v1043_v59 = vpop.f32.mrf.mxu2  ;;  %2798 = vmatmul.msk.bf16.vlgmr.msrb.gmra.mxu0 %vm1025_vm7, %v1617_v58  ;;  %v1651_v60 = vsel %vm1025_vm7, %v1646_v57, 0 }
 0x4aa   : > { %1660 = vmatpush.bf16.xpose.msra.mxu0 %v1651_v60  ;;  %1167 = vrot.lane.b32.xlu0 %v1043_v59, %s3294_s23 }
 0x4ab   : > { %1143 = vrot.lane.b32.xlu1 %v1043_v59, %s3293_s28 }
 0x4ac   : > { %v960_v61 = vpop.permute.xlu0 %959 }
 0x4ad   : > { %v1641_v63 = vunpack.c.l.b16 %v960_v61 }
 0x4af   : > { %v1643_v6 = vpack.c.b16 %v1642_v3, %v1641_v63 }
 0x4b4   : > { %v966_v1 = vpop.permute.xlu0 %965 }
 0x4b5   : > { %v1668_v5 = vunpack.c.l.b16 %v966_v1 }
 0x4b7   : > { %v1669_v7 = vpack.c.b16 %v1668_v5, %v1667_v4 }
 0x4b9   : > { %2799 = vmatmul.msk.bf16.vlgmr.msra.gmra.mxu0 %vm1025_vm7, %v1643_v6  ;;  %2800 = vmatmul.msk.bf16.vlgmr.msrb.gmra.mxu2 %vm1025_vm7, %v1669_v7 }
 0x4fc   : > { %v1142_v13 = vpop.permute.xlu2 %1141 }
 0x50c   : > { %v1069_v11 = vpop.f32.mrf.mxu3 }
 0x514   : > { %v1125_v8 = vpop.f32.mrf.mxu2  ;;  %v1071_v19 = vpop.f32.mrf.mxu3 }
 0x515   : > { %1177 = vrot.lane.b32.xlu1 %v1125_v8, %s3294_s23  ;;  %v1166_v12 = vpop.permute.xlu1 %1165 }
 0x516   : > { %v1097_v9 = vpop.f32.mrf.mxu0  ;;  %v1190_v14 = vsel %vm1189_vm8, %v1142_v13, %v1166_v12 }
 0x517   : > { %1173 = vrot.lane.b32.xlu2 %v1097_v9, %s3294_s23  ;;  %1149 = vrot.lane.b32.xlu0 %v1097_v9, %s3293_s28 }
 0x51c   : > { %v1127_v16 = vpop.f32.mrf.mxu2  ;;  %v1168_v21 = vpop.permute.xlu0 %1167 }
 0x51d   : > { %1145 = vrot.lane.b32.xlu1 %v1069_v11, %s3293_s28  ;;  %v1144_v20 = vpop.permute.xlu1 %1143 }
 0x51e   : > { %v1099_v15 = vpop.f32.mrf.mxu0  ;;  %v1191_v22 = vsel %vm1189_vm8, %v1144_v20, %v1168_v21 }
 0x51f   : > { %1153 = vrot.lane.b32.xlu2 %v1125_v8, %s3293_s28  ;;  %1169 = vrot.lane.b32.xlu0 %v1069_v11, %s3294_s23 }
 0x525   : > { %1210 = vrot.lane.b32.xlu1 %v1190_v14, %s3293_s28 }
 0x527   : > { %1175 = vrot.lane.b32.xlu2 %v1099_v15, %s3294_s23  ;;  %1234 = vrot.lane.b32.xlu0 %v1190_v14, %s3294_s23 }
 0x52d   : > { %1155 = vrot.lane.b32.xlu1 %v1127_v16, %s3293_s28 }
 0x52f   : > { %1147 = vrot.lane.b32.xlu2 %v1071_v19, %s3293_s28  ;;  %1151 = vrot.lane.b32.xlu0 %v1099_v15, %s3293_s28 }
 0x535   : > { %1171 = vrot.lane.b32.xlu1 %v1071_v19, %s3294_s23  ;;  %v1279_v19 = vand.u32 2, %v3685_v48 }
 0x537   : > { %1179 = vrot.lane.b32.xlu0 %v1127_v16, %s3294_s23  ;;  %1236 = vrot.lane.b32.xlu2 %v1191_v22, %s3294_s23  ;;  %v1278_v16 = vand.u32 2, %v3661_v28  ;;  %vm3739_vm13 = vcmp.ne.s32.totalorder %v1279_v19, 0 }
 0x539   : > { %vm3735_vm12 = vcmp.ne.s32.totalorder %v1278_v16, 0 }
 0x53f   : > { %1212 = vrot.lane.b32.xlu0 %v1191_v22, %s3293_s28 }
 0x571   : > { %v1174_v23 = vpop.permute.xlu2 %1173 }
 0x579   : > { %v1154_v29 = vpop.permute.xlu2 %1153 }
 0x581   : > { %v1176_v41 = vpop.permute.xlu2 %1175 }
 0x587   : > { %v1178_v24 = vpop.permute.xlu1 %1177 }
 0x588   : > { %v1196_v31 = vsel %vm1189_vm8, %v1154_v29, %v1178_v24 }
 0x589   : > { %v1150_v25 = vpop.permute.xlu0 %1149  ;;  %v1148_v46 = vpop.permute.xlu2 %1147 }
 0x58a   : > { %v1194_v26 = vsel %vm1189_vm8, %v1150_v25, %v1174_v23 }
 0x58b   : > { %1242 = vrot.lane.b32.xlu0 %v1194_v26, %s3294_s23  ;;  %1218 = vrot.lane.b32.xlu1 %v1194_v26, %s3293_s28 }
 0x58f   : > { %v1146_v27 = vpop.permute.xlu1 %1145 }
 0x591   : > { %v1170_v30 = vpop.permute.xlu0 %1169  ;;  %v1237_v53 = vpop.permute.xlu2 %1236 }
 0x592   : > { %v1192_v32 = vsel %vm1189_vm8, %v1146_v27, %v1170_v30 }
 0x593   : > { %1246 = vrot.lane.b32.xlu0 %v1196_v31, %s3294_s23  ;;  %1222 = vrot.lane.b32.xlu1 %v1196_v31, %s3293_s28 }
 0x594   : > { %1238 = vrot.lane.b32.xlu2 %v1192_v32, %s3294_s23 }
 0x597   : > { %v1211_v34 = vpop.permute.xlu1 %1210 }
 0x599   : > { %v1235_v36 = vpop.permute.xlu0 %1234 }
 0x59a   : > { %v1258_v37 = vsel %vm1189_vm8, %v1211_v34, %v1235_v36 }
 0x59b   : > { %1214 = vrot.lane.b32.xlu0 %v1192_v32, %s3293_s28  ;;  %v3677_v38 = vsel %vm3669_vm9, %v1258_v37, %v1190_v14 }
 0x59c   : > { %1314 = vrot.lane.b32.xlu2 %v3677_v38, %s3295_s27 }
 0x59f   : > { %v1156_v42 = vpop.permute.xlu1 %1155 }
 0x5a1   : > { %v1152_v43 = vpop.permute.xlu0 %1151 }
 0x5a2   : > { %v1195_v44 = vsel %vm1189_vm8, %v1152_v43, %v1176_v41 }
 0x5a3   : > { %1244 = vrot.lane.b32.xlu0 %v1195_v44, %s3294_s23  ;;  %1220 = vrot.lane.b32.xlu1 %v1195_v44, %s3293_s28 }
 0x5a7   : > { %v1172_v47 = vpop.permute.xlu1 %1171 }
 0x5a8   : > { %v3688_v49 = vsel %vm1189_vm8, %v1148_v46, %v1172_v47 }
 0x5a9   : > { %v1180_v0 = vpop.permute.xlu0 %1179 }
 0x5aa   : > { %v3691_v50 = vsel %vm1189_vm8, %v1156_v42, %v1180_v0 }
 0x5ab   : > { %1240 = vrot.lane.b32.xlu1 %v3688_v49, %s3294_s23  ;;  %1248 = vrot.lane.b32.xlu2 %v3691_v50, %s3294_s23 }
 0x5ac   : > { %1224 = vrot.lane.b32.xlu0 %v3691_v50, %s3293_s28 }
 0x5b1   : > { %v1213_v2 = vpop.permute.xlu0 %1212 }
 0x5b2   : > { %v1259_v54 = vsel %vm1189_vm8, %v1213_v2, %v1237_v53 }
 0x5b3   : > { %1216 = vrot.lane.b32.xlu2 %v3688_v49, %s3293_s28  ;;  %v1271_v55 = vsel %vm3700_vm10, %v1259_v54, %v1191_v22 }
 0x5b4   : > { %1290 = vrot.lane.b32.xlu0 %v3677_v38, %s3296_s21  ;;  %1316 = vrot.lane.b32.xlu1 %v1271_v55, %s3295_s27 }
 0x5bb   : > { %1292 = vrot.lane.b32.xlu2 %v1271_v55, %s3296_s21 }
 0x5ee   : > { %v1239_v59 = vpop.permute.xlu2 %1238 }
 0x5f6   : > { %v1315_v3 = vpop.permute.xlu2 %1314 }
 0x5fd   : > { %v1219_v56 = vpop.permute.xlu1 %1218  ;;  %v1243_v57 = vpop.permute.xlu0 %1242 }
 0x5fe   : > { %v1262_v58 = vsel %vm1189_vm8, %v1219_v56, %v1243_v57 }
 0x5ff   : > { %v1274_v60 = vsel %vm3669_vm9, %v1262_v58, %v1194_v26 }
 0x600   : > { %1322 = vrot.lane.b32.xlu2 %v1274_v60, %s3295_s27  ;;  %1298 = vrot.lane.b32.xlu0 %v1274_v60, %s3296_s21 }
 0x605   : > { %v1223_v61 = vpop.permute.xlu1 %1222  ;;  %v1247_v62 = vpop.permute.xlu0 %1246 }
 0x606   : > { %v1264_v63 = vsel %vm1189_vm8, %v1223_v61, %v1247_v62  ;;  %v1249_v7 = vpop.permute.xlu2 %1248 }
 0x607   : > { %v1276_v1 = vsel %vm3669_vm9, %v1264_v63, %v1196_v31  ;;  %v1360_v63 = vand.u32 4, %v3685_v48 }
 0x608   : > { %1326 = vrot.lane.b32.xlu2 %v1276_v1, %s3295_s27  ;;  %1302 = vrot.lane.b32.xlu0 %v1276_v1, %s3296_s21 }
 0x609   : > { %vm3814_vm15 = vcmp.ne.s32.totalorder %v1360_v63, 0 }
 0x60d   : > { %v1215_v4 = vpop.permute.xlu0 %1214 }
 0x60e   : > { %v1260_v5 = vsel %vm1189_vm8, %v1215_v4, %v1239_v59  ;;  %v1217_v13 = vpop.permute.xlu2 %1216 }
 0x60f   : > { %v1272_v6 = vsel %vm3669_vm9, %v1260_v5, %v1192_v32  ;;  %vm1930_vm9 = vcmask 195584  }
 0x610   : > { %1318 = vrot.lane.b32.xlu1 %v1272_v6, %s3295_s27  ;;  %1294 = vrot.lane.b32.xlu2 %v1272_v6, %s3296_s21 }
 0x615   : > { %v1221_v8 = vpop.permute.xlu1 %1220  ;;  %v1245_v9 = vpop.permute.xlu0 %1244 }
 0x616   : > { %v1263_v11 = vsel %vm1189_vm8, %v1221_v8, %v1245_v9  ;;  %v1293_v20 = vpop.permute.xlu2 %1292 }
 0x617   : > { %v1275_v12 = vsel %vm3700_vm10, %v1263_v11, %v1195_v44 }
 0x618   : > { %1324 = vrot.lane.b32.xlu2 %v1275_v12, %s3295_s27  ;;  %1300 = vrot.lane.b32.xlu0 %v1275_v12, %s3296_s21 }
 0x61d   : > { %v1241_v14 = vpop.permute.xlu1 %1240 }
 0x61e   : > { %v1225_v15 = vpop.permute.xlu0 %1224  ;;  %v1261_v32 = vsel %vm1189_vm8, %v1217_v13, %v1241_v14 }
 0x61f   : > { %v1265_v30 = vsel %vm1189_vm8, %v1225_v15, %v1249_v7  ;;  %v1273_v33 = vsel %vm3700_vm10, %v1261_v32, %v3688_v49 }
 0x620   : > { %v1277_v31 = vsel %vm3700_vm10, %v1265_v30, %v3691_v50 }
 0x626   : > { %v1291_v23 = vpop.permute.xlu0 %1290  ;;  %v1317_v24 = vpop.permute.xlu1 %1316 }
 0x627   : > { %v1339_v25 = vsel %vm1338_vm11, %v1291_v23, %v1315_v3  ;;  %v1340_v26 = vsel %vm1338_vm11, %v1293_v20, %v1317_v24 }
 0x628   : > { %v3748_v27 = vsel %vm3735_vm12, %v1339_v25, %v3677_v38  ;;  %v1352_v29 = vsel %vm3739_vm13, %v1340_v26, %v1271_v55 }
 0x629   : > { %1395 = vrot.lane.b32.xlu1 %v3748_v27, %s3297_s13  ;;  %1371 = vrot.lane.b32.xlu2 %v3748_v27, %s3298_s24 }
 0x62a   : > { %1397 = vrot.lane.b32.xlu0 %v1352_v29, %s3297_s13 }
 0x631   : > { %1328 = vrot.lane.b32.xlu1 %v1277_v31, %s3295_s27  ;;  %1304 = vrot.lane.b32.xlu2 %v1277_v31, %s3296_s21 }
 0x639   : > { %1320 = vrot.lane.b32.xlu1 %v1273_v33, %s3295_s27  ;;  %1296 = vrot.lane.b32.xlu2 %v1273_v33, %s3296_s21  ;;  %s560_s21 = sand.u32 1, %s3274_s22  }
 0x641   : > { %1373 = vrot.lane.b32.xlu1 %v1352_v29, %s3298_s24 }
 0x65a   : > { %v1323_v34 = vpop.permute.xlu2 %1322 }
 0x662   : > { %v1327_v38 = vpop.permute.xlu2 %1326 }
 0x66a   : > { %v1295_v44 = vpop.permute.xlu2 %1294 }
 0x672   : > { %v1299_v35 = vpop.permute.xlu0 %1298  ;;  %v1325_v49 = vpop.permute.xlu2 %1324 }
 0x673   : > { %v1343_v36 = vsel %vm1338_vm11, %v1299_v35, %v1323_v34  ;;  %v3851_v35 = vand.u32 127, %v1130_v40 }
 0x674   : > { %v3773_v37 = vsel %vm3735_vm12, %v1343_v36, %v1274_v60  ;;  %v3854_v36 = vadd.s32 1, %v3661_v28 }
 0x675   : > { %1403 = vrot.lane.b32.xlu1 %v3773_v37, %s3297_s13  ;;  %1379 = vrot.lane.b32.xlu2 %v3773_v37, %s3298_s24  ;;  %vm1559_vm4 = vcmp.le.s32.totalorder %v3851_v35, %v3661_v28  ;;  %vm1560_vm8 = vcmp.le.s32.totalorder %v3851_v35, %v3685_v48 }
 0x676   : > { %vm1563_vm3 = vcmp.eq.s32.totalorder %v3851_v35, %v3854_v36 }
 0x67a   : > { %v1303_v41 = vpop.permute.xlu0 %1302 }
 0x67b   : > { %v1345_v42 = vsel %vm1338_vm11, %v1303_v41, %v1327_v38 }
 0x67c   : > { %v3782_v43 = vsel %vm3735_vm12, %v1345_v42, %v1276_v1 }
 0x67d   : > { %1407 = vrot.lane.b32.xlu1 %v3782_v43, %s3297_s13  ;;  %1383 = vrot.lane.b32.xlu2 %v3782_v43, %s3298_s24 }
 0x682   : > { %v1319_v46 = vpop.permute.xlu1 %1318 }
 0x683   : > { %v1341_v47 = vsel %vm1338_vm11, %v1295_v44, %v1319_v46  ;;  %v1372_v53 = vpop.permute.xlu2 %1371 }
 0x684   : > { %v3791_v0 = vsel %vm3735_vm12, %v1341_v47, %v1272_v6 }
 0x685   : > { %1399 = vrot.lane.b32.xlu0 %v3791_v0, %s3297_s13  ;;  %1375 = vrot.lane.b32.xlu1 %v3791_v0, %s3298_s24 }
 0x68a   : > { %v1301_v50 = vpop.permute.xlu0 %1300 }
 0x68b   : > { %v1344_v51 = vsel %vm1338_vm11, %v1301_v50, %v1325_v49  ;;  %v1305_v55 = vpop.permute.xlu2 %1304 }
 0x68c   : > { %v1356_v52 = vsel %vm3739_vm13, %v1344_v51, %v1275_v12 }
 0x68d   : > { %1405 = vrot.lane.b32.xlu1 %v1356_v52, %s3297_s13  ;;  %1381 = vrot.lane.b32.xlu2 %v1356_v52, %s3298_s24 }
 0x693   : > { %v1297_v59 = vpop.permute.xlu2 %1296 }
 0x69b   : > { %v1396_v2 = vpop.permute.xlu1 %1395 }
 0x69c   : > { %v1420_v54 = vsel %vm1419_vm14, %v1372_v53, %v1396_v2  ;;  %v1398_v3 = vpop.permute.xlu0 %1397  ;;  %v3876_v2 = vadd.s32 1, %v3685_v48 }
 0x69e   : > { %vm1564_vm6 = vcmp.eq.s32.totalorder %v3851_v35, %v3876_v2 }
 0x6a3   : > { %v1329_v56 = vpop.permute.xlu1 %1328 }
 0x6a4   : > { %v1346_v57 = vsel %vm1338_vm11, %v1305_v55, %v1329_v56 }
 0x6a5   : > { %v1358_v58 = vsel %vm3739_vm13, %v1346_v57, %v1277_v31 }
 0x6a6   : > { %1409 = vrot.lane.b32.xlu0 %v1358_v58, %s3297_s13  ;;  %1385 = vrot.lane.b32.xlu1 %v1358_v58, %s3298_s24 }
 0x6ab   : > { %v1321_v60 = vpop.permute.xlu1 %1320 }
 0x6ac   : > { %v1342_v61 = vsel %vm1338_vm11, %v1297_v59, %v1321_v60 }
 0x6ad   : > { %v1354_v62 = vsel %vm3739_vm13, %v1342_v61, %v1273_v33  ;;  %v1636_v61 = vpop.f32.mrf.mxu0 }
 0x6ae   : > { %1401 = vrot.lane.b32.xlu0 %v1354_v62, %s3297_s13  ;;  %1377 = vrot.lane.b32.xlu1 %v1354_v62, %s3298_s24  ;;  %s2704_s13 = sshll.u32 %s560_s21, 4  ;;  %s2932_s24 = sshll.u32 %s3409_s25, 4 }
 0x6af   : > { %s2597_s29 = scalar_lea.hbm %s4185_s16, %s2932_s24  ;;  %s2586_s25 = scalar_lea.sflag [#allocation4], %s560_s21 }
 0x6b0   : > { %s2600_s20 = sshll.u32 %s2597_s29, 4  ;;  %s3232_s24 = scalar_lea.hbm %s4185_s16, 32  ;;  %s2601_s20 = int_to_ptr.hbm [resolvable:$true] %s2600_s20 }
 0x6b1   : > { %s3226_s28 = sshra.s32 %s2601_s20, 4  ;;  %s3227_s28 = int_to_ptr.hbm [resolvable:$true] %s3226_s28 }
 0x6b2   : > { %s3228_s23 = scalar_lea.hbm %s3227_s28, 16  ;;  %p3233_p3 = scmp.lt.s32.totalorder %s3227_s28, %s4185_s16 }
 0x6b3   : > { %v1374_v4 = vpop.permute.xlu1 %1373  ;;  %p3229_p0 = scmp.ne.s32.totalorder %s3227_s28, %s3228_s23  ;;  %p3234_p4 = scmp.lt.s32.totalorder %s3232_s24, %s3228_s23 }
 0x6b4   : > { %v1421_v5 = vsel %vm1419_vm14, %v1374_v4, %v1398_v3 }
 0x6b5   : > { %v1433_v6 = vsel %vm3814_vm15, %v1421_v5, %v1352_v29  ;;  %v1359_v29 = vand.u32 4, %v3661_v28  ;;  %p3230_p1 = pnand %p3229_p0, %p3426_p5  ;;  %p3235_p7 = por %p3234_p4, %p3233_p3 }
 0x6b6   : > { %1478 = vrot.lane.b32.xlu2 %v1433_v6, %s3299_s30  ;;  %1454 = vrot.lane.b32.xlu0 %v1433_v6, %s3290_s0 }
 0x6b7   : > { %vm3846_vm1 = vcmp.ne.s32.totalorder %v1359_v29, 0  ;;  %p3231_p2 = pneg %p3230_p1 }
 0x6b8   : > { %v1432_v38 = vsel %vm3846_vm1, %v1420_v54, %v3748_v27  ;;  %v1610_v27 = vpop.f32.mrf.mxu3 }
 0x6b9   : > { %v1531_v46 = vrot.slane %v1432_v38, 1  ;;  %p3236_p8 = pnand %p3235_p7, %p3231_p2 }
 0x6c0   : > { %v1612_v57 = vpop.f32.mrf.mxu3 }
 0x6cf   : > { %v1380_v7 = vpop.permute.xlu2 %1379 }
 0x6d7   : > { %v1384_v11 = vpop.permute.xlu2 %1383 }
 0x6e7   : > { %v1404_v8 = vpop.permute.xlu1 %1403  ;;  %v1382_v19 = vpop.permute.xlu2 %1381 }
 0x6e8   : > { %v1424_v9 = vsel %vm1419_vm14, %v1380_v7, %v1404_v8 }
 0x6e9   : > { %v1436_v1 = vsel %vm3846_vm1, %v1424_v9, %v3773_v37 }
 0x6ea   : > { %v1537_v6 = vrot.slane %v1436_v1, 1 }
 0x6ef   : > { %v1408_v12 = vpop.permute.xlu1 %1407 }
 0x6f0   : > { %v3825_v13 = vsel %vm1419_vm14, %v1384_v11, %v1408_v12 }
 0x6f1   : > { %v1438_v29 = vsel %vm3846_vm1, %v3825_v13, %v3782_v43 }
 0x6f7   : > { %v1376_v14 = vpop.permute.xlu1 %1375  ;;  %v1400_v15 = vpop.permute.xlu0 %1399 }
 0x6f8   : > { %v3828_v16 = vsel %vm1419_vm14, %v1376_v14, %v1400_v15 }
 0x6ff   : > { %v1406_v20 = vpop.permute.xlu1 %1405 }
 0x700   : > { %v1425_v21 = vsel %vm1419_vm14, %v1382_v19, %v1406_v20 }
 0x701   : > { %v1437_v22 = vsel %vm3814_vm15, %v1425_v21, %v1356_v52 }
 0x702   : > { %1462 = vrot.lane.b32.xlu1 %v1437_v22, %s3290_s0  ;;  %1486 = vrot.lane.b32.xlu0 %v1437_v22, %s3299_s30 }
 0x710   : > { %v1479_v41 = vpop.permute.xlu2 %1478 }
 0x718   : > { %v1386_v23 = vpop.permute.xlu1 %1385  ;;  %v1410_v24 = vpop.permute.xlu0 %1409 }
 0x719   : > { %v1427_v25 = vsel %vm1419_vm14, %v1386_v23, %v1410_v24 }
 0x71a   : > { %v1439_v26 = vsel %vm3814_vm15, %v1427_v25, %v1358_v58  ;;  %v1688_v25 = vpop.f32.mrf.mxu2 }
 0x71b   : > { %1490 = vrot.lane.b32.xlu2 %v1439_v26, %s3299_s30  ;;  %1466 = vrot.lane.b32.xlu0 %v1439_v26, %s3290_s0 }
 0x720   : > { %v1378_v30 = vpop.permute.xlu1 %1377  ;;  %v1402_v31 = vpop.permute.xlu0 %1401 }
 0x721   : > { %v1423_v32 = vsel %vm1419_vm14, %v1378_v30, %v1402_v31 }
 0x722   : > { %v1435_v33 = vsel %vm3814_vm15, %v1423_v32, %v1354_v62  ;;  %v1638_v62 = vpop.f32.mrf.mxu0  ;;  %v1540_v32 = vrot.slane %v1438_v29, 1 }
 0x723   : > { %1482 = vrot.lane.b32.xlu2 %v1435_v33, %s3299_s30  ;;  %1458 = vrot.lane.b32.xlu0 %v1435_v33, %s3290_s0 }
 0x728   : > { %v1455_v42 = vpop.permute.xlu0 %1454 }
 0x729   : > { %v1501_v44 = vsel %vm1025_vm7, %v1455_v42, %v1479_v41 }
 0x72a   : > { %v1532_v47 = vrot.slane %v1501_v44, 1  ;;  %v1662_v63 = vpop.f32.mrf.mxu0 }
 0x72c   : > { %v1533_v40 = vsel %vm1530_vm2, %v1531_v46, %v1532_v47  ;;  %v1555_v54 = vsel %vm1530_vm2, %v1532_v47, %v1531_v46  ;;  %v1690_v46 = vpop.f32.mrf.mxu2  ;;  %v1434_v47 = vsel %vm3846_vm1, %v3828_v16, %v3791_v0 }
 0x72d   : > { %v1569_v49 = vsel %vm1563_vm3, 0.0, %v1533_v40  ;;  %v1570_v55 = vsel %vm1564_vm6, 0.0, %v1555_v54 }
 0x72e   : > { %v1581_v50 = vsel %vm1559_vm4, %v1432_v38, %v1569_v49  ;;  %v1582_v56 = vsel %vm1560_vm8, %v1501_v44, %v1570_v55  ;;  %v1534_v55 = vrot.slane %v1434_v47, 1 }
 0x72f   : > { %v1611_v51 = vadd.f32 %v1610_v27, %v1581_v50  ;;  %v1613_v58 = vadd.f32 %v1612_v57, %v1582_v56 }
 0x731   : > { %v3871_v52 = vmul.f32 0.17677669, %v1611_v51  ;;  %v3889_v59 = vmul.f32 0.17677669, %v1613_v58 }
 0x732   : > { %v1664_v15 = vpop.f32.mrf.mxu0 }
 0x733   : > { %v1702_v53 = vsel %vm1701_vm5, %v3871_v52, -inf  ;;  %v1705_v60 = vsel %vm1701_vm5, %v3889_v59, -inf }
 0x734   : > { %1703 = vmax.xlane.f32.xlu1 %v1702_v53 }
 0x74d   : > { %1706 = vmax.xlane.f32.xlu0 %v1705_v60 }
 0x774   : > { %v1463_v3 = vpop.permute.xlu1 %1462  ;;  %v1487_v4 = vpop.permute.xlu0 %1486 }
 0x775   : > { %v1505_v5 = vsel %vm1025_vm7, %v1463_v3, %v1487_v4  ;;  %v1491_v26 = vpop.permute.xlu2 %1490 }
 0x776   : > { %v1538_v7 = vrot.slane %v1505_v5, 1 }
 0x778   : > { %v1557_v8 = vsel %vm1530_vm2, %v1538_v7, %v1537_v6  ;;  %v1539_v11 = vsel %vm1530_vm2, %v1537_v6, %v1538_v7 }
 0x779   : > { %v1574_v12 = vsel %vm1564_vm6, 0.0, %v1557_v8  ;;  %v1573_v14 = vsel %vm1563_vm3, 0.0, %v1539_v11 }
 0x77a   : > { %v1586_v37 = vsel %vm1560_vm8, %v1505_v5, %v1574_v12  ;;  %v1585_v9 = vsel %vm1559_vm4, %v1436_v1, %v1573_v14 }
 0x77b   : > { %v1665_v19 = vadd.f32 %v1664_v15, %v1586_v37  ;;  %v1663_v20 = vadd.f32 %v1662_v63, %v1585_v9 }
 0x77d   : > { %v1698_v21 = vmul.f32 0.17677669, %v1665_v19  ;;  %v1697_v22 = vmul.f32 0.17677669, %v1663_v20  ;;  %v1483_v27 = vpop.permute.xlu2 %1482 }
 0x77f   : > { %v1717_v23 = vsel %vm1701_vm5, %v1698_v21, -inf  ;;  %v1714_v24 = vsel %vm1701_vm5, %v1697_v22, -inf }
 0x780   : > { %1718 = vmax.xlane.f32.xlu2 %v1717_v23  ;;  %1715 = vmax.xlane.f32.xlu0 %v1714_v24 }
 0x78d   : > { %v1467_v30 = vpop.permute.xlu0 %1466 }
 0x78e   : > { %v1507_v31 = vsel %vm1025_vm7, %v1467_v30, %v1491_v26 }
 0x78f   : > { %v1541_v33 = vrot.slane %v1507_v31, 1 }
 0x791   : > { %v1558_v38 = vsel %vm1530_vm2, %v1541_v33, %v1540_v32  ;;  %v1542_v41 = vsel %vm1530_vm2, %v1540_v32, %v1541_v33 }
 0x792   : > { %v1576_v42 = vsel %vm1564_vm6, 0.0, %v1558_v38  ;;  %v1575_v44 = vsel %vm1563_vm3, 0.0, %v1542_v41 }
 0x793   : > { %v1588_v43 = vsel %vm1560_vm8, %v1507_v31, %v1576_v42  ;;  %v1587_v13 = vsel %vm1559_vm4, %v1438_v29, %v1575_v44 }
 0x794   : > { %v1691_v40 = vadd.f32 %v1690_v46, %v1588_v43  ;;  %v1689_v49 = vadd.f32 %v1688_v25, %v1587_v13 }
 0x795   : > { %v1459_v50 = vpop.permute.xlu0 %1458 }
 0x796   : > { %v1503_v51 = vsel %vm1025_vm7, %v1459_v50, %v1483_v27  ;;  %v1700_v53 = vmul.f32 0.17677669, %v1691_v40  ;;  %v1699_v54 = vmul.f32 0.17677669, %v1689_v49 }
 0x797   : > { %v1535_v56 = vrot.slane %v1503_v51, 1 }
 0x798   : > { %v1723_v57 = vsel %vm1701_vm5, %v1700_v53, -inf  ;;  %v1720_v58 = vsel %vm1701_vm5, %v1699_v54, -inf }
 0x799   : > { %1724 = vmax.xlane.f32.xlu0 %v1723_v57  ;;  %1721 = vmax.xlane.f32.xlu1 %v1720_v58  ;;  %v1536_v60 = vsel %vm1530_vm2, %v1534_v55, %v1535_v56  ;;  %v1556_v0 = vsel %vm1530_vm2, %v1535_v56, %v1534_v55 }
 0x79a   : > { %v1571_v16 = vsel %vm1563_vm3, 0.0, %v1536_v60  ;;  %v1572_v34 = vsel %vm1564_vm6, 0.0, %v1556_v0 }
 0x79b   : > { %v1583_v63 = vsel %vm1559_vm4, %v1434_v47, %v1571_v16  ;;  %v1584_v1 = vsel %vm1560_vm8, %v1503_v51, %v1572_v34  ;;  %vm2128_vm8 = vcmask 1042432  }
 0x79c   : > { %v1637_v3 = vadd.f32 %v1636_v61, %v1583_v63  ;;  %v1639_v4 = vadd.f32 %v1638_v62, %v1584_v1 }
 0x79e   : > { %v1695_v5 = vmul.f32 0.17677669, %v1637_v3  ;;  %v1696_v6 = vmul.f32 0.17677669, %v1639_v4 }
 0x7a0   : > { %v1708_v7 = vsel %vm1701_vm5, %v1695_v5, -inf  ;;  %v1711_v36 = vsel %vm1701_vm5, %v1696_v6, -inf }
 0x7a1   : > { %1709 = vmax.xlane.f32.xlu2 %v1708_v7  ;;  %1712 = vmax.xlane.f32.xlu1 %v1711_v36 }
 0x7a7   : > { %v1704_v37 = vpop.xlane.xlu1 %1703 }
 0x7a8   : > { %v1726_v51 = vsub.f32 %v3871_v52, %v1704_v37 }
 0x7ad   : > { %997 = vrot.lane.b32.xlu0 %v3621_v18, %s3290_s0 }
 0x7b9   : > { %1005 = vrot.lane.b32.xlu2 %v3621_v18, %s3291_s17 }
 0x7ba   : > { %1007 = vrot.lane.b32.xlu1 %v3619_v17, %s3291_s17  ;;  %s3301_s17 = smov 24  }
 0x7c0   : > { %v1707_v28 = vpop.xlane.xlu0 %1706 }
 0x7c1   : > { %v1727_v50 = vsub.f32 %v3889_v59, %v1707_v28 }
 0x7f3   : > { %v1719_v48 = vpop.xlane.xlu2 %1718  ;;  %v1716_v35 = vpop.xlane.xlu0 %1715 }
 0x7f4   : > { %v1731_v2 = vsub.f32 %v1698_v21, %v1719_v48  ;;  %v1730_v61 = vsub.f32 %v1697_v22, %v1716_v35 }
 0x7f6   : > { %v1744_v62 = vmul.f32 1.442695, %v1731_v2  ;;  %v1742_v8 = vmul.f32 1.442695, %v1730_v61 }
 0x7f8   : > { %3052 = vpow2.f32 %v1744_v62 }
 0x7f9   : > { %3054 = vpow2.f32 %v1742_v8 }
 0x7fe   : > { %v3961_v11 = vpop.eup %3052 }
 0x7ff   : > { %v3963_v12 = vpop.eup %3054  ;;  %v1765_v14 = vsel %vm1701_vm5, %v3961_v11, 0.0 }
 0x800   : > { %1766 = vadd.xlane.f32.xlu0 %v1765_v14  ;;  %v1762_v15 = vsel %vm1701_vm5, %v3963_v12, 0.0 }
 0x801   : > { %1763 = vadd.xlane.f32.xlu1 %v1762_v15 }
 0x80c   : > { %v1725_v9 = vpop.xlane.xlu0 %1724  ;;  %v1722_v19 = vpop.xlane.xlu1 %1721 }
 0x80d   : > { %v1733_v20 = vsub.f32 %v1700_v53, %v1725_v9  ;;  %v1732_v21 = vsub.f32 %v1699_v54, %v1722_v19  ;;  %v1736_v53 = vmul.f32 1.442695, %v1727_v50  ;;  %v1734_v54 = vmul.f32 1.442695, %v1726_v51 }
 0x80f   : > { %v1748_v22 = vmul.f32 1.442695, %v1733_v20  ;;  %v1746_v23 = vmul.f32 1.442695, %v1732_v21 }
 0x811   : > { %3056 = vpow2.f32 %v1748_v22 }
 0x812   : > { %3058 = vpow2.f32 %v1746_v23 }
 0x814   : > { %v1710_v24 = vpop.xlane.xlu2 %1709  ;;  %v1713_v25 = vpop.xlane.xlu1 %1712 }
 0x815   : > { %v1728_v26 = vsub.f32 %v1695_v5, %v1710_v24  ;;  %v1729_v29 = vsub.f32 %v1696_v6, %v1713_v25 }
 0x817   : > { %v3057_v30 = vpop.eup %3056  ;;  %v1738_v31 = vmul.f32 1.442695, %v1728_v26  ;;  %v1740_v32 = vmul.f32 1.442695, %v1729_v29 }
 0x818   : > { %v3059_v33 = vpop.eup %3058  ;;  %v1771_v38 = vsel %vm1701_vm5, %v3057_v30, 0.0 }
 0x819   : > { %3060 = vpow2.f32 %v1738_v31  ;;  %1772 = vadd.xlane.f32.xlu1 %v1771_v38  ;;  %v1768_v41 = vsel %vm1701_vm5, %v3059_v33, 0.0 }
 0x81a   : > { %3062 = vpow2.f32 %v1740_v32  ;;  %1769 = vadd.xlane.f32.xlu2 %v1768_v41 }
 0x81b   : > { %3064 = vpow2.f32 %v1736_v53 }
 0x81c   : > { %v1006_v13 = vpop.permute.xlu2 %1005  ;;  %3066 = vpow2.f32 %v1734_v54 }
 0x81d   : > { %v1881_v40 = vunpack.c.l.b16 %v1006_v13 }
 0x81f   : > { %v3061_v42 = vpop.eup %3060 }
 0x820   : > { %v3063_v44 = vpop.eup %3062  ;;  %v1756_v46 = vsel %vm1701_vm5, %v3061_v42, 0.0 }
 0x821   : > { %1757 = vadd.xlane.f32.xlu0 %v1756_v46  ;;  %v1759_v43 = vsel %vm1701_vm5, %v3063_v44, 0.0  ;;  %v3981_v55 = vpop.eup %3064 }
 0x822   : > { %1760 = vadd.xlane.f32.xlu2 %v1759_v43  ;;  %v1753_v56 = vsel %vm1701_vm5, %v3981_v55, 0.0  ;;  %v3985_v57 = vpop.eup %3066 }
 0x82c   : > { %v1008_v47 = vpop.permute.xlu1 %1007 }
 0x82d   : > { %v1882_v49 = vunpack.c.l.b16 %v1008_v47 }
 0x82f   : > { %v1883_v27 = vpack.c.b16 %v1882_v49, %v1881_v40 }
 0x831   : > { %1895 = vmatpush.bf16.msra.mxu2 %v1883_v27 }
 0x832   : > { %1003 = vrot.lane.b32.xlu1 %v3619_v17, %s3292_s18 }
 0x835   : > { %1001 = vrot.lane.b32.xlu0 %v3621_v18, %s3292_s18  ;;  %v1750_v18 = vsel %vm1701_vm5, %v3985_v57, 0.0 }
 0x83a   : > { %999 = vrot.lane.b32.xlu2 %v3619_v17, %s3290_s0  ;;  %v998_v17 = vpop.permute.xlu0 %997  ;;  %s3300_s0 = smov 16  }
 0x83b   : > { %v1829_v14 = vunpack.c.l.b16 %v998_v17 }
 0x85f   : > { %1754 = vadd.xlane.f32.xlu0 %v1753_v56 }
 0x863   : > { %1751 = vadd.xlane.f32.xlu2 %v1750_v18 }
 0x873   : > { %v1767_v58 = vpop.xlane.xlu0 %1766 }
 0x874   : > { %v1764_v59 = vpop.xlane.xlu1 %1763 }
 0x88c   : > { %v1773_v52 = vpop.xlane.xlu1 %1772 }
 0x88d   : > { %v1770_v60 = vpop.xlane.xlu2 %1769  ;;  %3068 = vrcp.f32 %v1773_v52  ;;  %v2914_v52 = vld [vmem:[%s4178_s9] sm:$0xff] }
 0x88e   : > { %3070 = vrcp.f32 %v1770_v60 }
 0x893   : > { %v3069_v0 = vpop.eup %3068 }
 0x894   : > { %v3071_v16 = vpop.eup %3070  ;;  %v1789_v34 = vmul.f32 %v3069_v0, %v3057_v30  ;;  %v1758_v63 = vpop.xlane.xlu0 %1757 }
 0x895   : > { %v1788_v1 = vmul.f32 %v3071_v16, %v3059_v33  ;;  %3072 = vrcp.f32 %v1758_v63  ;;  %v1761_v3 = vpop.xlane.xlu2 %1760 }
 0x896   : > { %v1797_v4 = vpack.c.bf16 %v1789_v34, %v1789_v34  ;;  %3074 = vrcp.f32 %v1761_v3 }
 0x897   : > { %3076 = vrcp.f32 %v1767_v58  ;;  %v1796_v5 = vpack.c.bf16 %v1788_v1, %v1788_v1 }
 0x898   : > { %3078 = vrcp.f32 %v1764_v59  ;;  %v1879_v6 = vunpack.c.l.b16 %v1797_v4 }
 0x899   : > { %v1878_v7 = vunpack.c.l.b16 %v1796_v5 }
 0x89b   : > { %v3073_v36 = vpop.eup %3072  ;;  %v1880_v28 = vpack.c.b16 %v1879_v6, %v1878_v7 }
 0x89c   : > { %v3075_v48 = vpop.eup %3074  ;;  %v1784_v35 = vmul.f32 %v3073_v36, %v3061_v42 }
 0x89d   : > { %v3077_v2 = vpop.eup %3076  ;;  %v1785_v61 = vmul.f32 %v3075_v48, %v3063_v44  ;;  %v1000_v62 = vpop.permute.xlu2 %999  ;;  %2804 = vmatmul.msk.bf16.vlgmr.msra.gmra.mxu2 %vm1701_vm5, %v1880_v28 }
 0x89e   : > { %v3079_v8 = vpop.eup %3078  ;;  %v1792_v15 = vpack.c.bf16 %v1784_v35, %v1784_v35  ;;  %v1830_v37 = vunpack.c.l.b16 %v1000_v62  ;;  %v1787_v21 = vmul.f32 %v3077_v2, %v3961_v11 }
 0x89f   : > { %v1793_v9 = vpack.c.bf16 %v1785_v61, %v1785_v61  ;;  %v1786_v22 = vmul.f32 %v3079_v8, %v3963_v12  ;;  %v4012_v8 = vld [vmem:[%s4171_s2 + $0x8] sm:$0xff] }
 0x8a0   : > { %v1826_v19 = vunpack.c.l.b16 %v1792_v15  ;;  %v1831_v20 = vpack.c.b16 %v1830_v37, %v1829_v14  ;;  %v1795_v25 = vpack.c.bf16 %v1787_v21, %v1787_v21  ;;  %v1938_v14 = vperm.slane %v4012_v8, 2 }
 0x8a1   : > { %v1827_v23 = vunpack.c.l.b16 %v1793_v9  ;;  %v1794_v26 = vpack.c.bf16 %v1786_v22, %v1786_v22 }
 0x8a2   : > { %1843 = vmatpush.bf16.msrb.mxu1 %v1831_v20  ;;  %v1853_v33 = vunpack.c.l.b16 %v1795_v25 }
 0x8a3   : > { %v1828_v24 = vpack.c.b16 %v1827_v23, %v1826_v19  ;;  %v1852_v38 = vunpack.c.l.b16 %v1794_v26 }
 0x8a4   : > { %v1004_v29 = vpop.permute.xlu1 %1003 }
 0x8a5   : > { %2802 = vmatmul.msk.bf16.vlgmr.msrb.gmra.mxu1 %vm1701_vm5, %v1828_v24  ;;  %v1856_v31 = vunpack.c.l.b16 %v1004_v29  ;;  %v1854_v42 = vpack.c.b16 %v1853_v33, %v1852_v38 }
 0x8a7   : > { %v1002_v30 = vpop.permute.xlu0 %1001 }
 0x8a8   : > { %v1855_v32 = vunpack.c.l.b16 %v1002_v30 }
 0x8aa   : > { %v1857_v41 = vpack.c.b16 %v1856_v31, %v1855_v32 }
 0x8ac   : > { %1869 = vmatpush.bf16.msrb.mxu0 %v1857_v41  ;;  %v2917_v41 = vld [vmem:[%s4179_s10 + $0x8] sm:$0xff] }
 0x8ad   : > { %2047 = vmatpush.bf16.msra.mxu1 %v2917_v41 }
 0x8af   : > { %2803 = vmatmul.msk.bf16.vlgmr.msrb.gmra.mxu0 %vm1701_vm5, %v1854_v42  ;;  %v2919_v42 = vld [vmem:[%s4180_s11 + $0x8] sm:$0xff] }
 0x8b0   : > { %2078 = vmatpush.bf16.msra.mxu0 %v2919_v42 }
 0x8d2   : > { %v1755_v11 = vpop.xlane.xlu0 %1754 }
 0x8d3   : > { %3080 = vrcp.f32 %v1755_v11 }
 0x8d6   : > { %v1752_v12 = vpop.xlane.xlu2 %1751 }
 0x8d7   : > { %3082 = vrcp.f32 %v1752_v12 }
 0x8d9   : > { %v3081_v44 = vpop.eup %3080 }
 0x8da   : > { %v1783_v46 = vmul.f32 %v3081_v44, %v3981_v55  ;;  %v2916_v44 = vld [vmem:[%s4179_s10] sm:$0xff] }
 0x8db   : > { %2048 = vmatpush.bf16.msra.mxu1 %v2916_v44 }
 0x8dc   : > { %v1791_v13 = vpack.c.bf16 %v1783_v46, %v1783_v46  ;;  %v2918_v46 = vld [vmem:[%s4180_s11] sm:$0xff] }
 0x8dd   : > { %v3083_v43 = vpop.eup %3082  ;;  %2079 = vmatpush.bf16.msra.mxu0 %v2918_v46 }
 0x8de   : > { %v1782_v47 = vmul.f32 %v3083_v43, %v3985_v57  ;;  %v1801_v49 = vunpack.c.l.b16 %v1791_v13  ;;  %v2915_v57 = vld [vmem:[%s4178_s9 + $0x8] sm:$0xff] }
 0x8df   : > { %1960 = vmatpush.bf16.msra.mxu3 %v2915_v57 }
 0x8e0   : > { %v1790_v40 = vpack.c.bf16 %v1782_v47, %v1782_v47 }
 0x8e2   : > { %v1800_v27 = vunpack.c.l.b16 %v1790_v40 }
 0x8e3   : > { %1961 = vmatpush.bf16.msra.mxu3 %v2914_v52 }
 0x8e4   : > { %v1802_v50 = vpack.c.b16 %v1801_v49, %v1800_v27 }
 0x8e6   : > { %2801 = vmatmul.msk.bf16.vlgmr.msrb.gmra.mxu3 %vm1701_vm5, %v1802_v50 }
 0x920   : > { %v1897_v18 = vpop.f32.mrf.mxu2 }
 0x922   : > { %v1845_v53 = vpop.f32.mrf.mxu1 }
 0x928   : > { %v1899_v55 = vpop.f32.mrf.mxu2 }
 0x929   : > { %v3029_v58 = vpack.i.bf16 %v1899_v55, %v1897_v18 }
 0x92a   : > { %v1847_v17 = vpop.f32.mrf.mxu1 }
 0x92b   : > { %v3024_v59 = vpack.i.bf16 %v1847_v17, %v1845_v53 }
 0x92c   : > { %v1871_v51 = vpop.f32.mrf.mxu0 }
 0x934   : > { %v1873_v54 = vpop.f32.mrf.mxu0 }
 0x935   : > { %v3019_v56 = vpack.i.bf16 %v1873_v54, %v1871_v51 }
 0x937   : > { %3020 = vrot.lane.b32.xlu1 %v3019_v56, %s3300_s0  ;;  %s562_s0 = scalar_lea.vmem [#allocation8], %s2704_s13 }
 0x938   : > { %s2598_s19 = sshll.u32 %s562_s0, 4  ;;  %s2599_s19 = int_to_ptr.vmem [resolvable:$true] %s2598_s19 }
 0x93f   : > { %3025 = vrot.lane.b32.xlu1 %v3024_v59, %s3299_s30 }
 0x947   : > { %3030 = vrot.lane.b32.xlu1 %v3029_v58, %s3301_s17  ;;  %v2014_v58 = vperm.slane %v4012_v8, 3 }
 0x969   : > { %v1819_v0 = vpop.f32.mrf.mxu3 }
 0x971   : > { %v1821_v1 = vpop.f32.mrf.mxu3 }
 0x9a9   : > { %v3021_v60 = vpop.permute.xlu1 %3020 }
 0x9aa   : > { %v3023_v5 = vunpack.i.h.bf16 %v3021_v60  ;;  %v3022_v6 = vunpack.i.l.bf16 %v3021_v60 }
 0x9b1   : > { %v3026_v16 = vpop.permute.xlu1 %3025 }
 0x9b2   : > { %v3028_v34 = vunpack.i.h.bf16 %v3026_v16  ;;  %v3027_v63 = vunpack.i.l.bf16 %v3026_v16 }
 0x9b4   : > { %v1927_v3 = vsel %vm1025_vm7, %v1821_v1, %v3028_v34  ;;  %v1926_v4 = vsel %vm1025_vm7, %v1819_v0, %v3027_v63  ;;  %v2017_v0 = vperm.slane %v4012_v8, 4 }
 0x9b5   : > { %v1928_v48 = vsel %vm1701_vm5, %v1926_v4, %v3022_v6  ;;  %v1929_v35 = vsel %vm1701_vm5, %v1927_v3, %v3023_v5  ;;  %v2059_v5 = vperm.slane %v4012_v8, 6 }
 0x9b9   : > { %v3031_v7 = vpop.permute.xlu1 %3030 }
 0x9ba   : > { %v3033_v36 = vunpack.i.h.bf16 %v3031_v7  ;;  %v3032_v28 = vunpack.i.l.bf16 %v3031_v7 }
 0x9bc   : > { %v1931_v2 = vsel %vm1930_vm9, %v1928_v48, %v3032_v28  ;;  %v1932_v61 = vsel %vm1930_vm9, %v1929_v35, %v3033_v36 }
 0x9bd   : > { %v1933_v62 = vpack.c.bf16 %v1932_v61, %v1931_v2 }
 0x9bf   : > { %2813 = vmatmul.msk.bf16.vlgmr.msra.gmra.mxu3 %vm595_vm0, %v1933_v62  ;;  %v2921_v62 = vld [vmem:[#allocation5 + $0x8] sm:$0xff] }
 0x9c0   : > { %2314 = vmatpush.bf16.msrb.mxu2 %v2921_v62 }
 0xa42   : > { %v1963_v15 = vpop.f32.mrf.mxu3 }
 0xa43   : > { %v1964_v37 = vadd.f32 %v1963_v15, %v1938_v14 }
 0xa45   : > { %v4016_v9 = vadd.f32 %v1964_v37, %v3537_v39 }
 0xa47   : > { %v1970_v19 = vsel %vm595_vm0, %v4016_v9, 0.0 }
 0xa48   : > { %1971 = vadd.xlane.f32.xlu1 %v1970_v19 }
 0xa4a   : > { %v1965_v20 = vpop.f32.mrf.mxu3 }
 0xa4b   : > { %v1966_v21 = vadd.f32 %v1965_v20, %v1938_v14  ;;  %v2920_v14 = vld [vmem:[#allocation5] sm:$0xff] }
 0xa4c   : > { %2315 = vmatpush.bf16.msrb.mxu2 %v2920_v14 }
 0xa4d   : > { %v4021_v22 = vadd.f32 %v1966_v21, %v3542_v45 }
 0xa4f   : > { %v1973_v23 = vsel %vm595_vm0, %v4021_v22, 0.0 }
 0xa50   : > { %1974 = vadd.xlane.f32.xlu2 %v1973_v23 }
 0xabb   : > { %v1972_v24 = vpop.xlane.xlu1 %1971 }
 0xabc   : > { %v1976_v25 = vmul.f32 %v1972_v24, %v3487_v10 }
 0xabe   : > { %v1978_v26 = vsub.f32 %v4016_v9, %v1976_v25  ;;  %v2025_v25 = vperm.slane %v4012_v8, 5 }
 0xac0   : > { %v1980_v39 = vmul.f32 %v1978_v26, %v1978_v26 }
 0xac2   : > { %v1982_v29 = vsel %vm595_vm0, %v1980_v39, 0.0 }
 0xac3   : > { %v1975_v30 = vpop.xlane.xlu2 %1974  ;;  %1983 = vadd.xlane.f32.xlu0 %v1982_v29 }
 0xac4   : > { %v1977_v31 = vmul.f32 %v1975_v30, %v3487_v10 }
 0xac6   : > { %v1979_v32 = vsub.f32 %v4021_v22, %v1977_v31 }
 0xac8   : > { %v1981_v45 = vmul.f32 %v1979_v32, %v1979_v32 }
 0xaca   : > { %v1985_v33 = vsel %vm595_vm0, %v1981_v45, 0.0 }
 0xacb   : > { %1986 = vadd.xlane.f32.xlu2 %v1985_v33 }
 0xb36   : > { %v1984_v38 = vpop.xlane.xlu0 %1983 }
 0xb37   : > { %v1988_v11 = vmul.f32 %v1984_v38, %v3487_v10 }
 0xb39   : > { %v1990_v12 = vadd.f32 1e-05, %v1988_v11 }
 0xb3b   : > { %3084 = vrsqrt.f32 %v1990_v12  ;;  %vm1998_vm10 = vweird.f32 %v1990_v12 }
 0xb3e   : > { %v1987_v43 = vpop.xlane.xlu2 %1986 }
 0xb3f   : > { %v1989_v13 = vmul.f32 %v1987_v43, %v3487_v10 }
 0xb41   : > { %v3085_v47 = vpop.eup %3084  ;;  %v1991_v40 = vadd.f32 1e-05, %v1989_v13  ;;  %v2137_v13 = vld [vmem:[%s4181_s12] sm:$0x7f] }
 0xb42   : > { %v1993_v49 = vmul.f32 %v3085_v47, %v1990_v12  ;;  %vm1999_vm7 = vweird.f32 %v3085_v47 }
 0xb43   : > { %3086 = vrsqrt.f32 %v1991_v40  ;;  %vm2000_vm11 = vmor %vm1998_vm10, %vm1999_vm7  ;;  %vm2008_vm13 = vweird.f32 %v1991_v40  ;;  %vm2164_vm10 = vcmask 1045504  }
 0xb44   : > { %v1994_v27 = vmul.f32 %v3085_v47, %v1993_v49 }
 0xb46   : > { %v1995_v50 = vmul.f32 0.5, %v1994_v27 }
 0xb48   : > { %v1996_v51 = vsub.f32 1.5, %v1995_v50  ;;  %v2141_v50 = vperm.slane %v2137_v13, 1 }
 0xb49   : > { %v3087_v53 = vpop.eup %3086 }
 0xb4a   : > { %v1997_v54 = vmul.f32 %v3085_v47, %v1996_v51  ;;  %v2003_v56 = vmul.f32 %v3087_v53, %v1991_v40  ;;  %vm2009_vm12 = vweird.f32 %v3087_v53 }
 0xb4b   : > { %vm2010_vm14 = vmor %vm2008_vm13, %vm2009_vm12  ;;  %vm2198_vm12 = vcmask 1043456  }
 0xb4c   : > { %v2004_v18 = vmul.f32 %v3087_v53, %v2003_v56  ;;  %v2001_v17 = vsel %vm2000_vm11, %v3085_v47, %v1997_v54  ;;  %vm2181_vm11 = vcmask 1044480  }
 0xb4d   : > { %v2012_v57 = vmul.f32 %v2001_v17, %v1978_v26  ;;  %v2174_v17 = vperm.slane %v2137_v13, 3 }
 0xb4e   : > { %v2005_v59 = vmul.f32 0.5, %v2004_v18  ;;  %v2157_v18 = vperm.slane %v2137_v13, 2 }
 0xb4f   : > { %v2015_v16 = vmul.f32 %v2014_v58, %v2012_v57  ;;  %v2224_v57 = vperm.slane %v2137_v13, 6 }
 0xb50   : > { %v2006_v55 = vsub.f32 1.5, %v2005_v59  ;;  %v2191_v59 = vperm.slane %v2137_v13, 4 }
 0xb51   : > { %v2018_v1 = vadd.f32 %v2017_v0, %v2015_v16 }
 0xb52   : > { %v2007_v52 = vmul.f32 %v3087_v53, %v2006_v55 }
 0xb54   : > { %v2011_v60 = vsel %vm2010_vm14, %v3087_v53, %v2007_v52  ;;  %v2138_v53 = vperm.slane %v2137_v13, 0 }
 0xb55   : > { %v2013_v34 = vmul.f32 %v2011_v60, %v1979_v32 }
 0xb57   : > { %v2016_v63 = vmul.f32 %v2014_v58, %v2013_v34  ;;  %v2208_v58 = vperm.slane %v2137_v13, 5 }
 0xb59   : > { %v2019_v3 = vadd.f32 %v2017_v0, %v2016_v63 }
 0xb5b   : > { %v2020_v4 = vpack.c.bf16 %v2019_v3, %v2018_v1 }
 0xb5d   : > { %2822 = vmatmul.msk.bf16.vlgmr.msra.gmra.mxu1 %vm595_vm0, %v2020_v4  ;;  %2831 = vmatmul.msk.bf16.vlgmr.msra.gmra.mxu0 %vm595_vm0, %v2020_v4 }
 0xbda   : > { %v2081_v6 = vpop.f32.mrf.mxu0  ;;  %v2050_v23 = vpop.f32.mrf.mxu1 }
 0xbdb   : > { %v2082_v7 = vadd.f32 %v2081_v6, %v2059_v5  ;;  %v2051_v32 = vadd.f32 %v2050_v23, %v2025_v25 }
 0xbdd   : > { %v2832_v36 = vmul.f32 -1.442695, %v2082_v7 }
 0xbdf   : > { %3088 = vpow2.f32 %v2832_v36 }
 0xbe2   : > { %v2083_v28 = vpop.f32.mrf.mxu0  ;;  %v2052_v46 = vpop.f32.mrf.mxu1 }
 0xbe3   : > { %v2084_v48 = vadd.f32 %v2083_v28, %v2059_v5  ;;  %v2053_v49 = vadd.f32 %v2052_v46, %v2025_v25 }
 0xbe5   : > { %v3089_v35 = vpop.eup %3088  ;;  %v2833_v2 = vmul.f32 -1.442695, %v2084_v48 }
 0xbe6   : > { %v2092_v61 = vadd.f32 1.0, %v3089_v35 }
 0xbe7   : > { %3090 = vpow2.f32 %v2833_v2 }
 0xbe8   : > { %3092 = vrcp.f32 %v2092_v61  ;;  %v2105_v24 = vand.u32 2147483648, %v2092_v61  ;;  %v2103_v39 = vand.u32 2147483647, %v2092_v61  ;;  %vm2099_vm1 = vweird.f32 %v2092_v61 }
 0xbea   : > { %v2106_v31 = vor.u32 1.1754944e-38, %v2105_v24  ;;  %vm2104_vm4 = vcmp.eq.f32.partialorder %v2103_v39, 8.507059e+37 }
 0xbed   : > { %v3091_v15 = vpop.eup %3090 }
 0xbee   : > { %v3093_v37 = vpop.eup %3092  ;;  %v2093_v19 = vadd.f32 1.0, %v3091_v15 }
 0xbef   : > { %v2095_v20 = vmul.f32 %v3093_v37, %v2092_v61  ;;  %vm2100_vm15 = vweird.f32 %v3093_v37 }
 0xbf0   : > { %3094 = vrcp.f32 %v2093_v19  ;;  %vm2101_vm3 = vmor %vm2099_vm1, %vm2100_vm15  ;;  %v2120_v11 = vand.u32 2147483648, %v2093_v19  ;;  %v2118_v44 = vand.u32 2147483647, %v2093_v19  ;;  %vm2114_vm6 = vweird.f32 %v2093_v19 }
 0xbf1   : > { %v2096_v21 = vsub.f32 1.0, %v2095_v20 }
 0xbf2   : > { %v2121_v40 = vor.u32 1.1754944e-38, %v2120_v11  ;;  %vm2119_vm7 = vcmp.eq.f32.partialorder %v2118_v44, 8.507059e+37 }
 0xbf3   : > { %v2097_v26 = vmul.f32 %v3093_v37, %v2096_v21 }
 0xbf5   : > { %v2098_v29 = vadd.f32 %v3093_v37, %v2097_v26 }
 0xbf6   : > { %v3095_v30 = vpop.eup %3094 }
 0xbf7   : > { %v2102_v45 = vsel %vm2101_vm3, %v3093_v37, %v2098_v29  ;;  %v2110_v33 = vmul.f32 %v3095_v30, %v2093_v19  ;;  %vm2115_vm5 = vweird.f32 %v3095_v30 }
 0xbf8   : > { %v2107_v38 = vsel %vm2104_vm4, %v2106_v31, %v2102_v45  ;;  %vm2116_vm9 = vmor %vm2114_vm6, %vm2115_vm5 }
 0xbf9   : > { %v2124_v41 = vmul.f32 %v2107_v38, %v2051_v32  ;;  %v2111_v42 = vsub.f32 1.0, %v2110_v33 }
 0xbfb   : > { %v2112_v12 = vmul.f32 %v3095_v30, %v2111_v42  ;;  %v2129_v43 = vrot.slane %v2124_v41, 5 }
 0xbfd   : > { %v2113_v47 = vadd.f32 %v3095_v30, %v2112_v12  ;;  %v2135_v54 = vsel %vm2128_vm8, 0.0, %v2129_v43 }
 0xbfe   : > { %v2142_v52 = vmul.f32 %v2141_v50, %v2135_v54  ;;  %v2139_v60 = vmul.f32 %v2138_v53, %v2135_v54  ;;  %v2158_v34 = vmul.f32 %v2157_v18, %v2135_v54  ;;  %v2175_v63 = vmul.f32 %v2174_v17, %v2135_v54 }
 0xbff   : > { %v2117_v27 = vsel %vm2116_vm9, %v3095_v30, %v2113_v47  ;;  %v2192_v5 = vmul.f32 %v2191_v59, %v2135_v54  ;;  %v2209_v28 = vmul.f32 %v2208_v58, %v2135_v54  ;;  %v2225_v61 = vmul.f32 %v2224_v57, %v2135_v54 }
 0xc00   : > { %v2122_v51 = vsel %vm2119_vm7, %v2121_v40, %v2117_v27  ;;  %v2148_v48 = vrot.slane %v2142_v52, 1  ;;  %v2165_v20 = vrot.slane %v2158_v34, 2  ;;  %v2182_v31 = vrot.slane %v2175_v63, 3 }
 0xc01   : > { %v2125_v56 = vmul.f32 %v2122_v51, %v2053_v49  ;;  %v2199_v12 = vrot.slane %v2192_v5, 4  ;;  %v2215_v27 = vrot.slane %v2209_v28, 5 }
 0xc03   : > { %v2130_v55 = vrot.slane %v2125_v56, 5 }
 0xc05   : > { %v2131_v0 = vsel %vm2128_vm8, %v2129_v43, %v2130_v55  ;;  %v2136_v16 = vsel %vm2128_vm8, %v2130_v55, 0.0 }
 0xc06   : > { %v2144_v1 = vmul.f32 %v2141_v50, %v2136_v16  ;;  %v2160_v3 = vmul.f32 %v2157_v18, %v2136_v16  ;;  %v2177_v4 = vmul.f32 %v2174_v17, %v2136_v16  ;;  %v2143_v6 = vmul.f32 %v2141_v50, %v2131_v0 }
 0xc07   : > { %v2159_v7 = vmul.f32 %v2157_v18, %v2131_v0  ;;  %v2176_v36 = vmul.f32 %v2174_v17, %v2131_v0  ;;  %v2193_v2 = vmul.f32 %v2191_v59, %v2131_v0  ;;  %v2194_v37 = vmul.f32 %v2191_v59, %v2136_v16  ;;  %v4068_v17 = vld [vmem:[%s4171_s2 + $0x10] sm:$0x7f] }
 0xc08   : > { %v2151_v35 = vrot.slane %v2144_v1, 1  ;;  %v2168_v62 = vrot.slane %v2160_v3, 2  ;;  %v2149_v14 = vrot.slane %v2143_v6, 1  ;;  %v2140_v19 = vmul.f32 %v2138_v53, %v2131_v0 }
 0xc09   : > { %v2166_v15 = vrot.slane %v2159_v7, 2  ;;  %v2183_v21 = vrot.slane %v2176_v36, 3  ;;  %v2185_v23 = vrot.slane %v2177_v4, 3  ;;  %v2210_v26 = vmul.f32 %v2208_v58, %v2131_v0 }
 0xc0a   : > { %v2150_v24 = vsel %vm1530_vm2, %v2148_v48, %v2149_v14  ;;  %v2152_v25 = vsel %vm1530_vm2, %v2149_v14, %v2151_v35  ;;  %v2211_v39 = vmul.f32 %v2208_v58, %v2136_v16  ;;  %v2200_v32 = vrot.slane %v2193_v2, 4 }
 0xc0b   : > { %v2155_v29 = vadd.f32 %v2150_v24, %v2139_v60  ;;  %v2156_v30 = vadd.f32 %v2152_v25, %v2140_v19  ;;  %v2167_v45 = vsel %vm2164_vm10, %v2165_v20, %v2166_v15  ;;  %v2169_v33 = vsel %vm2164_vm10, %v2166_v15, %v2168_v62 }
 0xc0c   : > { %v2202_v38 = vrot.slane %v2194_v37, 4  ;;  %v2226_v41 = vmul.f32 %v2224_v57, %v2131_v0  ;;  %v2227_v44 = vmul.f32 %v2224_v57, %v2136_v16  ;;  %v2184_v46 = vsel %vm2181_vm11, %v2182_v31, %v2183_v21 }
 0xc0d   : > { %v2172_v42 = vadd.f32 %v2167_v45, %v2155_v29  ;;  %v2173_v11 = vadd.f32 %v2169_v33, %v2156_v30  ;;  %v2186_v43 = vsel %vm2181_vm11, %v2183_v21, %v2185_v23  ;;  %v2216_v13 = vrot.slane %v2210_v26, 5 }
 0xc0e   : > { %v2218_v47 = vrot.slane %v2211_v39, 5  ;;  %v2201_v50 = vsel %vm2198_vm12, %v2199_v12, %v2200_v32  ;;  %v2203_v51 = vsel %vm2198_vm12, %v2200_v32, %v2202_v38  ;;  %v2233_v53 = vrot.slane %v2226_v41, 6 }
 0xc0f   : > { %v2189_v40 = vadd.f32 %v2184_v46, %v2172_v42  ;;  %v2190_v49 = vadd.f32 %v2186_v43, %v2173_v11  ;;  %v2235_v54 = vrot.slane %v2227_v44, 6  ;;  %vm2231_vm2 = vcmask 1041408  }
 0xc10   : > { %v2217_v59 = vsel %vm2128_vm8, %v2215_v27, %v2216_v13  ;;  %v2219_v55 = vsel %vm2128_vm8, %v2216_v13, %v2218_v47  ;;  %v2232_v58 = vrot.slane %v2225_v61, 6  ;;  %v2241_v60 = vperm.slane %v4012_v8, 7 }
 0xc11   : > { %v2206_v56 = vadd.f32 %v2201_v50, %v2189_v40  ;;  %v2207_v18 = vadd.f32 %v2203_v51, %v2190_v49  ;;  %v2236_v16 = vsel %vm2231_vm2, %v2233_v53, %v2235_v54  ;;  %v2244_v1 = vperm.slane %v4068_v17, 0 }
 0xc12   : > { %v2234_v0 = vsel %vm2231_vm2, %v2232_v58, %v2233_v53  ;;  %v2292_v11 = vperm.slane %v4068_v17, 1 }
 0xc13   : > { %v2222_v57 = vadd.f32 %v2217_v59, %v2206_v56  ;;  %v2223_v52 = vadd.f32 %v2219_v55, %v2207_v18 }
 0xc15   : > { %v2239_v34 = vadd.f32 %v2234_v0, %v2222_v57  ;;  %v2240_v63 = vadd.f32 %v2236_v16, %v2223_v52  ;;  %v2923_v52 = vld [vmem:[#allocation7 + $0x8] sm:$0xff] }
 0xc16   : > { %2417 = vmatpush.bf16.msrb.mxu3 %v2923_v52 }
 0xc17   : > { %v2242_v3 = vmul.f32 %v2241_v60, %v2239_v34  ;;  %v2243_v4 = vmul.f32 %v2241_v60, %v2240_v63  ;;  %v2922_v60 = vld [vmem:[#allocation7] sm:$0xff] }
 0xc19   : > { %v2245_v5 = vadd.f32 %v2244_v1, %v2242_v3  ;;  %v2246_v6 = vadd.f32 %v2244_v1, %v2243_v4 }
 0xc1a   : > { %2418 = vmatpush.bf16.msrb.mxu3 %v2922_v60 }
 0xc1b   : > { %v2834_v7 = vmul.f32 -1.442695, %v2245_v5  ;;  %v2835_v36 = vmul.f32 -1.442695, %v2246_v6 }
 0xc1d   : > { %3096 = vpow2.f32 %v2834_v7 }
 0xc1e   : > { %3098 = vpow2.f32 %v2835_v36 }
 0xc23   : > { %v3097_v28 = vpop.eup %3096 }
 0xc24   : > { %v3099_v48 = vpop.eup %3098  ;;  %v2253_v35 = vadd.f32 1.0, %v3097_v28 }
 0xc25   : > { %v2254_v2 = vadd.f32 1.0, %v3099_v48 }
 0xc26   : > { %3100 = vrcp.f32 %v2253_v35  ;;  %v2266_v37 = vand.u32 2147483648, %v2253_v35  ;;  %v2264_v21 = vand.u32 2147483647, %v2253_v35  ;;  %vm2260_vm15 = vweird.f32 %v2253_v35 }
 0xc27   : > { %3102 = vrcp.f32 %v2254_v2  ;;  %v2281_v23 = vand.u32 2147483648, %v2254_v2  ;;  %v2279_v25 = vand.u32 2147483647, %v2254_v2  ;;  %vm2275_vm3 = vweird.f32 %v2254_v2 }
 0xc28   : > { %v2267_v39 = vor.u32 1.1754944e-38, %v2266_v37  ;;  %vm2265_vm4 = vcmp.eq.f32.partialorder %v2264_v21, 8.507059e+37 }
 0xc29   : > { %v2282_v31 = vor.u32 1.1754944e-38, %v2281_v23  ;;  %vm2280_vm6 = vcmp.eq.f32.partialorder %v2279_v25, 8.507059e+37  ;;  %v2931_v25 = vld [vmem:[%s4184_s15 + $0x38] sm:$0xff] }
 0xc2a   : > { %2515 = vmatpush.bf16.msrb.mxu1 %v2931_v25 }
 0xc2c   : > { %v3101_v8 = vpop.eup %3100 }
 0xc2d   : > { %v3103_v61 = vpop.eup %3102  ;;  %v2256_v62 = vmul.f32 %v3101_v8, %v2253_v35  ;;  %vm2261_vm13 = vweird.f32 %v3101_v8 }
 0xc2e   : > { %v2271_v14 = vmul.f32 %v3103_v61, %v2254_v2  ;;  %vm2276_vm14 = vweird.f32 %v3103_v61  ;;  %vm2262_vm1 = vmor %vm2260_vm15, %vm2261_vm13 }
 0xc2f   : > { %v2257_v15 = vsub.f32 1.0, %v2256_v62  ;;  %vm2277_vm5 = vmor %vm2275_vm3, %vm2276_vm14 }
 0xc30   : > { %v2272_v19 = vsub.f32 1.0, %v2271_v14 }
 0xc31   : > { %v2258_v20 = vmul.f32 %v3101_v8, %v2257_v15  ;;  %v2391_v15 = vperm.slane %v4068_v17, 3 }
 0xc32   : > { %v2273_v24 = vmul.f32 %v3103_v61, %v2272_v19 }
 0xc33   : > { %v2259_v26 = vadd.f32 %v3101_v8, %v2258_v20 }
 0xc34   : > { %v2274_v29 = vadd.f32 %v3103_v61, %v2273_v24 }
 0xc35   : > { %v2263_v30 = vsel %vm2262_vm1, %v3101_v8, %v2259_v26  ;;  %v2388_v8 = vperm.slane %v4068_v17, 2  ;;  %v2930_v26 = vld [vmem:[%s4184_s15 + $0x30] sm:$0xff] }
 0xc36   : > { %v2268_v32 = vsel %vm2265_vm4, %v2267_v39, %v2263_v30  ;;  %v2278_v45 = vsel %vm2277_vm5, %v3103_v61, %v2274_v29  ;;  %2516 = vmatpush.bf16.msrb.mxu1 %v2930_v26  ;;  %v2929_v39 = vld [vmem:[%s4184_s15 + $0x28] sm:$0xff]  ;;  %v2928_v29 = vld [vmem:[%s4184_s15 + $0x20] sm:$0xff] }
 0xc37   : > { %v2283_v33 = vsel %vm2280_vm6, %v2282_v31, %v2278_v45  ;;  %v2285_v38 = vmul.f32 %v2268_v32, %v2245_v5  ;;  %v3121_v30 = vld [vmem:[#allocation2] sm:$0x3]  ;;  %v2927_v45 = vld [vmem:[%s4184_s15 + $0x18] sm:$0xff] }
 0xc38   : > { %v2286_v41 = vmul.f32 %v2283_v33, %v2246_v6  ;;  %v2395_v31 = vperm.slane %v3121_v30, 1 }
 0xc3a   : > { %v2287_v42 = vpack.c.bf16 %v2286_v41, %v2285_v38  ;;  %2517 = vmatpush.bf16.msrb.mxu1 %v2929_v39  ;;  %v2926_v41 = vld [vmem:[%s4184_s15 + $0x10] sm:$0xff] }
 0xc3c   : > { %2844 = vmatmul.msk.bf16.vlgmr.msrb.gmra.mxu2 %vm595_vm0, %v2287_v42 }
 0xc3e   : > { %2518 = vmatpush.bf16.msrb.mxu1 %v2928_v29 }
 0xc42   : > { %2519 = vmatpush.bf16.msrb.mxu1 %v2927_v45 }
 0xc46   : > { %2520 = vmatpush.bf16.msrb.mxu1 %v2926_v41 }
 0xcbf   : > { %v2317_v12 = vpop.f32.mrf.mxu2 }
 0xcc0   : > { %v2318_v44 = vadd.f32 %v2317_v12, %v2292_v11 }
 0xcc2   : > { %v4077_v46 = vadd.f32 %v2318_v44, %v4016_v9  ;;  %v2924_v44 = vld [vmem:[%s4184_s15] sm:$0xff] }
 0xcc4   : > { %v2344_v43 = vsel %vm595_vm0, %v4077_v46, 0.0 }
 0xcc5   : > { %2345 = vadd.xlane.f32.xlu0 %v2344_v43 }
 0xcc7   : > { %v2319_v13 = vpop.f32.mrf.mxu2 }
 0xcc8   : > { %v2320_v47 = vadd.f32 %v2319_v13, %v2292_v11  ;;  %v2925_v11 = vld [vmem:[%s4184_s15 + $0x8] sm:$0xff] }
 0xcc9   : > { %2521 = vmatpush.bf16.msrb.mxu1 %v2925_v11 }
 0xcca   : > { %v4082_v40 = vadd.f32 %v2320_v47, %v4021_v22 }
 0xccc   : > { %v2347_v49 = vsel %vm595_vm0, %v4082_v40, 0.0 }
 0xccd   : > { %2348 = vadd.xlane.f32.xlu2 %v2347_v49  ;;  %2522 = vmatpush.bf16.msrb.mxu1 %v2924_v44 }
 0xd38   : > { %v2346_v27 = vpop.xlane.xlu0 %2345 }
 0xd39   : > { %v2350_v50 = vmul.f32 %v2346_v27, %v3487_v10 }
 0xd3b   : > { %v2352_v51 = vsub.f32 %v4077_v46, %v2350_v50 }
 0xd3d   : > { %v2354_v9 = vmul.f32 %v2352_v51, %v2352_v51 }
 0xd3f   : > { %v2356_v53 = vsel %vm595_vm0, %v2354_v9, 0.0 }
 0xd40   : > { %v2349_v54 = vpop.xlane.xlu2 %2348  ;;  %2357 = vadd.xlane.f32.xlu0 %v2356_v53 }
 0xd41   : > { %v2351_v56 = vmul.f32 %v2349_v54, %v3487_v10 }
 0xd43   : > { %v2353_v18 = vsub.f32 %v4082_v40, %v2351_v56 }
 0xd45   : > { %v2355_v22 = vmul.f32 %v2353_v18, %v2353_v18 }
 0xd47   : > { %v2359_v59 = vsel %vm595_vm0, %v2355_v22, 0.0 }
 0xd48   : > { %2360 = vadd.xlane.f32.xlu2 %v2359_v59 }
 0xdb3   : > { %v2358_v55 = vpop.xlane.xlu0 %2357 }
 0xdb4   : > { %v2362_v58 = vmul.f32 %v2358_v55, %v3487_v10 }
 0xdb6   : > { %v2364_v57 = vadd.f32 1e-05, %v2362_v58 }
 0xdb8   : > { %3104 = vrsqrt.f32 %v2364_v57  ;;  %vm2372_vm9 = vweird.f32 %v2364_v57 }
 0xdbb   : > { %v2361_v0 = vpop.xlane.xlu2 %2360 }
 0xdbc   : > { %v2363_v16 = vmul.f32 %v2361_v0, %v3487_v10 }
 0xdbe   : > { %v3105_v34 = vpop.eup %3104  ;;  %v2365_v63 = vadd.f32 1e-05, %v2363_v16 }
 0xdbf   : > { %v2367_v1 = vmul.f32 %v3105_v34, %v2364_v57  ;;  %vm2373_vm8 = vweird.f32 %v3105_v34 }
 0xdc0   : > { %3106 = vrsqrt.f32 %v2365_v63  ;;  %vm2374_vm7 = vmor %vm2372_vm9, %vm2373_vm8  ;;  %vm2382_vm11 = vweird.f32 %v2365_v63 }
 0xdc1   : > { %v2368_v3 = vmul.f32 %v3105_v34, %v2367_v1 }
 0xdc3   : > { %v2369_v4 = vmul.f32 0.5, %v2368_v3 }
 0xdc5   : > { %v2370_v5 = vsub.f32 1.5, %v2369_v4 }
 0xdc6   : > { %v3107_v6 = vpop.eup %3106 }
 0xdc7   : > { %v2371_v7 = vmul.f32 %v3105_v34, %v2370_v5  ;;  %v2377_v36 = vmul.f32 %v3107_v6, %v2365_v63  ;;  %vm2383_vm10 = vweird.f32 %v3107_v6 }
 0xdc8   : > { %vm2384_vm12 = vmor %vm2382_vm11, %vm2383_vm10 }
 0xdc9   : > { %v2378_v28 = vmul.f32 %v3107_v6, %v2377_v36  ;;  %v2375_v48 = vsel %vm2374_vm7, %v3105_v34, %v2371_v7  ;;  %v2466_v7 = vperm.slane %v4068_v17, 4 }
 0xdca   : > { %v2386_v61 = vmul.f32 %v2375_v48, %v2352_v51 }
 0xdcb   : > { %v2379_v35 = vmul.f32 0.5, %v2378_v28 }
 0xdcc   : > { %v2389_v37 = vmul.f32 %v2388_v8, %v2386_v61 }
 0xdcd   : > { %v2380_v2 = vsub.f32 1.5, %v2379_v35 }
 0xdce   : > { %v2392_v21 = vadd.f32 %v2391_v15, %v2389_v37 }
 0xdcf   : > { %v2381_v62 = vmul.f32 %v3107_v6, %v2380_v2 }
 0xdd1   : > { %v2385_v14 = vsel %vm2384_vm12, %v3107_v6, %v2381_v62 }
 0xdd2   : > { %v2387_v19 = vmul.f32 %v2385_v14, %v2353_v18 }
 0xdd4   : > { %v2390_v20 = vmul.f32 %v2388_v8, %v2387_v19 }
 0xdd6   : > { %v2393_v23 = vadd.f32 %v2391_v15, %v2390_v20 }
 0xdd8   : > { %v2394_v24 = vpack.c.bf16 %v2393_v23, %v2392_v21 }
 0xdda   : > { %2853 = vmatmul.msk.bf16.vlgmr.msrb.gmra.mxu3 %vm595_vm0, %v2394_v24 }
 0xe5d   : > { %v2420_v32 = vpop.f32.mrf.mxu3 }
 0xe5e   : > { %v2421_v33 = vadd.f32 %v2420_v32, %v2395_v31 }
 0xe60   : > { %v2854_v38 = vmul.f32 -1.442695, %v2421_v33 }
 0xe62   : > { %3108 = vpow2.f32 %v2854_v38 }
 0xe65   : > { %v2422_v42 = vpop.f32.mrf.mxu3 }
 0xe66   : > { %v2423_v12 = vadd.f32 %v2422_v42, %v2395_v31 }
 0xe68   : > { %v3109_v43 = vpop.eup %3108  ;;  %v2855_v13 = vmul.f32 -1.442695, %v2423_v12 }
 0xe69   : > { %v2431_v47 = vadd.f32 1.0, %v3109_v43 }
 0xe6a   : > { %3110 = vpow2.f32 %v2855_v13  ;;  %v2577_v13 = vperm.slane %v4068_v17, 5 }
 0xe6b   : > { %3112 = vrcp.f32 %v2431_v47  ;;  %v2444_v22 = vand.u32 2147483648, %v2431_v47  ;;  %vm2438_vm13 = vweird.f32 %v2431_v47  ;;  %v2442_v59 = vand.u32 2147483647, %v2431_v47 }
 0xe6d   : > { %v2445_v0 = vor.u32 1.1754944e-38, %v2444_v22  ;;  %vm2443_vm1 = vcmp.eq.f32.partialorder %v2442_v59, 8.507059e+37 }
 0xe70   : > { %v3111_v49 = vpop.eup %3110 }
 0xe71   : > { %v3113_v27 = vpop.eup %3112  ;;  %v2432_v50 = vadd.f32 1.0, %v3111_v49 }
 0xe72   : > { %v2434_v51 = vmul.f32 %v3113_v27, %v2431_v47  ;;  %vm2439_vm2 = vweird.f32 %v3113_v27 }
 0xe73   : > { %3114 = vrcp.f32 %v2432_v50  ;;  %vm2440_vm14 = vmor %vm2438_vm13, %vm2439_vm2  ;;  %v2459_v58 = vand.u32 2147483648, %v2432_v50  ;;  %v2457_v60 = vand.u32 2147483647, %v2432_v50  ;;  %vm2453_vm3 = vweird.f32 %v2432_v50 }
 0xe74   : > { %v2435_v9 = vsub.f32 1.0, %v2434_v51 }
 0xe75   : > { %v2460_v63 = vor.u32 1.1754944e-38, %v2459_v58  ;;  %vm2458_vm5 = vcmp.eq.f32.partialorder %v2457_v60, 8.507059e+37 }
 0xe76   : > { %v2436_v53 = vmul.f32 %v3113_v27, %v2435_v9 }
 0xe78   : > { %v2437_v56 = vadd.f32 %v3113_v27, %v2436_v53 }
 0xe79   : > { %v3115_v54 = vpop.eup %3114 }
 0xe7a   : > { %v2449_v18 = vmul.f32 %v3115_v54, %v2432_v50  ;;  %v2441_v57 = vsel %vm2440_vm14, %v3113_v27, %v2437_v56  ;;  %vm2454_vm15 = vweird.f32 %v3115_v54 }
 0xe7b   : > { %v2446_v34 = vsel %vm2443_vm1, %v2445_v0, %v2441_v57  ;;  %vm2455_vm4 = vmor %vm2453_vm3, %vm2454_vm15 }
 0xe7c   : > { %v2450_v55 = vsub.f32 1.0, %v2449_v18  ;;  %v2463_v4 = vmul.f32 %v2446_v34, %v2421_v33 }
 0xe7e   : > { %v2451_v52 = vmul.f32 %v3115_v54, %v2450_v55 }
 0xe80   : > { %v2452_v16 = vadd.f32 %v3115_v54, %v2451_v52 }
 0xe82   : > { %v2456_v1 = vsel %vm2455_vm4, %v3115_v54, %v2452_v16 }
 0xe83   : > { %v2461_v3 = vsel %vm2458_vm5, %v2460_v63, %v2456_v1 }
 0xe84   : > { %v2464_v5 = vmul.f32 %v2461_v3, %v2423_v12 }
 0xe86   : > { %v2465_v6 = vpack.c.bf16 %v2464_v5, %v2463_v4 }
 0xe88   : > { %2523 = vmatmul.bf16.vlgmr.msrb.gmra.mxu1 %v2465_v6 }
 0xf05   : > { %v2524_v36 = vpop.f32.mrf.mxu1 }
 0xf06   : > { %v2525_v28 = vadd.f32 %v2524_v36, %v2466_v7 }
 0xf08   : > { %v2529_v48 = vmul.f32 0.5, %v2525_v28 }
 0xf0a   : > { %v2531_v35 = vadd.f32 %v2529_v48, %v4077_v46 }
 0xf0c   : > { %v2533_v2 = vsel %vm595_vm0, %v2531_v35, 0.0 }
 0xf0d   : > { %v2526_v8 = vpop.f32.mrf.mxu1  ;;  %2534 = vadd.xlane.f32.xlu0 %v2533_v2 }
 0xf0e   : > { %v2527_v61 = vadd.f32 %v2526_v8, %v2466_v7 }
 0xf10   : > { %v2530_v62 = vmul.f32 0.5, %v2527_v61 }
 0xf12   : > { %v2532_v14 = vadd.f32 %v2530_v62, %v4082_v40 }
 0xf14   : > { %v2536_v15 = vsel %vm595_vm0, %v2532_v14, 0.0 }
 0xf15   : > { %2537 = vadd.xlane.f32.xlu1 %v2536_v15 }
 0xf80   : > { %v2535_v37 = vpop.xlane.xlu0 %2534 }
 0xf81   : > { %v2539_v19 = vmul.f32 %v2535_v37, %v3487_v10 }
 0xf83   : > { %v2541_v20 = vsub.f32 %v2531_v35, %v2539_v19 }
 0xf85   : > { %v2543_v21 = vmul.f32 %v2541_v20, %v2541_v20 }
 0xf87   : > { %v2545_v23 = vsel %vm595_vm0, %v2543_v21, 0.0 }
 0xf88   : > { %v2538_v24 = vpop.xlane.xlu1 %2537  ;;  %2546 = vadd.xlane.f32.xlu2 %v2545_v23 }
 0xf89   : > { %v2540_v46 = vmul.f32 %v2538_v24, %v3487_v10 }
 0xf8b   : > { %v2542_v25 = vsub.f32 %v2532_v14, %v2540_v46 }
 0xf8d   : > { %v2544_v26 = vmul.f32 %v2542_v25, %v2542_v25 }
 0xf8f   : > { %v2548_v39 = vsel %vm595_vm0, %v2544_v26, 0.0 }
 0xf90   : > { %2549 = vadd.xlane.f32.xlu0 %v2548_v39 }
 0xffb   : > { %v2547_v40 = vpop.xlane.xlu2 %2546 }
 0xffc   : > { %v2551_v29 = vmul.f32 %v2547_v40, %v3487_v10 }
 0xffe   : > { %v2553_v30 = vadd.f32 1e-05, %v2551_v29 }
0x1000   : > { %3116 = vrsqrt.f32 %v2553_v30  ;;  %vm2561_vm8 = vweird.f32 %v2553_v30 }
0x1003   : > { %v2550_v31 = vpop.xlane.xlu0 %2549 }
0x1004   : > { %v2552_v32 = vmul.f32 %v2550_v31, %v3487_v10  ;;  %v2580_v10 = vperm.slane %v4068_v17, 6 }
0x1006   : > { %v3117_v45 = vpop.eup %3116  ;;  %v2554_v33 = vadd.f32 1e-05, %v2552_v32 }
0x1007   : > { %v2556_v38 = vmul.f32 %v3117_v45, %v2553_v30  ;;  %vm2562_vm6 = vweird.f32 %v3117_v45 }
0x1008   : > { %3118 = vrsqrt.f32 %v2554_v33  ;;  %vm2563_vm9 = vmor %vm2561_vm8, %vm2562_vm6  ;;  %vm2571_vm10 = vweird.f32 %v2554_v33 }
0x1009   : > { %v2557_v41 = vmul.f32 %v3117_v45, %v2556_v38 }
0x100b   : > { %v2558_v42 = vmul.f32 0.5, %v2557_v41 }
0x100d   : > { %v2559_v11 = vsub.f32 1.5, %v2558_v42 }
0x100e   : > { %v3119_v12 = vpop.eup %3118 }
0x100f   : > { %v2560_v44 = vmul.f32 %v3117_v45, %v2559_v11  ;;  %v2566_v43 = vmul.f32 %v3119_v12, %v2554_v33  ;;  %vm2572_vm7 = vweird.f32 %v3119_v12 }
0x1010   : > { %vm2573_vm11 = vmor %vm2571_vm10, %vm2572_vm7 }
0x1011   : > { %v2564_v47 = vsel %vm2563_vm9, %v3117_v45, %v2560_v44  ;;  %v2567_v49 = vmul.f32 %v3119_v12, %v2566_v43 }
0x1012   : > { %v2575_v27 = vmul.f32 %v2564_v47, %v2541_v20 }
0x1013   : > { %v2568_v50 = vmul.f32 0.5, %v2567_v49 }
0x1014   : > { %v2578_v51 = vmul.f32 %v2577_v13, %v2575_v27 }
0x1015   : > { %v2569_v9 = vsub.f32 1.5, %v2568_v50 }
0x1016   : > { %v2581_v53 = vadd.f32 %v2580_v10, %v2578_v51 }
0x1017   : > { %v2570_v54 = vmul.f32 %v3119_v12, %v2569_v9 }
0x1018   : > { %2583 = vst.msk [vmem:[%s562_s0] sm:$0xff] %vm595_vm0, %v2581_v53 }
0x1019   : > { %v2574_v17 = vsel %vm2573_vm11, %v3119_v12, %v2570_v54 }
0x101a   : > { %v2576_v56 = vmul.f32 %v2574_v17, %v2542_v25 }
0x101c   : > { %v2579_v18 = vmul.f32 %v2577_v13, %v2576_v56 }
0x101e   : > { %v2582_v22 = vadd.f32 %v2580_v10, %v2579_v18 }
0x1020   : > { %2584 = vst.msk [vmem:[%s562_s0 + $0x8] sm:$0xff] %vm595_vm0, %v2582_v22 }
0x1021   : > { %3239 = shalt.err (!%p3236_p8)
}
0x1022   : > { %s3302_s21 = smov 128  }
0x1023   : > { %2945 = dma.vmem_to_hbm [thread:$0]  (%p3426_p5), %s2599_s19, 256, %s2601_s20, %s2586_s25, %s3302_s21, %s3302_s21, %s3299_s30  }
0x1024 PF: > { %s4224_s0 = sld [smem:[#allocation14_spill]] }
0x1025   : > { %s4225_s29 = sld [smem:[#allocation12_spill]] }
0x102a   : > { %p2967_p9 = scmp.ge.s32.totalorder %s4224_s0, 2 }
0x102b   : > { %s2615_s27 = sand.u32 1, %s4225_s29  }
0x102c   : > { %p2958_p10 = pnand %p2967_p9, %p3430_p6  ;;  %s2616_s13 = scalar_lea.sflag [#allocation4], %s2615_s27 }
0x102e   : > { %p2959_p11 = pneg %p2958_p10 }
0x1030   : > { %3265 = dma.done.wait (%p2959_p11), %s2616_s13, 256  }
0x1031   : > { %3267 = vsyncadd (%p2959_p11), %s2616_s13, 4294967040  ;;  %s4227_s24 = sld [smem:[#allocation15_spill]]  ;;  %s4230_s21 = smov %s3274_s22 }
0x1032   : > { %s4228_s28 = sld [smem:[#allocation13_spill]] }
0x1033   : > { %s4229_s23 = sld [smem:[#allocation16_spill]] }
0x1037   : > { %p28_p12 = scmp.ge.s32.totalorder %s4227_s24, 4  }
0x1038   : > { %s4231_s22 = smov %s4228_s28 }
0x1039   :  { %30 = sbr.rel (!%p28_p12) target bundleno = 9 (0x9), region = 132 }
0x103e   :  { %2622 = vsyncpa [#allocation3], 1 }
0x103f   :  { %2624 = vsyncpa [#allocation3 + $0x1], 1 }
0x1040   :  { %2625 = vsyncpa [#allocation6], 1 }
0x1041   :  { %2626 = vsyncpa [#allocation4], 1 }
0x1042   :  { %2628 = vsyncpa [#allocation4 + $0x1], 1 }

</bundles_post_ra>
